<compile_context>
chip_gen: v7x
topology: tpu7x:2x2x1
jax: 0.10.0
libtpu: 0.0.40
codegen_flags: <defaults>
</compile_context>

<pallas_src>
import itertools
import math

import numpy as np
import jax
import jax.numpy as jnp
from jax.experimental import pallas as pl
from jax.experimental.pallas import tpu as pltpu


def _make_ola_kernel(*, n_src, window_size, hop_size, batch, cb, perms):
    overlap = window_size - hop_size
    n_perms = len(perms)
    body_len = cb * hop_size  # samples finalized per grid step

    def kernel(chunk_ref, w_ref, b_ref, win_ref, o_ref, acc_ref, carry_ref, ps_ref):
        k = pl.program_id(0)

        @pl.when(k == 0)
        def _init():
            carry_ref[...] = jnp.zeros_like(carry_ref)
            ps_ref[...] = jnp.zeros_like(ps_ref)      # zero prev tails => identity perm at chunk 0

        # Local OLA accumulator for this step: head <- carried tail from previous step, rest <- 0.
        acc_ref[...] = jnp.zeros_like(acc_ref)
        acc_ref[:, :, 0:overlap] = carry_ref[...]

        # ---- fused nnet: all CB chunks x all n_src sources in ONE MXU matmul ------------
        # y_all[c*batch + b, s*window + t] = sum_w chunk[c,b,w] * W[s,w,t] + bias[s,t]
        y_all = jnp.dot(chunk_ref[...], w_ref[...],
                        preferred_element_type=jnp.float32) + b_ref[...]
        # NOTE: kept f32 so the (discrete) permutation decision is bit-stable vs the
        # reference; on v6e/v7x a bf16 cast of chunk/W here is a further MXU win.

        win = win_ref[...]                                     # (1, window)
        ps_cols = [ps_ref[:, i:i + 1] for i in range(n_src)]   # prev windowed-tail sums, (batch,1)

        # ---- sequential per-chunk reorder + window + overlap-add ------------------------
        for j in range(cb):                                    # static unroll, CB is small
            y_j = y_all[j * batch:(j + 1) * batch, :]          # (batch, n_src*window)

            # head sums of the current (pre-window) chunk, per source: one lane-reduce each
            cs_cols = [
                jnp.sum(y_j[:, s * window_size:s * window_size + overlap],
                        axis=1, keepdims=True)
                for s in range(n_src)
            ]

            # asteroid find_best_perm semantics:
            #   loss(p) = sum_{b,i} cs[b, p[i]] * ps[b, i]   (argmin, first-min tie break)
            losses = []
            for p in perms:
                prod = cs_cols[p[0]] * ps_cols[0]
                for i in range(1, n_src):
                    prod = prod + cs_cols[p[i]] * ps_cols[i]
                losses.append(jnp.sum(prod))
            best = jnp.int32(0)
            best_val = losses[0]
            for pi in range(1, n_perms):
                better = losses[pi] < best_val
                best_val = jnp.where(better, losses[pi], best_val)
                best = jnp.where(better, jnp.int32(pi), best)

            # reorder (index select via scalar switch), apply hann, overlap-add into acc
            off = j * hop_size                                  # static, hop-aligned offset
            new_ps = []
            for i in range(n_src):
                sel = jnp.int32(perms[0][i])
                for pi in range(1, n_perms):
                    sel = jnp.where(best == pi, jnp.int32(perms[pi][i]), sel)
                r = y_j[:, 0:window_size]
                for s in range(1, n_src):
                    r = jnp.where(sel == s,
                                  y_j[:, s * window_size:(s + 1) * window_size], r)
                w_i = r * win                                   # (batch, window) windowed
                acc_ref[i, :, off:off + window_size] = (
                    acc_ref[i, :, off:off + window_size] + w_i)
                # tail sums of the (windowed, reordered) chunk -> next chunk's "previous"
                new_ps.append(jnp.sum(w_i[:, hop_size:], axis=1, keepdims=True))
            ps_cols = new_ps

        # persist carries for the next grid step
        for i in range(n_src):
            ps_ref[:, i:i + 1] = ps_cols[i]
        o_ref[...] = acc_ref[:, :, 0:body_len]
        carry_ref[...] = acc_ref[:, :, body_len:body_len + overlap]

    return kernel


def _choose_chunks_per_step(window_size, hop_size, batch, target=8):
    def lcm(a, b):
        return a * b // math.gcd(a, b)
    # block-shape divisibility: (cb*batch) % 8 == 0 and (cb*hop) % 128 == 0
    cb = lcm(128 // math.gcd(hop_size, 128), 8 // math.gcd(batch, 8))
    cb *= max(1, -(-target // cb))
    # carried tail (overlap) must fit within one step's finalized body
    while cb * hop_size < window_size - hop_size:
        cb *= 2
    return cb


def lambda_overlap_add(x, W, bias, *, n_src, window_size, hop_size, chunks_per_step=None):
    """x: (batch, 1, n_frames) float32.  Returns (batch, n_src, n_frames)."""
    assert window_size % 2 == 0, "Window size must be even"
    assert 0 < hop_size < window_size
    batch, channels, n_frames = x.shape
    assert channels == 1
    overlap = window_size - hop_size

    # scipy.signal.get_window('hanning', N)  (periodic hann)
    hann = 0.5 * (1.0 - jnp.cos(2.0 * jnp.pi * jnp.arange(window_size) / window_size))
    win_row = hann.astype(jnp.float32)[None, :]                      # (1, window)

    # number of chunks produced by F.unfold(padding=window, stride=hop)
    n_chunks = (n_frames + window_size) // hop_size + 1
    cb = chunks_per_step if chunks_per_step is not None else \
        _choose_chunks_per_step(window_size, hop_size, batch)
    n_steps = -(-n_chunks // cb)
    n_chunks_pad = n_steps * cb          # trailing zero-chunks land past the crop region
    assert cb * hop_size >= overlap

    # ---- segmentation glue (F.unfold), laid out lane-dense: row = chunk*batch + b -------
    need_len = (n_chunks_pad - 1) * hop_size + window_size
    right_pad = max(window_size, need_len - (n_frames + window_size))
    x_pad = jnp.pad(x[:, 0, :].astype(jnp.float32), ((0, 0), (window_size, right_pad)))
    idx = jnp.arange(n_chunks_pad)[:, None] * hop_size + jnp.arange(window_size)[None, :]
    chunks2d = x_pad[:, idx]                                          # (batch, n_chunks_pad, window)
    chunks2d = jnp.transpose(chunks2d, (1, 0, 2)).reshape(n_chunks_pad * batch, window_size)

    # Fused nnet weights: Wf[w, s*window + t] = W[s, w, t];  Y = chunks @ Wf + bias
    Wf = jnp.transpose(W.astype(jnp.float32), (1, 0, 2)).reshape(window_size, n_src * window_size)
    bf = bias.astype(jnp.float32).reshape(1, n_src * window_size)

    perms = list(itertools.permutations(range(n_src)))
    out_len = n_steps * cb * hop_size
    kernel = _make_ola_kernel(n_src=n_src, window_size=window_size, hop_size=hop_size,
                              batch=batch, cb=cb, perms=perms)

    o = pl.pallas_call(
        kernel,
        out_shape=jax.ShapeDtypeStruct((n_src, batch, out_len), jnp.float32),
        grid=(n_steps,),
        in_specs=[
            pl.BlockSpec((cb * batch, window_size), lambda k: (k, 0)),              # chunks
            pl.BlockSpec((window_size, n_src * window_size), lambda k: (0, 0)),     # fused W
            pl.BlockSpec((1, n_src * window_size), lambda k: (0, 0)),               # fused bias
            pl.BlockSpec((1, window_size), lambda k: (0, 0)),                       # hann window
        ],
        out_specs=pl.BlockSpec((n_src, batch, cb * hop_size), lambda k: (0, 0, k)),
        scratch_shapes=[
            pltpu.VMEM((n_src, batch, cb * hop_size + overlap), jnp.float32),  # local OLA acc
            pltpu.VMEM((n_src, batch, overlap), jnp.float32),                  # carried tail
            pltpu.VMEM((batch, n_src), jnp.float32),                           # prev tail sums
        ],
        compiler_params=pltpu.CompilerParams(dimension_semantics=("arbitrary",)),
    )(chunks2d, Wf, bf, win_row)

    # crop the unfold/fold padding; back to (batch, n_src, n_frames)
    out = o[:, :, window_size:window_size + n_frames]
    return jnp.transpose(out, (1, 0, 2))


def _reference(x, W, bias, n_src, window_size, hop_size):
    """Pure-numpy emulation of LambdaOverlapAdd.ola_forward with the same synthetic nnet."""
    x = np.asarray(x, np.float32)
    W = np.asarray(W, np.float32)
    bias = np.asarray(bias, np.float32)
    batch, _, n_frames = x.shape
    hann = (0.5 * (1.0 - np.cos(2.0 * np.pi * np.arange(window_size) / window_size))).astype(np.float32)
    x_pad = np.pad(x[:, 0, :], ((0, 0), (window_size, window_size)))
    n_chunks = (n_frames + window_size) // hop_size + 1
    overlap = window_size - hop_size
    perms = list(itertools.permutations(range(n_src)))
    acc = np.zeros((batch, n_src, n_frames + 2 * window_size), np.float32)
    prev = None
    for k in range(n_chunks):
        chunk = x_pad[:, k * hop_size:k * hop_size + window_size]          # (batch, window)
        y = np.einsum('bw,swt->bst', chunk, W) + bias[None]                # (batch, n_src, window)
        if k != 0:
            cs = y[:, :, :overlap].sum(-1)                                 # (batch, n_src)
            ps = prev[:, :, hop_size:].sum(-1)                             # (batch, n_src)
            pw = np.einsum('bi,bj->ij', cs, ps)                            # summed over batch
            losses = [sum(pw[p[i], i] for i in range(n_src)) / n_src for p in perms]
            p = perms[int(np.argmin(losses))]
            y = y[:, list(p), :]
        yw = y * hann[None, None, :]
        prev = yw
        acc[:, :, k * hop_size:k * hop_size + window_size] += yw
    return acc[:, :, window_size:window_size + n_frames]


if __name__ == "__main__":
    batch, n_frames = 2, 2000
    n_src, window_size, hop_size = 3, 128, 64

    key = jax.random.PRNGKey(0)
    k1, k2, k3 = jax.random.split(key, 3)
    x = jax.random.normal(k1, (batch, 1, n_frames), jnp.float32)
    # Deterministic synthetic nnet parameters: per-source affine map window -> window.
    W = 0.1 * jax.random.normal(k2, (n_src, window_size, window_size), jnp.float32)
    bias = 0.01 * jax.random.normal(k3, (n_src, window_size), jnp.float32)

    out = lambda_overlap_add(x, W, bias, n_src=n_src,
                             window_size=window_size, hop_size=hop_size)
    out = jax.block_until_ready(out)

    assert out.shape == (batch, n_src, n_frames)
    ref = _reference(x, W, bias, n_src, window_size, hop_size)
    np.testing.assert_allclose(np.asarray(out), ref, rtol=2e-3, atol=2e-3)
    print("KERNEL_OK")
</pallas_src>

<mosaic_0001>
module attributes {stable_mosaic.version = 11 : i64} {
  func.func @kernel(%arg0: i32, %arg1: memref<16x128xf32, #tpu.memory_space<vmem>>, %arg2: memref<128x384xf32, #tpu.memory_space<vmem>>, %arg3: memref<1x384xf32, #tpu.memory_space<vmem>>, %arg4: memref<1x128xf32, #tpu.memory_space<vmem>>, %arg5: memref<3x2x512xf32, #tpu.memory_space<vmem>>, %arg6: memref<3x2x576xf32, #tpu.memory_space<vmem>>, %arg7: memref<3x2x64xf32, #tpu.memory_space<vmem>>, %arg8: memref<2x3xf32, #tpu.memory_space<vmem>>) attributes {dimension_semantics = [#tpu.dimension_semantics<arbitrary>], iteration_bounds = array<i64: 5>, scalar_prefetch = 0 : i64, scratch_operands = 3 : i64, tpu.core_type = #tpu.core_type<tc>, window_params = [{transform_indices = @transform_0, window_bounds = array<i64: 16, 128>}, {pipeline_mode = #tpu.pipeline_mode<synchronous>, transform_indices = @transform_1, window_bounds = array<i64: 128, 384>}, {pipeline_mode = #tpu.pipeline_mode<synchronous>, transform_indices = @transform_2, window_bounds = array<i64: 1, 384>}, {pipeline_mode = #tpu.pipeline_mode<synchronous>, transform_indices = @transform_3, window_bounds = array<i64: 1, 128>}, {transform_indices = @transform_4, window_bounds = array<i64: 3, 2, 512>}]} {
    %c0_i32 = arith.constant 0 : i32
    %0 = arith.cmpi eq, %arg0, %c0_i32 : i32
    %1 = arith.extui %0 : i1 to i32
    %c0_i32_0 = arith.constant 0 : i32
    %2 = arith.cmpi ne, %1, %c0_i32_0 : i32
    scf.if %2 {
      %cst_627 = arith.constant 0.000000e+00 : f32
      %1320 = vector.broadcast %cst_627 : f32 to vector<3x2x64xf32>
      %c0_628 = arith.constant 0 : index
      %c0_629 = arith.constant 0 : index
      %c0_630 = arith.constant 0 : index
      %1321 = vector.load %arg7[%c0_628, %c0_629, %c0_630] : memref<3x2x64xf32, #tpu.memory_space<vmem>>, vector<3x2x64xf32>
      tpu.vector_store %arg7[%c0_628, %c0_629, %c0_630], %1320 {strides = array<i32>} : memref<3x2x64xf32, #tpu.memory_space<vmem>>, vector<3x2x64xf32>,
      %cst_631 = arith.constant 0.000000e+00 : f32
      %1322 = vector.broadcast %cst_631 : f32 to vector<2x3xf32>
      %c0_632 = arith.constant 0 : index
      %c0_633 = arith.constant 0 : index
      %1323 = vector.load %arg8[%c0_632, %c0_633] : memref<2x3xf32, #tpu.memory_space<vmem>>, vector<2x3xf32>
      tpu.vector_store %arg8[%c0_632, %c0_633], %1322 {strides = array<i32>} : memref<2x3xf32, #tpu.memory_space<vmem>>, vector<2x3xf32>,
    } else {
    }
    %cst = arith.constant 0.000000e+00 : f32
    %3 = vector.broadcast %cst : f32 to vector<3x2x576xf32>
    %c0 = arith.constant 0 : index
    %c0_1 = arith.constant 0 : index
    %c0_2 = arith.constant 0 : index
    %4 = vector.load %arg6[%c0, %c0_1, %c0_2] : memref<3x2x576xf32, #tpu.memory_space<vmem>>, vector<3x2x576xf32>
    tpu.vector_store %arg6[%c0, %c0_1, %c0_2], %3 {strides = array<i32>} : memref<3x2x576xf32, #tpu.memory_space<vmem>>, vector<3x2x576xf32>,
    %c0_3 = arith.constant 0 : index
    %c0_4 = arith.constant 0 : index
    %c0_5 = arith.constant 0 : index
    %5 = vector.load %arg7[%c0_3, %c0_4, %c0_5] : memref<3x2x64xf32, #tpu.memory_space<vmem>>, vector<3x2x64xf32>
    %c0_6 = arith.constant 0 : index
    %c0_7 = arith.constant 0 : index
    %c0_8 = arith.constant 0 : index
    %6 = vector.load %arg6[%c0_6, %c0_7, %c0_8] : memref<3x2x576xf32, #tpu.memory_space<vmem>>, vector<3x2x64xf32>
    tpu.vector_store %arg6[%c0_6, %c0_7, %c0_8], %5 {strides = array<i32>} : memref<3x2x576xf32, #tpu.memory_space<vmem>>, vector<3x2x64xf32>,
    %c0_9 = arith.constant 0 : index
    %c0_10 = arith.constant 0 : index
    %7 = vector.load %arg1[%c0_9, %c0_10] : memref<16x128xf32, #tpu.memory_space<vmem>>, vector<16x128xf32>
    %c0_11 = arith.constant 0 : index
    %c0_12 = arith.constant 0 : index
    %8 = vector.load %arg2[%c0_11, %c0_12] : memref<128x384xf32, #tpu.memory_space<vmem>>, vector<128x384xf32>
    %cst_13 = arith.constant dense<0.000000e+00> : vector<16x384xf32>
    %9 = tpu.matmul %7, %8, %cst_13 {dimension_numbers = #tpu.dot_dimension_numbers<[1], [0], [0], [1], [0, 0, 1, 1], [], []>} : vector<16x128xf32>, vector<128x384xf32>, vector<16x384xf32> -> vector<16x384xf32>
    %c0_14 = arith.constant 0 : index
    %c0_15 = arith.constant 0 : index
    %10 = vector.load %arg3[%c0_14, %c0_15] : memref<1x384xf32, #tpu.memory_space<vmem>>, vector<1x384xf32>
    %11 = vector.broadcast %10 : vector<1x384xf32> to vector<16x384xf32>
    %12 = arith.addf %9, %11 : vector<16x384xf32>
    %c0_16 = arith.constant 0 : index
    %c0_17 = arith.constant 0 : index
    %13 = vector.load %arg4[%c0_16, %c0_17] : memref<1x128xf32, #tpu.memory_space<vmem>>, vector<1x128xf32>
    %c0_18 = arith.constant 0 : index
    %c0_19 = arith.constant 0 : index
    %14 = vector.load %arg8[%c0_18, %c0_19] : memref<2x3xf32, #tpu.memory_space<vmem>>, vector<2x1xf32>
    %c0_20 = arith.constant 0 : index
    %c1 = arith.constant 1 : index
    %15 = vector.load %arg8[%c0_20, %c1] : memref<2x3xf32, #tpu.memory_space<vmem>>, vector<2x1xf32>
    %c0_21 = arith.constant 0 : index
    %c2 = arith.constant 2 : index
    %16 = vector.load %arg8[%c0_21, %c2] : memref<2x3xf32, #tpu.memory_space<vmem>>, vector<2x1xf32>
    %17 = vector.extract_strided_slice %12 {offsets = [0, 0], sizes = [2, 384], strides = [1, 1]} : vector<16x384xf32> to vector<2x384xf32>
    %18 = vector.extract_strided_slice %17 {offsets = [0, 0], sizes = [2, 64], strides = [1, 1]} : vector<2x384xf32> to vector<2x64xf32>
    %cst_22 = arith.constant dense<0.000000e+00> : vector<2xf32>
    %19 = vector.multi_reduction <add>, %18, %cst_22 [1] : vector<2x64xf32> to vector<2xf32>
    %20 = vector.shape_cast %19 : vector<2xf32> to vector<2x1xf32>
    %21 = vector.extract_strided_slice %17 {offsets = [0, 128], sizes = [2, 64], strides = [1, 1]} : vector<2x384xf32> to vector<2x64xf32>
    %cst_23 = arith.constant dense<0.000000e+00> : vector<2xf32>
    %22 = vector.multi_reduction <add>, %21, %cst_23 [1] : vector<2x64xf32> to vector<2xf32>
    %23 = vector.shape_cast %22 : vector<2xf32> to vector<2x1xf32>
    %24 = vector.extract_strided_slice %17 {offsets = [0, 256], sizes = [2, 64], strides = [1, 1]} : vector<2x384xf32> to vector<2x64xf32>
    %cst_24 = arith.constant dense<0.000000e+00> : vector<2xf32>
    %25 = vector.multi_reduction <add>, %24, %cst_24 [1] : vector<2x64xf32> to vector<2xf32>
    %26 = vector.shape_cast %25 : vector<2xf32> to vector<2x1xf32>
    %27 = arith.mulf %20, %14 : vector<2x1xf32>
    %28 = arith.mulf %23, %15 : vector<2x1xf32>
    %29 = arith.addf %27, %28 : vector<2x1xf32>
    %30 = arith.mulf %26, %16 : vector<2x1xf32>
    %31 = arith.addf %29, %30 : vector<2x1xf32>
    %32 = vector.shape_cast %31 : vector<2x1xf32> to vector<1x2x1xf32>
    %cst_25 = arith.constant dense<0.000000e+00> : vector<1xf32>
    %33 = vector.multi_reduction <add>, %32, %cst_25 [1, 2] : vector<1x2x1xf32> to vector<1xf32>
    %34 = vector.shape_cast %33 : vector<1xf32> to vector<1x1x1xf32>
    %35 = vector.extract %34[0, 0, 0] : f32 from vector<1x1x1xf32>
    %36 = arith.mulf %20, %14 : vector<2x1xf32>
    %37 = arith.mulf %26, %15 : vector<2x1xf32>
    %38 = arith.addf %36, %37 : vector<2x1xf32>
    %39 = arith.mulf %23, %16 : vector<2x1xf32>
    %40 = arith.addf %38, %39 : vector<2x1xf32>
    %41 = vector.shape_cast %40 : vector<2x1xf32> to vector<1x2x1xf32>
    %cst_26 = arith.constant dense<0.000000e+00> : vector<1xf32>
    %42 = vector.multi_reduction <add>, %41, %cst_26 [1, 2] : vector<1x2x1xf32> to vector<1xf32>
    %43 = vector.shape_cast %42 : vector<1xf32> to vector<1x1x1xf32>
    %44 = vector.extract %43[0, 0, 0] : f32 from vector<1x1x1xf32>
    %45 = arith.mulf %23, %14 : vector<2x1xf32>
    %46 = arith.mulf %20, %15 : vector<2x1xf32>
    %47 = arith.addf %45, %46 : vector<2x1xf32>
    %48 = arith.mulf %26, %16 : vector<2x1xf32>
    %49 = arith.addf %47, %48 : vector<2x1xf32>
    %50 = vector.shape_cast %49 : vector<2x1xf32> to vector<1x2x1xf32>
    %cst_27 = arith.constant dense<0.000000e+00> : vector<1xf32>
    %51 = vector.multi_reduction <add>, %50, %cst_27 [1, 2] : vector<1x2x1xf32> to vector<1xf32>
    %52 = vector.shape_cast %51 : vector<1xf32> to vector<1x1x1xf32>
    %53 = vector.extract %52[0, 0, 0] : f32 from vector<1x1x1xf32>
    %54 = arith.mulf %23, %14 : vector<2x1xf32>
    %55 = arith.mulf %26, %15 : vector<2x1xf32>
    %56 = arith.addf %54, %55 : vector<2x1xf32>
    %57 = arith.mulf %20, %16 : vector<2x1xf32>
    %58 = arith.addf %56, %57 : vector<2x1xf32>
    %59 = vector.shape_cast %58 : vector<2x1xf32> to vector<1x2x1xf32>
    %cst_28 = arith.constant dense<0.000000e+00> : vector<1xf32>
    %60 = vector.multi_reduction <add>, %59, %cst_28 [1, 2] : vector<1x2x1xf32> to vector<1xf32>
    %61 = vector.shape_cast %60 : vector<1xf32> to vector<1x1x1xf32>
    %62 = vector.extract %61[0, 0, 0] : f32 from vector<1x1x1xf32>
    %63 = arith.mulf %26, %14 : vector<2x1xf32>
    %64 = arith.mulf %20, %15 : vector<2x1xf32>
    %65 = arith.addf %63, %64 : vector<2x1xf32>
    %66 = arith.mulf %23, %16 : vector<2x1xf32>
    %67 = arith.addf %65, %66 : vector<2x1xf32>
    %68 = vector.shape_cast %67 : vector<2x1xf32> to vector<1x2x1xf32>
    %cst_29 = arith.constant dense<0.000000e+00> : vector<1xf32>
    %69 = vector.multi_reduction <add>, %68, %cst_29 [1, 2] : vector<1x2x1xf32> to vector<1xf32>
    %70 = vector.shape_cast %69 : vector<1xf32> to vector<1x1x1xf32>
    %71 = vector.extract %70[0, 0, 0] : f32 from vector<1x1x1xf32>
    %72 = arith.mulf %26, %14 : vector<2x1xf32>
    %73 = arith.mulf %23, %15 : vector<2x1xf32>
    %74 = arith.addf %72, %73 : vector<2x1xf32>
    %75 = arith.mulf %20, %16 : vector<2x1xf32>
    %76 = arith.addf %74, %75 : vector<2x1xf32>
    %77 = vector.shape_cast %76 : vector<2x1xf32> to vector<1x2x1xf32>
    %cst_30 = arith.constant dense<0.000000e+00> : vector<1xf32>
    %78 = vector.multi_reduction <add>, %77, %cst_30 [1, 2] : vector<1x2x1xf32> to vector<1xf32>
    %79 = vector.shape_cast %78 : vector<1xf32> to vector<1x1x1xf32>
    %80 = vector.extract %79[0, 0, 0] : f32 from vector<1x1x1xf32>
    %81 = arith.cmpf olt, %44, %35 : f32
    %82 = arith.select %81, %44, %35 : f32
    %c1_i32 = arith.constant 1 : i32
    %c0_i32_31 = arith.constant 0 : i32
    %83 = arith.select %81, %c1_i32, %c0_i32_31 : i32
    %84 = arith.cmpf olt, %53, %82 : f32
    %85 = arith.select %84, %53, %82 : f32
    %c2_i32 = arith.constant 2 : i32
    %86 = arith.select %84, %c2_i32, %83 : i32
    %87 = arith.cmpf olt, %62, %85 : f32
    %88 = arith.select %87, %62, %85 : f32
    %c3_i32 = arith.constant 3 : i32
    %89 = arith.select %87, %c3_i32, %86 : i32
    %90 = arith.cmpf olt, %71, %88 : f32
    %91 = arith.select %90, %71, %88 : f32
    %c4_i32 = arith.constant 4 : i32
    %92 = arith.select %90, %c4_i32, %89 : i32
    %93 = arith.cmpf olt, %80, %91 : f32
    %c5_i32 = arith.constant 5 : i32
    %94 = arith.select %93, %c5_i32, %92 : i32
    %c1_i32_32 = arith.constant 1 : i32
    %95 = arith.cmpi eq, %94, %c1_i32_32 : i32
    %c0_i32_33 = arith.constant 0 : i32
    %c0_i32_34 = arith.constant 0 : i32
    %96 = arith.select %95, %c0_i32_33, %c0_i32_34 : i32
    %c2_i32_35 = arith.constant 2 : i32
    %97 = arith.cmpi eq, %94, %c2_i32_35 : i32
    %c1_i32_36 = arith.constant 1 : i32
    %98 = arith.select %97, %c1_i32_36, %96 : i32
    %c3_i32_37 = arith.constant 3 : i32
    %99 = arith.cmpi eq, %94, %c3_i32_37 : i32
    %c1_i32_38 = arith.constant 1 : i32
    %100 = arith.select %99, %c1_i32_38, %98 : i32
    %c4_i32_39 = arith.constant 4 : i32
    %101 = arith.cmpi eq, %94, %c4_i32_39 : i32
    %c2_i32_40 = arith.constant 2 : i32
    %102 = arith.select %101, %c2_i32_40, %100 : i32
    %c5_i32_41 = arith.constant 5 : i32
    %103 = arith.cmpi eq, %94, %c5_i32_41 : i32
    %c2_i32_42 = arith.constant 2 : i32
    %104 = arith.select %103, %c2_i32_42, %102 : i32
    %105 = vector.extract_strided_slice %17 {offsets = [0, 0], sizes = [2, 128], strides = [1, 1]} : vector<2x384xf32> to vector<2x128xf32>
    %c1_i32_43 = arith.constant 1 : i32
    %106 = arith.cmpi eq, %104, %c1_i32_43 : i32
    %107 = vector.extract_strided_slice %17 {offsets = [0, 128], sizes = [2, 128], strides = [1, 1]} : vector<2x384xf32> to vector<2x128xf32>
    %108 = arith.select %106, %107, %105 : vector<2x128xf32>
    %c2_i32_44 = arith.constant 2 : i32
    %109 = arith.cmpi eq, %104, %c2_i32_44 : i32
    %110 = vector.extract_strided_slice %17 {offsets = [0, 256], sizes = [2, 128], strides = [1, 1]} : vector<2x384xf32> to vector<2x128xf32>
    %111 = arith.select %109, %110, %108 : vector<2x128xf32>
    %112 = vector.broadcast %13 : vector<1x128xf32> to vector<2x128xf32>
    %113 = arith.mulf %111, %112 : vector<2x128xf32>
    %c0_45 = arith.constant 0 : index
    %c0_46 = arith.constant 0 : index
    %c0_47 = arith.constant 0 : index
    %114 = vector.load %arg6[%c0_45, %c0_46, %c0_47] : memref<3x2x576xf32, #tpu.memory_space<vmem>>, vector<1x2x128xf32>
    %115 = vector.shape_cast %114 : vector<1x2x128xf32> to vector<2x128xf32>
    %116 = arith.addf %115, %113 : vector<2x128xf32>
    %c0_48 = arith.constant 0 : index
    %c0_49 = arith.constant 0 : index
    %c0_50 = arith.constant 0 : index
    %117 = vector.load %arg6[%c0_48, %c0_49, %c0_50] : memref<3x2x576xf32, #tpu.memory_space<vmem>>, vector<1x2x128xf32>
    %118 = vector.shape_cast %117 : vector<1x2x128xf32> to vector<2x128xf32>
    %119 = vector.shape_cast %116 : vector<2x128xf32> to vector<1x2x128xf32>
    tpu.vector_store %arg6[%c0_48, %c0_49, %c0_50], %119 {strides = array<i32>} : memref<3x2x576xf32, #tpu.memory_space<vmem>>, vector<1x2x128xf32>,
    %120 = vector.extract_strided_slice %113 {offsets = [0, 64], sizes = [2, 64], strides = [1, 1]} : vector<2x128xf32> to vector<2x64xf32>
    %cst_51 = arith.constant dense<0.000000e+00> : vector<2xf32>
    %121 = vector.multi_reduction <add>, %120, %cst_51 [1] : vector<2x64xf32> to vector<2xf32>
    %122 = vector.shape_cast %121 : vector<2xf32> to vector<2x1xf32>
    %c1_i32_52 = arith.constant 1 : i32
    %123 = arith.cmpi eq, %94, %c1_i32_52 : i32
    %c2_i32_53 = arith.constant 2 : i32
    %c1_i32_54 = arith.constant 1 : i32
    %124 = arith.select %123, %c2_i32_53, %c1_i32_54 : i32
    %c2_i32_55 = arith.constant 2 : i32
    %125 = arith.cmpi eq, %94, %c2_i32_55 : i32
    %c0_i32_56 = arith.constant 0 : i32
    %126 = arith.select %125, %c0_i32_56, %124 : i32
    %c3_i32_57 = arith.constant 3 : i32
    %127 = arith.cmpi eq, %94, %c3_i32_57 : i32
    %c2_i32_58 = arith.constant 2 : i32
    %128 = arith.select %127, %c2_i32_58, %126 : i32
    %c4_i32_59 = arith.constant 4 : i32
    %129 = arith.cmpi eq, %94, %c4_i32_59 : i32
    %c0_i32_60 = arith.constant 0 : i32
    %130 = arith.select %129, %c0_i32_60, %128 : i32
    %c5_i32_61 = arith.constant 5 : i32
    %131 = arith.cmpi eq, %94, %c5_i32_61 : i32
    %c1_i32_62 = arith.constant 1 : i32
    %132 = arith.select %131, %c1_i32_62, %130 : i32
    %133 = vector.extract_strided_slice %17 {offsets = [0, 0], sizes = [2, 128], strides = [1, 1]} : vector<2x384xf32> to vector<2x128xf32>
    %c1_i32_63 = arith.constant 1 : i32
    %134 = arith.cmpi eq, %132, %c1_i32_63 : i32
    %135 = vector.extract_strided_slice %17 {offsets = [0, 128], sizes = [2, 128], strides = [1, 1]} : vector<2x384xf32> to vector<2x128xf32>
    %136 = arith.select %134, %135, %133 : vector<2x128xf32>
    %c2_i32_64 = arith.constant 2 : i32
    %137 = arith.cmpi eq, %132, %c2_i32_64 : i32
    %138 = vector.extract_strided_slice %17 {offsets = [0, 256], sizes = [2, 128], strides = [1, 1]} : vector<2x384xf32> to vector<2x128xf32>
    %139 = arith.select %137, %138, %136 : vector<2x128xf32>
    %140 = vector.broadcast %13 : vector<1x128xf32> to vector<2x128xf32>
    %141 = arith.mulf %139, %140 : vector<2x128xf32>
    %c1_65 = arith.constant 1 : index
    %c0_66 = arith.constant 0 : index
    %c0_67 = arith.constant 0 : index
    %142 = vector.load %arg6[%c1_65, %c0_66, %c0_67] : memref<3x2x576xf32, #tpu.memory_space<vmem>>, vector<1x2x128xf32>
    %143 = vector.shape_cast %142 : vector<1x2x128xf32> to vector<2x128xf32>
    %144 = arith.addf %143, %141 : vector<2x128xf32>
    %c1_68 = arith.constant 1 : index
    %c0_69 = arith.constant 0 : index
    %c0_70 = arith.constant 0 : index
    %145 = vector.load %arg6[%c1_68, %c0_69, %c0_70] : memref<3x2x576xf32, #tpu.memory_space<vmem>>, vector<1x2x128xf32>
    %146 = vector.shape_cast %145 : vector<1x2x128xf32> to vector<2x128xf32>
    %147 = vector.shape_cast %144 : vector<2x128xf32> to vector<1x2x128xf32>
    tpu.vector_store %arg6[%c1_68, %c0_69, %c0_70], %147 {strides = array<i32>} : memref<3x2x576xf32, #tpu.memory_space<vmem>>, vector<1x2x128xf32>,
    %148 = vector.extract_strided_slice %141 {offsets = [0, 64], sizes = [2, 64], strides = [1, 1]} : vector<2x128xf32> to vector<2x64xf32>
    %cst_71 = arith.constant dense<0.000000e+00> : vector<2xf32>
    %149 = vector.multi_reduction <add>, %148, %cst_71 [1] : vector<2x64xf32> to vector<2xf32>
    %150 = vector.shape_cast %149 : vector<2xf32> to vector<2x1xf32>
    %c1_i32_72 = arith.constant 1 : i32
    %151 = arith.cmpi eq, %94, %c1_i32_72 : i32
    %c1_i32_73 = arith.constant 1 : i32
    %c2_i32_74 = arith.constant 2 : i32
    %152 = arith.select %151, %c1_i32_73, %c2_i32_74 : i32
    %c2_i32_75 = arith.constant 2 : i32
    %153 = arith.cmpi eq, %94, %c2_i32_75 : i32
    %c2_i32_76 = arith.constant 2 : i32
    %154 = arith.select %153, %c2_i32_76, %152 : i32
    %c3_i32_77 = arith.constant 3 : i32
    %155 = arith.cmpi eq, %94, %c3_i32_77 : i32
    %c0_i32_78 = arith.constant 0 : i32
    %156 = arith.select %155, %c0_i32_78, %154 : i32
    %c4_i32_79 = arith.constant 4 : i32
    %157 = arith.cmpi eq, %94, %c4_i32_79 : i32
    %c1_i32_80 = arith.constant 1 : i32
    %158 = arith.select %157, %c1_i32_80, %156 : i32
    %c5_i32_81 = arith.constant 5 : i32
    %159 = arith.cmpi eq, %94, %c5_i32_81 : i32
    %c0_i32_82 = arith.constant 0 : i32
    %160 = arith.select %159, %c0_i32_82, %158 : i32
    %161 = vector.extract_strided_slice %17 {offsets = [0, 0], sizes = [2, 128], strides = [1, 1]} : vector<2x384xf32> to vector<2x128xf32>
    %c1_i32_83 = arith.constant 1 : i32
    %162 = arith.cmpi eq, %160, %c1_i32_83 : i32
    %163 = vector.extract_strided_slice %17 {offsets = [0, 128], sizes = [2, 128], strides = [1, 1]} : vector<2x384xf32> to vector<2x128xf32>
    %164 = arith.select %162, %163, %161 : vector<2x128xf32>
    %c2_i32_84 = arith.constant 2 : i32
    %165 = arith.cmpi eq, %160, %c2_i32_84 : i32
    %166 = vector.extract_strided_slice %17 {offsets = [0, 256], sizes = [2, 128], strides = [1, 1]} : vector<2x384xf32> to vector<2x128xf32>
    %167 = arith.select %165, %166, %164 : vector<2x128xf32>
    %168 = vector.broadcast %13 : vector<1x128xf32> to vector<2x128xf32>
    %169 = arith.mulf %167, %168 : vector<2x128xf32>
    %c2_85 = arith.constant 2 : index
    %c0_86 = arith.constant 0 : index
    %c0_87 = arith.constant 0 : index
    %170 = vector.load %arg6[%c2_85, %c0_86, %c0_87] : memref<3x2x576xf32, #tpu.memory_space<vmem>>, vector<1x2x128xf32>
    %171 = vector.shape_cast %170 : vector<1x2x128xf32> to vector<2x128xf32>
    %172 = arith.addf %171, %169 : vector<2x128xf32>
    %c2_88 = arith.constant 2 : index
    %c0_89 = arith.constant 0 : index
    %c0_90 = arith.constant 0 : index
    %173 = vector.load %arg6[%c2_88, %c0_89, %c0_90] : memref<3x2x576xf32, #tpu.memory_space<vmem>>, vector<1x2x128xf32>
    %174 = vector.shape_cast %173 : vector<1x2x128xf32> to vector<2x128xf32>
    %175 = vector.shape_cast %172 : vector<2x128xf32> to vector<1x2x128xf32>
    tpu.vector_store %arg6[%c2_88, %c0_89, %c0_90], %175 {strides = array<i32>} : memref<3x2x576xf32, #tpu.memory_space<vmem>>, vector<1x2x128xf32>,
    %176 = vector.extract_strided_slice %169 {offsets = [0, 64], sizes = [2, 64], strides = [1, 1]} : vector<2x128xf32> to vector<2x64xf32>
    %cst_91 = arith.constant dense<0.000000e+00> : vector<2xf32>
    %177 = vector.multi_reduction <add>, %176, %cst_91 [1] : vector<2x64xf32> to vector<2xf32>
    %178 = vector.shape_cast %177 : vector<2xf32> to vector<2x1xf32>
    %179 = vector.extract_strided_slice %12 {offsets = [2, 0], sizes = [2, 384], strides = [1, 1]} : vector<16x384xf32> to vector<2x384xf32>
    %180 = vector.extract_strided_slice %179 {offsets = [0, 0], sizes = [2, 64], strides = [1, 1]} : vector<2x384xf32> to vector<2x64xf32>
    %cst_92 = arith.constant dense<0.000000e+00> : vector<2xf32>
    %181 = vector.multi_reduction <add>, %180, %cst_92 [1] : vector<2x64xf32> to vector<2xf32>
    %182 = vector.shape_cast %181 : vector<2xf32> to vector<2x1xf32>
    %183 = vector.extract_strided_slice %179 {offsets = [0, 128], sizes = [2, 64], strides = [1, 1]} : vector<2x384xf32> to vector<2x64xf32>
    %cst_93 = arith.constant dense<0.000000e+00> : vector<2xf32>
    %184 = vector.multi_reduction <add>, %183, %cst_93 [1] : vector<2x64xf32> to vector<2xf32>
    %185 = vector.shape_cast %184 : vector<2xf32> to vector<2x1xf32>
    %186 = vector.extract_strided_slice %179 {offsets = [0, 256], sizes = [2, 64], strides = [1, 1]} : vector<2x384xf32> to vector<2x64xf32>
    %cst_94 = arith.constant dense<0.000000e+00> : vector<2xf32>
    %187 = vector.multi_reduction <add>, %186, %cst_94 [1] : vector<2x64xf32> to vector<2xf32>
    %188 = vector.shape_cast %187 : vector<2xf32> to vector<2x1xf32>
    %189 = arith.mulf %182, %122 : vector<2x1xf32>
    %190 = arith.mulf %185, %150 : vector<2x1xf32>
    %191 = arith.addf %189, %190 : vector<2x1xf32>
    %192 = arith.mulf %188, %178 : vector<2x1xf32>
    %193 = arith.addf %191, %192 : vector<2x1xf32>
    %194 = vector.shape_cast %193 : vector<2x1xf32> to vector<1x2x1xf32>
    %cst_95 = arith.constant dense<0.000000e+00> : vector<1xf32>
    %195 = vector.multi_reduction <add>, %194, %cst_95 [1, 2] : vector<1x2x1xf32> to vector<1xf32>
    %196 = vector.shape_cast %195 : vector<1xf32> to vector<1x1x1xf32>
    %197 = vector.extract %196[0, 0, 0] : f32 from vector<1x1x1xf32>
    %198 = arith.mulf %182, %122 : vector<2x1xf32>
    %199 = arith.mulf %188, %150 : vector<2x1xf32>
    %200 = arith.addf %198, %199 : vector<2x1xf32>
    %201 = arith.mulf %185, %178 : vector<2x1xf32>
    %202 = arith.addf %200, %201 : vector<2x1xf32>
    %203 = vector.shape_cast %202 : vector<2x1xf32> to vector<1x2x1xf32>
    %cst_96 = arith.constant dense<0.000000e+00> : vector<1xf32>
    %204 = vector.multi_reduction <add>, %203, %cst_96 [1, 2] : vector<1x2x1xf32> to vector<1xf32>
    %205 = vector.shape_cast %204 : vector<1xf32> to vector<1x1x1xf32>
    %206 = vector.extract %205[0, 0, 0] : f32 from vector<1x1x1xf32>
    %207 = arith.mulf %185, %122 : vector<2x1xf32>
    %208 = arith.mulf %182, %150 : vector<2x1xf32>
    %209 = arith.addf %207, %208 : vector<2x1xf32>
    %210 = arith.mulf %188, %178 : vector<2x1xf32>
    %211 = arith.addf %209, %210 : vector<2x1xf32>
    %212 = vector.shape_cast %211 : vector<2x1xf32> to vector<1x2x1xf32>
    %cst_97 = arith.constant dense<0.000000e+00> : vector<1xf32>
    %213 = vector.multi_reduction <add>, %212, %cst_97 [1, 2] : vector<1x2x1xf32> to vector<1xf32>
    %214 = vector.shape_cast %213 : vector<1xf32> to vector<1x1x1xf32>
    %215 = vector.extract %214[0, 0, 0] : f32 from vector<1x1x1xf32>
    %216 = arith.mulf %185, %122 : vector<2x1xf32>
    %217 = arith.mulf %188, %150 : vector<2x1xf32>
    %218 = arith.addf %216, %217 : vector<2x1xf32>
    %219 = arith.mulf %182, %178 : vector<2x1xf32>
    %220 = arith.addf %218, %219 : vector<2x1xf32>
    %221 = vector.shape_cast %220 : vector<2x1xf32> to vector<1x2x1xf32>
    %cst_98 = arith.constant dense<0.000000e+00> : vector<1xf32>
    %222 = vector.multi_reduction <add>, %221, %cst_98 [1, 2] : vector<1x2x1xf32> to vector<1xf32>
    %223 = vector.shape_cast %222 : vector<1xf32> to vector<1x1x1xf32>
    %224 = vector.extract %223[0, 0, 0] : f32 from vector<1x1x1xf32>
    %225 = arith.mulf %188, %122 : vector<2x1xf32>
    %226 = arith.mulf %182, %150 : vector<2x1xf32>
    %227 = arith.addf %225, %226 : vector<2x1xf32>
    %228 = arith.mulf %185, %178 : vector<2x1xf32>
    %229 = arith.addf %227, %228 : vector<2x1xf32>
    %230 = vector.shape_cast %229 : vector<2x1xf32> to vector<1x2x1xf32>
    %cst_99 = arith.constant dense<0.000000e+00> : vector<1xf32>
    %231 = vector.multi_reduction <add>, %230, %cst_99 [1, 2] : vector<1x2x1xf32> to vector<1xf32>
    %232 = vector.shape_cast %231 : vector<1xf32> to vector<1x1x1xf32>
    %233 = vector.extract %232[0, 0, 0] : f32 from vector<1x1x1xf32>
    %234 = arith.mulf %188, %122 : vector<2x1xf32>
    %235 = arith.mulf %185, %150 : vector<2x1xf32>
    %236 = arith.addf %234, %235 : vector<2x1xf32>
    %237 = arith.mulf %182, %178 : vector<2x1xf32>
    %238 = arith.addf %236, %237 : vector<2x1xf32>
    %239 = vector.shape_cast %238 : vector<2x1xf32> to vector<1x2x1xf32>
    %cst_100 = arith.constant dense<0.000000e+00> : vector<1xf32>
    %240 = vector.multi_reduction <add>, %239, %cst_100 [1, 2] : vector<1x2x1xf32> to vector<1xf32>
    %241 = vector.shape_cast %240 : vector<1xf32> to vector<1x1x1xf32>
    %242 = vector.extract %241[0, 0, 0] : f32 from vector<1x1x1xf32>
    %243 = arith.cmpf olt, %206, %197 : f32
    %244 = arith.select %243, %206, %197 : f32
    %c1_i32_101 = arith.constant 1 : i32
    %c0_i32_102 = arith.constant 0 : i32
    %245 = arith.select %243, %c1_i32_101, %c0_i32_102 : i32
    %246 = arith.cmpf olt, %215, %244 : f32
    %247 = arith.select %246, %215, %244 : f32
    %c2_i32_103 = arith.constant 2 : i32
    %248 = arith.select %246, %c2_i32_103, %245 : i32
    %249 = arith.cmpf olt, %224, %247 : f32
    %250 = arith.select %249, %224, %247 : f32
    %c3_i32_104 = arith.constant 3 : i32
    %251 = arith.select %249, %c3_i32_104, %248 : i32
    %252 = arith.cmpf olt, %233, %250 : f32
    %253 = arith.select %252, %233, %250 : f32
    %c4_i32_105 = arith.constant 4 : i32
    %254 = arith.select %252, %c4_i32_105, %251 : i32
    %255 = arith.cmpf olt, %242, %253 : f32
    %c5_i32_106 = arith.constant 5 : i32
    %256 = arith.select %255, %c5_i32_106, %254 : i32
    %c1_i32_107 = arith.constant 1 : i32
    %257 = arith.cmpi eq, %256, %c1_i32_107 : i32
    %c0_i32_108 = arith.constant 0 : i32
    %c0_i32_109 = arith.constant 0 : i32
    %258 = arith.select %257, %c0_i32_108, %c0_i32_109 : i32
    %c2_i32_110 = arith.constant 2 : i32
    %259 = arith.cmpi eq, %256, %c2_i32_110 : i32
    %c1_i32_111 = arith.constant 1 : i32
    %260 = arith.select %259, %c1_i32_111, %258 : i32
    %c3_i32_112 = arith.constant 3 : i32
    %261 = arith.cmpi eq, %256, %c3_i32_112 : i32
    %c1_i32_113 = arith.constant 1 : i32
    %262 = arith.select %261, %c1_i32_113, %260 : i32
    %c4_i32_114 = arith.constant 4 : i32
    %263 = arith.cmpi eq, %256, %c4_i32_114 : i32
    %c2_i32_115 = arith.constant 2 : i32
    %264 = arith.select %263, %c2_i32_115, %262 : i32
    %c5_i32_116 = arith.constant 5 : i32
    %265 = arith.cmpi eq, %256, %c5_i32_116 : i32
    %c2_i32_117 = arith.constant 2 : i32
    %266 = arith.select %265, %c2_i32_117, %264 : i32
    %267 = vector.extract_strided_slice %179 {offsets = [0, 0], sizes = [2, 128], strides = [1, 1]} : vector<2x384xf32> to vector<2x128xf32>
    %c1_i32_118 = arith.constant 1 : i32
    %268 = arith.cmpi eq, %266, %c1_i32_118 : i32
    %269 = vector.extract_strided_slice %179 {offsets = [0, 128], sizes = [2, 128], strides = [1, 1]} : vector<2x384xf32> to vector<2x128xf32>
    %270 = arith.select %268, %269, %267 : vector<2x128xf32>
    %c2_i32_119 = arith.constant 2 : i32
    %271 = arith.cmpi eq, %266, %c2_i32_119 : i32
    %272 = vector.extract_strided_slice %179 {offsets = [0, 256], sizes = [2, 128], strides = [1, 1]} : vector<2x384xf32> to vector<2x128xf32>
    %273 = arith.select %271, %272, %270 : vector<2x128xf32>
    %274 = vector.broadcast %13 : vector<1x128xf32> to vector<2x128xf32>
    %275 = arith.mulf %273, %274 : vector<2x128xf32>
    %c0_120 = arith.constant 0 : index
    %c0_121 = arith.constant 0 : index
    %c64 = arith.constant 64 : index
    %276 = vector.load %arg6[%c0_120, %c0_121, %c64] : memref<3x2x576xf32, #tpu.memory_space<vmem>>, vector<1x2x128xf32>
    %277 = vector.shape_cast %276 : vector<1x2x128xf32> to vector<2x128xf32>
    %278 = arith.addf %277, %275 : vector<2x128xf32>
    %c0_122 = arith.constant 0 : index
    %c0_123 = arith.constant 0 : index
    %c64_124 = arith.constant 64 : index
    %279 = vector.load %arg6[%c0_122, %c0_123, %c64_124] : memref<3x2x576xf32, #tpu.memory_space<vmem>>, vector<1x2x128xf32>
    %280 = vector.shape_cast %279 : vector<1x2x128xf32> to vector<2x128xf32>
    %281 = vector.shape_cast %278 : vector<2x128xf32> to vector<1x2x128xf32>
    tpu.vector_store %arg6[%c0_122, %c0_123, %c64_124], %281 {strides = array<i32>} : memref<3x2x576xf32, #tpu.memory_space<vmem>>, vector<1x2x128xf32>,
    %282 = vector.extract_strided_slice %275 {offsets = [0, 64], sizes = [2, 64], strides = [1, 1]} : vector<2x128xf32> to vector<2x64xf32>
    %cst_125 = arith.constant dense<0.000000e+00> : vector<2xf32>
    %283 = vector.multi_reduction <add>, %282, %cst_125 [1] : vector<2x64xf32> to vector<2xf32>
    %284 = vector.shape_cast %283 : vector<2xf32> to vector<2x1xf32>
    %c1_i32_126 = arith.constant 1 : i32
    %285 = arith.cmpi eq, %256, %c1_i32_126 : i32
    %c2_i32_127 = arith.constant 2 : i32
    %c1_i32_128 = arith.constant 1 : i32
    %286 = arith.select %285, %c2_i32_127, %c1_i32_128 : i32
    %c2_i32_129 = arith.constant 2 : i32
    %287 = arith.cmpi eq, %256, %c2_i32_129 : i32
    %c0_i32_130 = arith.constant 0 : i32
    %288 = arith.select %287, %c0_i32_130, %286 : i32
    %c3_i32_131 = arith.constant 3 : i32
    %289 = arith.cmpi eq, %256, %c3_i32_131 : i32
    %c2_i32_132 = arith.constant 2 : i32
    %290 = arith.select %289, %c2_i32_132, %288 : i32
    %c4_i32_133 = arith.constant 4 : i32
    %291 = arith.cmpi eq, %256, %c4_i32_133 : i32
    %c0_i32_134 = arith.constant 0 : i32
    %292 = arith.select %291, %c0_i32_134, %290 : i32
    %c5_i32_135 = arith.constant 5 : i32
    %293 = arith.cmpi eq, %256, %c5_i32_135 : i32
    %c1_i32_136 = arith.constant 1 : i32
    %294 = arith.select %293, %c1_i32_136, %292 : i32
    %295 = vector.extract_strided_slice %179 {offsets = [0, 0], sizes = [2, 128], strides = [1, 1]} : vector<2x384xf32> to vector<2x128xf32>
    %c1_i32_137 = arith.constant 1 : i32
    %296 = arith.cmpi eq, %294, %c1_i32_137 : i32
    %297 = vector.extract_strided_slice %179 {offsets = [0, 128], sizes = [2, 128], strides = [1, 1]} : vector<2x384xf32> to vector<2x128xf32>
    %298 = arith.select %296, %297, %295 : vector<2x128xf32>
    %c2_i32_138 = arith.constant 2 : i32
    %299 = arith.cmpi eq, %294, %c2_i32_138 : i32
    %300 = vector.extract_strided_slice %179 {offsets = [0, 256], sizes = [2, 128], strides = [1, 1]} : vector<2x384xf32> to vector<2x128xf32>
    %301 = arith.select %299, %300, %298 : vector<2x128xf32>
    %302 = vector.broadcast %13 : vector<1x128xf32> to vector<2x128xf32>
    %303 = arith.mulf %301, %302 : vector<2x128xf32>
    %c1_139 = arith.constant 1 : index
    %c0_140 = arith.constant 0 : index
    %c64_141 = arith.constant 64 : index
    %304 = vector.load %arg6[%c1_139, %c0_140, %c64_141] : memref<3x2x576xf32, #tpu.memory_space<vmem>>, vector<1x2x128xf32>
    %305 = vector.shape_cast %304 : vector<1x2x128xf32> to vector<2x128xf32>
    %306 = arith.addf %305, %303 : vector<2x128xf32>
    %c1_142 = arith.constant 1 : index
    %c0_143 = arith.constant 0 : index
    %c64_144 = arith.constant 64 : index
    %307 = vector.load %arg6[%c1_142, %c0_143, %c64_144] : memref<3x2x576xf32, #tpu.memory_space<vmem>>, vector<1x2x128xf32>
    %308 = vector.shape_cast %307 : vector<1x2x128xf32> to vector<2x128xf32>
    %309 = vector.shape_cast %306 : vector<2x128xf32> to vector<1x2x128xf32>
    tpu.vector_store %arg6[%c1_142, %c0_143, %c64_144], %309 {strides = array<i32>} : memref<3x2x576xf32, #tpu.memory_space<vmem>>, vector<1x2x128xf32>,
    %310 = vector.extract_strided_slice %303 {offsets = [0, 64], sizes = [2, 64], strides = [1, 1]} : vector<2x128xf32> to vector<2x64xf32>
    %cst_145 = arith.constant dense<0.000000e+00> : vector<2xf32>
    %311 = vector.multi_reduction <add>, %310, %cst_145 [1] : vector<2x64xf32> to vector<2xf32>
    %312 = vector.shape_cast %311 : vector<2xf32> to vector<2x1xf32>
    %c1_i32_146 = arith.constant 1 : i32
    %313 = arith.cmpi eq, %256, %c1_i32_146 : i32
    %c1_i32_147 = arith.constant 1 : i32
    %c2_i32_148 = arith.constant 2 : i32
    %314 = arith.select %313, %c1_i32_147, %c2_i32_148 : i32
    %c2_i32_149 = arith.constant 2 : i32
    %315 = arith.cmpi eq, %256, %c2_i32_149 : i32
    %c2_i32_150 = arith.constant 2 : i32
    %316 = arith.select %315, %c2_i32_150, %314 : i32
    %c3_i32_151 = arith.constant 3 : i32
    %317 = arith.cmpi eq, %256, %c3_i32_151 : i32
    %c0_i32_152 = arith.constant 0 : i32
    %318 = arith.select %317, %c0_i32_152, %316 : i32
    %c4_i32_153 = arith.constant 4 : i32
    %319 = arith.cmpi eq, %256, %c4_i32_153 : i32
    %c1_i32_154 = arith.constant 1 : i32
    %320 = arith.select %319, %c1_i32_154, %318 : i32
    %c5_i32_155 = arith.constant 5 : i32
    %321 = arith.cmpi eq, %256, %c5_i32_155 : i32
    %c0_i32_156 = arith.constant 0 : i32
    %322 = arith.select %321, %c0_i32_156, %320 : i32
    %323 = vector.extract_strided_slice %179 {offsets = [0, 0], sizes = [2, 128], strides = [1, 1]} : vector<2x384xf32> to vector<2x128xf32>
    %c1_i32_157 = arith.constant 1 : i32
    %324 = arith.cmpi eq, %322, %c1_i32_157 : i32
    %325 = vector.extract_strided_slice %179 {offsets = [0, 128], sizes = [2, 128], strides = [1, 1]} : vector<2x384xf32> to vector<2x128xf32>
    %326 = arith.select %324, %325, %323 : vector<2x128xf32>
    %c2_i32_158 = arith.constant 2 : i32
    %327 = arith.cmpi eq, %322, %c2_i32_158 : i32
    %328 = vector.extract_strided_slice %179 {offsets = [0, 256], sizes = [2, 128], strides = [1, 1]} : vector<2x384xf32> to vector<2x128xf32>
    %329 = arith.select %327, %328, %326 : vector<2x128xf32>
    %330 = vector.broadcast %13 : vector<1x128xf32> to vector<2x128xf32>
    %331 = arith.mulf %329, %330 : vector<2x128xf32>
    %c2_159 = arith.constant 2 : index
    %c0_160 = arith.constant 0 : index
    %c64_161 = arith.constant 64 : index
    %332 = vector.load %arg6[%c2_159, %c0_160, %c64_161] : memref<3x2x576xf32, #tpu.memory_space<vmem>>, vector<1x2x128xf32>
    %333 = vector.shape_cast %332 : vector<1x2x128xf32> to vector<2x128xf32>
    %334 = arith.addf %333, %331 : vector<2x128xf32>
    %c2_162 = arith.constant 2 : index
    %c0_163 = arith.constant 0 : index
    %c64_164 = arith.constant 64 : index
    %335 = vector.load %arg6[%c2_162, %c0_163, %c64_164] : memref<3x2x576xf32, #tpu.memory_space<vmem>>, vector<1x2x128xf32>
    %336 = vector.shape_cast %335 : vector<1x2x128xf32> to vector<2x128xf32>
    %337 = vector.shape_cast %334 : vector<2x128xf32> to vector<1x2x128xf32>
    tpu.vector_store %arg6[%c2_162, %c0_163, %c64_164], %337 {strides = array<i32>} : memref<3x2x576xf32, #tpu.memory_space<vmem>>, vector<1x2x128xf32>,
    %338 = vector.extract_strided_slice %331 {offsets = [0, 64], sizes = [2, 64], strides = [1, 1]} : vector<2x128xf32> to vector<2x64xf32>
    %cst_165 = arith.constant dense<0.000000e+00> : vector<2xf32>
    %339 = vector.multi_reduction <add>, %338, %cst_165 [1] : vector<2x64xf32> to vector<2xf32>
    %340 = vector.shape_cast %339 : vector<2xf32> to vector<2x1xf32>
    %341 = vector.extract_strided_slice %12 {offsets = [4, 0], sizes = [2, 384], strides = [1, 1]} : vector<16x384xf32> to vector<2x384xf32>
    %342 = vector.extract_strided_slice %341 {offsets = [0, 0], sizes = [2, 64], strides = [1, 1]} : vector<2x384xf32> to vector<2x64xf32>
    %cst_166 = arith.constant dense<0.000000e+00> : vector<2xf32>
    %343 = vector.multi_reduction <add>, %342, %cst_166 [1] : vector<2x64xf32> to vector<2xf32>
    %344 = vector.shape_cast %343 : vector<2xf32> to vector<2x1xf32>
    %345 = vector.extract_strided_slice %341 {offsets = [0, 128], sizes = [2, 64], strides = [1, 1]} : vector<2x384xf32> to vector<2x64xf32>
    %cst_167 = arith.constant dense<0.000000e+00> : vector<2xf32>
    %346 = vector.multi_reduction <add>, %345, %cst_167 [1] : vector<2x64xf32> to vector<2xf32>
    %347 = vector.shape_cast %346 : vector<2xf32> to vector<2x1xf32>
    %348 = vector.extract_strided_slice %341 {offsets = [0, 256], sizes = [2, 64], strides = [1, 1]} : vector<2x384xf32> to vector<2x64xf32>
    %cst_168 = arith.constant dense<0.000000e+00> : vector<2xf32>
    %349 = vector.multi_reduction <add>, %348, %cst_168 [1] : vector<2x64xf32> to vector<2xf32>
    %350 = vector.shape_cast %349 : vector<2xf32> to vector<2x1xf32>
    %351 = arith.mulf %344, %284 : vector<2x1xf32>
    %352 = arith.mulf %347, %312 : vector<2x1xf32>
    %353 = arith.addf %351, %352 : vector<2x1xf32>
    %354 = arith.mulf %350, %340 : vector<2x1xf32>
    %355 = arith.addf %353, %354 : vector<2x1xf32>
    %356 = vector.shape_cast %355 : vector<2x1xf32> to vector<1x2x1xf32>
    %cst_169 = arith.constant dense<0.000000e+00> : vector<1xf32>
    %357 = vector.multi_reduction <add>, %356, %cst_169 [1, 2] : vector<1x2x1xf32> to vector<1xf32>
    %358 = vector.shape_cast %357 : vector<1xf32> to vector<1x1x1xf32>
    %359 = vector.extract %358[0, 0, 0] : f32 from vector<1x1x1xf32>
    %360 = arith.mulf %344, %284 : vector<2x1xf32>
    %361 = arith.mulf %350, %312 : vector<2x1xf32>
    %362 = arith.addf %360, %361 : vector<2x1xf32>
    %363 = arith.mulf %347, %340 : vector<2x1xf32>
    %364 = arith.addf %362, %363 : vector<2x1xf32>
    %365 = vector.shape_cast %364 : vector<2x1xf32> to vector<1x2x1xf32>
    %cst_170 = arith.constant dense<0.000000e+00> : vector<1xf32>
    %366 = vector.multi_reduction <add>, %365, %cst_170 [1, 2] : vector<1x2x1xf32> to vector<1xf32>
    %367 = vector.shape_cast %366 : vector<1xf32> to vector<1x1x1xf32>
    %368 = vector.extract %367[0, 0, 0] : f32 from vector<1x1x1xf32>
    %369 = arith.mulf %347, %284 : vector<2x1xf32>
    %370 = arith.mulf %344, %312 : vector<2x1xf32>
    %371 = arith.addf %369, %370 : vector<2x1xf32>
    %372 = arith.mulf %350, %340 : vector<2x1xf32>
    %373 = arith.addf %371, %372 : vector<2x1xf32>
    %374 = vector.shape_cast %373 : vector<2x1xf32> to vector<1x2x1xf32>
    %cst_171 = arith.constant dense<0.000000e+00> : vector<1xf32>
    %375 = vector.multi_reduction <add>, %374, %cst_171 [1, 2] : vector<1x2x1xf32> to vector<1xf32>
    %376 = vector.shape_cast %375 : vector<1xf32> to vector<1x1x1xf32>
    %377 = vector.extract %376[0, 0, 0] : f32 from vector<1x1x1xf32>
    %378 = arith.mulf %347, %284 : vector<2x1xf32>
    %379 = arith.mulf %350, %312 : vector<2x1xf32>
    %380 = arith.addf %378, %379 : vector<2x1xf32>
    %381 = arith.mulf %344, %340 : vector<2x1xf32>
    %382 = arith.addf %380, %381 : vector<2x1xf32>
    %383 = vector.shape_cast %382 : vector<2x1xf32> to vector<1x2x1xf32>
    %cst_172 = arith.constant dense<0.000000e+00> : vector<1xf32>
    %384 = vector.multi_reduction <add>, %383, %cst_172 [1, 2] : vector<1x2x1xf32> to vector<1xf32>
    %385 = vector.shape_cast %384 : vector<1xf32> to vector<1x1x1xf32>
    %386 = vector.extract %385[0, 0, 0] : f32 from vector<1x1x1xf32>
    %387 = arith.mulf %350, %284 : vector<2x1xf32>
    %388 = arith.mulf %344, %312 : vector<2x1xf32>
    %389 = arith.addf %387, %388 : vector<2x1xf32>
    %390 = arith.mulf %347, %340 : vector<2x1xf32>
    %391 = arith.addf %389, %390 : vector<2x1xf32>
    %392 = vector.shape_cast %391 : vector<2x1xf32> to vector<1x2x1xf32>
    %cst_173 = arith.constant dense<0.000000e+00> : vector<1xf32>
    %393 = vector.multi_reduction <add>, %392, %cst_173 [1, 2] : vector<1x2x1xf32> to vector<1xf32>
    %394 = vector.shape_cast %393 : vector<1xf32> to vector<1x1x1xf32>
    %395 = vector.extract %394[0, 0, 0] : f32 from vector<1x1x1xf32>
    %396 = arith.mulf %350, %284 : vector<2x1xf32>
    %397 = arith.mulf %347, %312 : vector<2x1xf32>
    %398 = arith.addf %396, %397 : vector<2x1xf32>
    %399 = arith.mulf %344, %340 : vector<2x1xf32>
    %400 = arith.addf %398, %399 : vector<2x1xf32>
    %401 = vector.shape_cast %400 : vector<2x1xf32> to vector<1x2x1xf32>
    %cst_174 = arith.constant dense<0.000000e+00> : vector<1xf32>
    %402 = vector.multi_reduction <add>, %401, %cst_174 [1, 2] : vector<1x2x1xf32> to vector<1xf32>
    %403 = vector.shape_cast %402 : vector<1xf32> to vector<1x1x1xf32>
    %404 = vector.extract %403[0, 0, 0] : f32 from vector<1x1x1xf32>
    %405 = arith.cmpf olt, %368, %359 : f32
    %406 = arith.select %405, %368, %359 : f32
    %c1_i32_175 = arith.constant 1 : i32
    %c0_i32_176 = arith.constant 0 : i32
    %407 = arith.select %405, %c1_i32_175, %c0_i32_176 : i32
    %408 = arith.cmpf olt, %377, %406 : f32
    %409 = arith.select %408, %377, %406 : f32
    %c2_i32_177 = arith.constant 2 : i32
    %410 = arith.select %408, %c2_i32_177, %407 : i32
    %411 = arith.cmpf olt, %386, %409 : f32
    %412 = arith.select %411, %386, %409 : f32
    %c3_i32_178 = arith.constant 3 : i32
    %413 = arith.select %411, %c3_i32_178, %410 : i32
    %414 = arith.cmpf olt, %395, %412 : f32
    %415 = arith.select %414, %395, %412 : f32
    %c4_i32_179 = arith.constant 4 : i32
    %416 = arith.select %414, %c4_i32_179, %413 : i32
    %417 = arith.cmpf olt, %404, %415 : f32
    %c5_i32_180 = arith.constant 5 : i32
    %418 = arith.select %417, %c5_i32_180, %416 : i32
    %c1_i32_181 = arith.constant 1 : i32
    %419 = arith.cmpi eq, %418, %c1_i32_181 : i32
    %c0_i32_182 = arith.constant 0 : i32
    %c0_i32_183 = arith.constant 0 : i32
    %420 = arith.select %419, %c0_i32_182, %c0_i32_183 : i32
    %c2_i32_184 = arith.constant 2 : i32
    %421 = arith.cmpi eq, %418, %c2_i32_184 : i32
    %c1_i32_185 = arith.constant 1 : i32
    %422 = arith.select %421, %c1_i32_185, %420 : i32
    %c3_i32_186 = arith.constant 3 : i32
    %423 = arith.cmpi eq, %418, %c3_i32_186 : i32
    %c1_i32_187 = arith.constant 1 : i32
    %424 = arith.select %423, %c1_i32_187, %422 : i32
    %c4_i32_188 = arith.constant 4 : i32
    %425 = arith.cmpi eq, %418, %c4_i32_188 : i32
    %c2_i32_189 = arith.constant 2 : i32
    %426 = arith.select %425, %c2_i32_189, %424 : i32
    %c5_i32_190 = arith.constant 5 : i32
    %427 = arith.cmpi eq, %418, %c5_i32_190 : i32
    %c2_i32_191 = arith.constant 2 : i32
    %428 = arith.select %427, %c2_i32_191, %426 : i32
    %429 = vector.extract_strided_slice %341 {offsets = [0, 0], sizes = [2, 128], strides = [1, 1]} : vector<2x384xf32> to vector<2x128xf32>
    %c1_i32_192 = arith.constant 1 : i32
    %430 = arith.cmpi eq, %428, %c1_i32_192 : i32
    %431 = vector.extract_strided_slice %341 {offsets = [0, 128], sizes = [2, 128], strides = [1, 1]} : vector<2x384xf32> to vector<2x128xf32>
    %432 = arith.select %430, %431, %429 : vector<2x128xf32>
    %c2_i32_193 = arith.constant 2 : i32
    %433 = arith.cmpi eq, %428, %c2_i32_193 : i32
    %434 = vector.extract_strided_slice %341 {offsets = [0, 256], sizes = [2, 128], strides = [1, 1]} : vector<2x384xf32> to vector<2x128xf32>
    %435 = arith.select %433, %434, %432 : vector<2x128xf32>
    %436 = vector.broadcast %13 : vector<1x128xf32> to vector<2x128xf32>
    %437 = arith.mulf %435, %436 : vector<2x128xf32>
    %c0_194 = arith.constant 0 : index
    %c0_195 = arith.constant 0 : index
    %c128 = arith.constant 128 : index
    %438 = vector.load %arg6[%c0_194, %c0_195, %c128] : memref<3x2x576xf32, #tpu.memory_space<vmem>>, vector<1x2x128xf32>
    %439 = vector.shape_cast %438 : vector<1x2x128xf32> to vector<2x128xf32>
    %440 = arith.addf %439, %437 : vector<2x128xf32>
    %c0_196 = arith.constant 0 : index
    %c0_197 = arith.constant 0 : index
    %c128_198 = arith.constant 128 : index
    %441 = vector.load %arg6[%c0_196, %c0_197, %c128_198] : memref<3x2x576xf32, #tpu.memory_space<vmem>>, vector<1x2x128xf32>
    %442 = vector.shape_cast %441 : vector<1x2x128xf32> to vector<2x128xf32>
    %443 = vector.shape_cast %440 : vector<2x128xf32> to vector<1x2x128xf32>
    tpu.vector_store %arg6[%c0_196, %c0_197, %c128_198], %443 {strides = array<i32>} : memref<3x2x576xf32, #tpu.memory_space<vmem>>, vector<1x2x128xf32>,
    %444 = vector.extract_strided_slice %437 {offsets = [0, 64], sizes = [2, 64], strides = [1, 1]} : vector<2x128xf32> to vector<2x64xf32>
    %cst_199 = arith.constant dense<0.000000e+00> : vector<2xf32>
    %445 = vector.multi_reduction <add>, %444, %cst_199 [1] : vector<2x64xf32> to vector<2xf32>
    %446 = vector.shape_cast %445 : vector<2xf32> to vector<2x1xf32>
    %c1_i32_200 = arith.constant 1 : i32
    %447 = arith.cmpi eq, %418, %c1_i32_200 : i32
    %c2_i32_201 = arith.constant 2 : i32
    %c1_i32_202 = arith.constant 1 : i32
    %448 = arith.select %447, %c2_i32_201, %c1_i32_202 : i32
    %c2_i32_203 = arith.constant 2 : i32
    %449 = arith.cmpi eq, %418, %c2_i32_203 : i32
    %c0_i32_204 = arith.constant 0 : i32
    %450 = arith.select %449, %c0_i32_204, %448 : i32
    %c3_i32_205 = arith.constant 3 : i32
    %451 = arith.cmpi eq, %418, %c3_i32_205 : i32
    %c2_i32_206 = arith.constant 2 : i32
    %452 = arith.select %451, %c2_i32_206, %450 : i32
    %c4_i32_207 = arith.constant 4 : i32
    %453 = arith.cmpi eq, %418, %c4_i32_207 : i32
    %c0_i32_208 = arith.constant 0 : i32
    %454 = arith.select %453, %c0_i32_208, %452 : i32
    %c5_i32_209 = arith.constant 5 : i32
    %455 = arith.cmpi eq, %418, %c5_i32_209 : i32
    %c1_i32_210 = arith.constant 1 : i32
    %456 = arith.select %455, %c1_i32_210, %454 : i32
    %457 = vector.extract_strided_slice %341 {offsets = [0, 0], sizes = [2, 128], strides = [1, 1]} : vector<2x384xf32> to vector<2x128xf32>
    %c1_i32_211 = arith.constant 1 : i32
    %458 = arith.cmpi eq, %456, %c1_i32_211 : i32
    %459 = vector.extract_strided_slice %341 {offsets = [0, 128], sizes = [2, 128], strides = [1, 1]} : vector<2x384xf32> to vector<2x128xf32>
    %460 = arith.select %458, %459, %457 : vector<2x128xf32>
    %c2_i32_212 = arith.constant 2 : i32
    %461 = arith.cmpi eq, %456, %c2_i32_212 : i32
    %462 = vector.extract_strided_slice %341 {offsets = [0, 256], sizes = [2, 128], strides = [1, 1]} : vector<2x384xf32> to vector<2x128xf32>
    %463 = arith.select %461, %462, %460 : vector<2x128xf32>
    %464 = vector.broadcast %13 : vector<1x128xf32> to vector<2x128xf32>
    %465 = arith.mulf %463, %464 : vector<2x128xf32>
    %c1_213 = arith.constant 1 : index
    %c0_214 = arith.constant 0 : index
    %c128_215 = arith.constant 128 : index
    %466 = vector.load %arg6[%c1_213, %c0_214, %c128_215] : memref<3x2x576xf32, #tpu.memory_space<vmem>>, vector<1x2x128xf32>
    %467 = vector.shape_cast %466 : vector<1x2x128xf32> to vector<2x128xf32>
    %468 = arith.addf %467, %465 : vector<2x128xf32>
    %c1_216 = arith.constant 1 : index
    %c0_217 = arith.constant 0 : index
    %c128_218 = arith.constant 128 : index
    %469 = vector.load %arg6[%c1_216, %c0_217, %c128_218] : memref<3x2x576xf32, #tpu.memory_space<vmem>>, vector<1x2x128xf32>
    %470 = vector.shape_cast %469 : vector<1x2x128xf32> to vector<2x128xf32>
    %471 = vector.shape_cast %468 : vector<2x128xf32> to vector<1x2x128xf32>
    tpu.vector_store %arg6[%c1_216, %c0_217, %c128_218], %471 {strides = array<i32>} : memref<3x2x576xf32, #tpu.memory_space<vmem>>, vector<1x2x128xf32>,
    %472 = vector.extract_strided_slice %465 {offsets = [0, 64], sizes = [2, 64], strides = [1, 1]} : vector<2x128xf32> to vector<2x64xf32>
    %cst_219 = arith.constant dense<0.000000e+00> : vector<2xf32>
    %473 = vector.multi_reduction <add>, %472, %cst_219 [1] : vector<2x64xf32> to vector<2xf32>
    %474 = vector.shape_cast %473 : vector<2xf32> to vector<2x1xf32>
    %c1_i32_220 = arith.constant 1 : i32
    %475 = arith.cmpi eq, %418, %c1_i32_220 : i32
    %c1_i32_221 = arith.constant 1 : i32
    %c2_i32_222 = arith.constant 2 : i32
    %476 = arith.select %475, %c1_i32_221, %c2_i32_222 : i32
    %c2_i32_223 = arith.constant 2 : i32
    %477 = arith.cmpi eq, %418, %c2_i32_223 : i32
    %c2_i32_224 = arith.constant 2 : i32
    %478 = arith.select %477, %c2_i32_224, %476 : i32
    %c3_i32_225 = arith.constant 3 : i32
    %479 = arith.cmpi eq, %418, %c3_i32_225 : i32
    %c0_i32_226 = arith.constant 0 : i32
    %480 = arith.select %479, %c0_i32_226, %478 : i32
    %c4_i32_227 = arith.constant 4 : i32
    %481 = arith.cmpi eq, %418, %c4_i32_227 : i32
    %c1_i32_228 = arith.constant 1 : i32
    %482 = arith.select %481, %c1_i32_228, %480 : i32
    %c5_i32_229 = arith.constant 5 : i32
    %483 = arith.cmpi eq, %418, %c5_i32_229 : i32
    %c0_i32_230 = arith.constant 0 : i32
    %484 = arith.select %483, %c0_i32_230, %482 : i32
    %485 = vector.extract_strided_slice %341 {offsets = [0, 0], sizes = [2, 128], strides = [1, 1]} : vector<2x384xf32> to vector<2x128xf32>
    %c1_i32_231 = arith.constant 1 : i32
    %486 = arith.cmpi eq, %484, %c1_i32_231 : i32
    %487 = vector.extract_strided_slice %341 {offsets = [0, 128], sizes = [2, 128], strides = [1, 1]} : vector<2x384xf32> to vector<2x128xf32>
    %488 = arith.select %486, %487, %485 : vector<2x128xf32>
    %c2_i32_232 = arith.constant 2 : i32
    %489 = arith.cmpi eq, %484, %c2_i32_232 : i32
    %490 = vector.extract_strided_slice %341 {offsets = [0, 256], sizes = [2, 128], strides = [1, 1]} : vector<2x384xf32> to vector<2x128xf32>
    %491 = arith.select %489, %490, %488 : vector<2x128xf32>
    %492 = vector.broadcast %13 : vector<1x128xf32> to vector<2x128xf32>
    %493 = arith.mulf %491, %492 : vector<2x128xf32>
    %c2_233 = arith.constant 2 : index
    %c0_234 = arith.constant 0 : index
    %c128_235 = arith.constant 128 : index
    %494 = vector.load %arg6[%c2_233, %c0_234, %c128_235] : memref<3x2x576xf32, #tpu.memory_space<vmem>>, vector<1x2x128xf32>
    %495 = vector.shape_cast %494 : vector<1x2x128xf32> to vector<2x128xf32>
    %496 = arith.addf %495, %493 : vector<2x128xf32>
    %c2_236 = arith.constant 2 : index
    %c0_237 = arith.constant 0 : index
    %c128_238 = arith.constant 128 : index
    %497 = vector.load %arg6[%c2_236, %c0_237, %c128_238] : memref<3x2x576xf32, #tpu.memory_space<vmem>>, vector<1x2x128xf32>
    %498 = vector.shape_cast %497 : vector<1x2x128xf32> to vector<2x128xf32>
    %499 = vector.shape_cast %496 : vector<2x128xf32> to vector<1x2x128xf32>
    tpu.vector_store %arg6[%c2_236, %c0_237, %c128_238], %499 {strides = array<i32>} : memref<3x2x576xf32, #tpu.memory_space<vmem>>, vector<1x2x128xf32>,
    %500 = vector.extract_strided_slice %493 {offsets = [0, 64], sizes = [2, 64], strides = [1, 1]} : vector<2x128xf32> to vector<2x64xf32>
    %cst_239 = arith.constant dense<0.000000e+00> : vector<2xf32>
    %501 = vector.multi_reduction <add>, %500, %cst_239 [1] : vector<2x64xf32> to vector<2xf32>
    %502 = vector.shape_cast %501 : vector<2xf32> to vector<2x1xf32>
    %503 = vector.extract_strided_slice %12 {offsets = [6, 0], sizes = [2, 384], strides = [1, 1]} : vector<16x384xf32> to vector<2x384xf32>
    %504 = vector.extract_strided_slice %503 {offsets = [0, 0], sizes = [2, 64], strides = [1, 1]} : vector<2x384xf32> to vector<2x64xf32>
    %cst_240 = arith.constant dense<0.000000e+00> : vector<2xf32>
    %505 = vector.multi_reduction <add>, %504, %cst_240 [1] : vector<2x64xf32> to vector<2xf32>
    %506 = vector.shape_cast %505 : vector<2xf32> to vector<2x1xf32>
    %507 = vector.extract_strided_slice %503 {offsets = [0, 128], sizes = [2, 64], strides = [1, 1]} : vector<2x384xf32> to vector<2x64xf32>
    %cst_241 = arith.constant dense<0.000000e+00> : vector<2xf32>
    %508 = vector.multi_reduction <add>, %507, %cst_241 [1] : vector<2x64xf32> to vector<2xf32>
    %509 = vector.shape_cast %508 : vector<2xf32> to vector<2x1xf32>
    %510 = vector.extract_strided_slice %503 {offsets = [0, 256], sizes = [2, 64], strides = [1, 1]} : vector<2x384xf32> to vector<2x64xf32>
    %cst_242 = arith.constant dense<0.000000e+00> : vector<2xf32>
    %511 = vector.multi_reduction <add>, %510, %cst_242 [1] : vector<2x64xf32> to vector<2xf32>
    %512 = vector.shape_cast %511 : vector<2xf32> to vector<2x1xf32>
    %513 = arith.mulf %506, %446 : vector<2x1xf32>
    %514 = arith.mulf %509, %474 : vector<2x1xf32>
    %515 = arith.addf %513, %514 : vector<2x1xf32>
    %516 = arith.mulf %512, %502 : vector<2x1xf32>
    %517 = arith.addf %515, %516 : vector<2x1xf32>
    %518 = vector.shape_cast %517 : vector<2x1xf32> to vector<1x2x1xf32>
    %cst_243 = arith.constant dense<0.000000e+00> : vector<1xf32>
    %519 = vector.multi_reduction <add>, %518, %cst_243 [1, 2] : vector<1x2x1xf32> to vector<1xf32>
    %520 = vector.shape_cast %519 : vector<1xf32> to vector<1x1x1xf32>
    %521 = vector.extract %520[0, 0, 0] : f32 from vector<1x1x1xf32>
    %522 = arith.mulf %506, %446 : vector<2x1xf32>
    %523 = arith.mulf %512, %474 : vector<2x1xf32>
    %524 = arith.addf %522, %523 : vector<2x1xf32>
    %525 = arith.mulf %509, %502 : vector<2x1xf32>
    %526 = arith.addf %524, %525 : vector<2x1xf32>
    %527 = vector.shape_cast %526 : vector<2x1xf32> to vector<1x2x1xf32>
    %cst_244 = arith.constant dense<0.000000e+00> : vector<1xf32>
    %528 = vector.multi_reduction <add>, %527, %cst_244 [1, 2] : vector<1x2x1xf32> to vector<1xf32>
    %529 = vector.shape_cast %528 : vector<1xf32> to vector<1x1x1xf32>
    %530 = vector.extract %529[0, 0, 0] : f32 from vector<1x1x1xf32>
    %531 = arith.mulf %509, %446 : vector<2x1xf32>
    %532 = arith.mulf %506, %474 : vector<2x1xf32>
    %533 = arith.addf %531, %532 : vector<2x1xf32>
    %534 = arith.mulf %512, %502 : vector<2x1xf32>
    %535 = arith.addf %533, %534 : vector<2x1xf32>
    %536 = vector.shape_cast %535 : vector<2x1xf32> to vector<1x2x1xf32>
    %cst_245 = arith.constant dense<0.000000e+00> : vector<1xf32>
    %537 = vector.multi_reduction <add>, %536, %cst_245 [1, 2] : vector<1x2x1xf32> to vector<1xf32>
    %538 = vector.shape_cast %537 : vector<1xf32> to vector<1x1x1xf32>
    %539 = vector.extract %538[0, 0, 0] : f32 from vector<1x1x1xf32>
    %540 = arith.mulf %509, %446 : vector<2x1xf32>
    %541 = arith.mulf %512, %474 : vector<2x1xf32>
    %542 = arith.addf %540, %541 : vector<2x1xf32>
    %543 = arith.mulf %506, %502 : vector<2x1xf32>
    %544 = arith.addf %542, %543 : vector<2x1xf32>
    %545 = vector.shape_cast %544 : vector<2x1xf32> to vector<1x2x1xf32>
    %cst_246 = arith.constant dense<0.000000e+00> : vector<1xf32>
    %546 = vector.multi_reduction <add>, %545, %cst_246 [1, 2] : vector<1x2x1xf32> to vector<1xf32>
    %547 = vector.shape_cast %546 : vector<1xf32> to vector<1x1x1xf32>
    %548 = vector.extract %547[0, 0, 0] : f32 from vector<1x1x1xf32>
    %549 = arith.mulf %512, %446 : vector<2x1xf32>
    %550 = arith.mulf %506, %474 : vector<2x1xf32>
    %551 = arith.addf %549, %550 : vector<2x1xf32>
    %552 = arith.mulf %509, %502 : vector<2x1xf32>
    %553 = arith.addf %551, %552 : vector<2x1xf32>
    %554 = vector.shape_cast %553 : vector<2x1xf32> to vector<1x2x1xf32>
    %cst_247 = arith.constant dense<0.000000e+00> : vector<1xf32>
    %555 = vector.multi_reduction <add>, %554, %cst_247 [1, 2] : vector<1x2x1xf32> to vector<1xf32>
    %556 = vector.shape_cast %555 : vector<1xf32> to vector<1x1x1xf32>
    %557 = vector.extract %556[0, 0, 0] : f32 from vector<1x1x1xf32>
    %558 = arith.mulf %512, %446 : vector<2x1xf32>
    %559 = arith.mulf %509, %474 : vector<2x1xf32>
    %560 = arith.addf %558, %559 : vector<2x1xf32>
    %561 = arith.mulf %506, %502 : vector<2x1xf32>
    %562 = arith.addf %560, %561 : vector<2x1xf32>
    %563 = vector.shape_cast %562 : vector<2x1xf32> to vector<1x2x1xf32>
    %cst_248 = arith.constant dense<0.000000e+00> : vector<1xf32>
    %564 = vector.multi_reduction <add>, %563, %cst_248 [1, 2] : vector<1x2x1xf32> to vector<1xf32>
    %565 = vector.shape_cast %564 : vector<1xf32> to vector<1x1x1xf32>
    %566 = vector.extract %565[0, 0, 0] : f32 from vector<1x1x1xf32>
    %567 = arith.cmpf olt, %530, %521 : f32
    %568 = arith.select %567, %530, %521 : f32
    %c1_i32_249 = arith.constant 1 : i32
    %c0_i32_250 = arith.constant 0 : i32
    %569 = arith.select %567, %c1_i32_249, %c0_i32_250 : i32
    %570 = arith.cmpf olt, %539, %568 : f32
    %571 = arith.select %570, %539, %568 : f32
    %c2_i32_251 = arith.constant 2 : i32
    %572 = arith.select %570, %c2_i32_251, %569 : i32
    %573 = arith.cmpf olt, %548, %571 : f32
    %574 = arith.select %573, %548, %571 : f32
    %c3_i32_252 = arith.constant 3 : i32
    %575 = arith.select %573, %c3_i32_252, %572 : i32
    %576 = arith.cmpf olt, %557, %574 : f32
    %577 = arith.select %576, %557, %574 : f32
    %c4_i32_253 = arith.constant 4 : i32
    %578 = arith.select %576, %c4_i32_253, %575 : i32
    %579 = arith.cmpf olt, %566, %577 : f32
    %c5_i32_254 = arith.constant 5 : i32
    %580 = arith.select %579, %c5_i32_254, %578 : i32
    %c1_i32_255 = arith.constant 1 : i32
    %581 = arith.cmpi eq, %580, %c1_i32_255 : i32
    %c0_i32_256 = arith.constant 0 : i32
    %c0_i32_257 = arith.constant 0 : i32
    %582 = arith.select %581, %c0_i32_256, %c0_i32_257 : i32
    %c2_i32_258 = arith.constant 2 : i32
    %583 = arith.cmpi eq, %580, %c2_i32_258 : i32
    %c1_i32_259 = arith.constant 1 : i32
    %584 = arith.select %583, %c1_i32_259, %582 : i32
    %c3_i32_260 = arith.constant 3 : i32
    %585 = arith.cmpi eq, %580, %c3_i32_260 : i32
    %c1_i32_261 = arith.constant 1 : i32
    %586 = arith.select %585, %c1_i32_261, %584 : i32
    %c4_i32_262 = arith.constant 4 : i32
    %587 = arith.cmpi eq, %580, %c4_i32_262 : i32
    %c2_i32_263 = arith.constant 2 : i32
    %588 = arith.select %587, %c2_i32_263, %586 : i32
    %c5_i32_264 = arith.constant 5 : i32
    %589 = arith.cmpi eq, %580, %c5_i32_264 : i32
    %c2_i32_265 = arith.constant 2 : i32
    %590 = arith.select %589, %c2_i32_265, %588 : i32
    %591 = vector.extract_strided_slice %503 {offsets = [0, 0], sizes = [2, 128], strides = [1, 1]} : vector<2x384xf32> to vector<2x128xf32>
    %c1_i32_266 = arith.constant 1 : i32
    %592 = arith.cmpi eq, %590, %c1_i32_266 : i32
    %593 = vector.extract_strided_slice %503 {offsets = [0, 128], sizes = [2, 128], strides = [1, 1]} : vector<2x384xf32> to vector<2x128xf32>
    %594 = arith.select %592, %593, %591 : vector<2x128xf32>
    %c2_i32_267 = arith.constant 2 : i32
    %595 = arith.cmpi eq, %590, %c2_i32_267 : i32
    %596 = vector.extract_strided_slice %503 {offsets = [0, 256], sizes = [2, 128], strides = [1, 1]} : vector<2x384xf32> to vector<2x128xf32>
    %597 = arith.select %595, %596, %594 : vector<2x128xf32>
    %598 = vector.broadcast %13 : vector<1x128xf32> to vector<2x128xf32>
    %599 = arith.mulf %597, %598 : vector<2x128xf32>
    %c0_268 = arith.constant 0 : index
    %c0_269 = arith.constant 0 : index
    %c192 = arith.constant 192 : index
    %600 = vector.load %arg6[%c0_268, %c0_269, %c192] : memref<3x2x576xf32, #tpu.memory_space<vmem>>, vector<1x2x128xf32>
    %601 = vector.shape_cast %600 : vector<1x2x128xf32> to vector<2x128xf32>
    %602 = arith.addf %601, %599 : vector<2x128xf32>
    %c0_270 = arith.constant 0 : index
    %c0_271 = arith.constant 0 : index
    %c192_272 = arith.constant 192 : index
    %603 = vector.load %arg6[%c0_270, %c0_271, %c192_272] : memref<3x2x576xf32, #tpu.memory_space<vmem>>, vector<1x2x128xf32>
    %604 = vector.shape_cast %603 : vector<1x2x128xf32> to vector<2x128xf32>
    %605 = vector.shape_cast %602 : vector<2x128xf32> to vector<1x2x128xf32>
    tpu.vector_store %arg6[%c0_270, %c0_271, %c192_272], %605 {strides = array<i32>} : memref<3x2x576xf32, #tpu.memory_space<vmem>>, vector<1x2x128xf32>,
    %606 = vector.extract_strided_slice %599 {offsets = [0, 64], sizes = [2, 64], strides = [1, 1]} : vector<2x128xf32> to vector<2x64xf32>
    %cst_273 = arith.constant dense<0.000000e+00> : vector<2xf32>
    %607 = vector.multi_reduction <add>, %606, %cst_273 [1] : vector<2x64xf32> to vector<2xf32>
    %608 = vector.shape_cast %607 : vector<2xf32> to vector<2x1xf32>
    %c1_i32_274 = arith.constant 1 : i32
    %609 = arith.cmpi eq, %580, %c1_i32_274 : i32
    %c2_i32_275 = arith.constant 2 : i32
    %c1_i32_276 = arith.constant 1 : i32
    %610 = arith.select %609, %c2_i32_275, %c1_i32_276 : i32
    %c2_i32_277 = arith.constant 2 : i32
    %611 = arith.cmpi eq, %580, %c2_i32_277 : i32
    %c0_i32_278 = arith.constant 0 : i32
    %612 = arith.select %611, %c0_i32_278, %610 : i32
    %c3_i32_279 = arith.constant 3 : i32
    %613 = arith.cmpi eq, %580, %c3_i32_279 : i32
    %c2_i32_280 = arith.constant 2 : i32
    %614 = arith.select %613, %c2_i32_280, %612 : i32
    %c4_i32_281 = arith.constant 4 : i32
    %615 = arith.cmpi eq, %580, %c4_i32_281 : i32
    %c0_i32_282 = arith.constant 0 : i32
    %616 = arith.select %615, %c0_i32_282, %614 : i32
    %c5_i32_283 = arith.constant 5 : i32
    %617 = arith.cmpi eq, %580, %c5_i32_283 : i32
    %c1_i32_284 = arith.constant 1 : i32
    %618 = arith.select %617, %c1_i32_284, %616 : i32
    %619 = vector.extract_strided_slice %503 {offsets = [0, 0], sizes = [2, 128], strides = [1, 1]} : vector<2x384xf32> to vector<2x128xf32>
    %c1_i32_285 = arith.constant 1 : i32
    %620 = arith.cmpi eq, %618, %c1_i32_285 : i32
    %621 = vector.extract_strided_slice %503 {offsets = [0, 128], sizes = [2, 128], strides = [1, 1]} : vector<2x384xf32> to vector<2x128xf32>
    %622 = arith.select %620, %621, %619 : vector<2x128xf32>
    %c2_i32_286 = arith.constant 2 : i32
    %623 = arith.cmpi eq, %618, %c2_i32_286 : i32
    %624 = vector.extract_strided_slice %503 {offsets = [0, 256], sizes = [2, 128], strides = [1, 1]} : vector<2x384xf32> to vector<2x128xf32>
    %625 = arith.select %623, %624, %622 : vector<2x128xf32>
    %626 = vector.broadcast %13 : vector<1x128xf32> to vector<2x128xf32>
    %627 = arith.mulf %625, %626 : vector<2x128xf32>
    %c1_287 = arith.constant 1 : index
    %c0_288 = arith.constant 0 : index
    %c192_289 = arith.constant 192 : index
    %628 = vector.load %arg6[%c1_287, %c0_288, %c192_289] : memref<3x2x576xf32, #tpu.memory_space<vmem>>, vector<1x2x128xf32>
    %629 = vector.shape_cast %628 : vector<1x2x128xf32> to vector<2x128xf32>
    %630 = arith.addf %629, %627 : vector<2x128xf32>
    %c1_290 = arith.constant 1 : index
    %c0_291 = arith.constant 0 : index
    %c192_292 = arith.constant 192 : index
    %631 = vector.load %arg6[%c1_290, %c0_291, %c192_292] : memref<3x2x576xf32, #tpu.memory_space<vmem>>, vector<1x2x128xf32>
    %632 = vector.shape_cast %631 : vector<1x2x128xf32> to vector<2x128xf32>
    %633 = vector.shape_cast %630 : vector<2x128xf32> to vector<1x2x128xf32>
    tpu.vector_store %arg6[%c1_290, %c0_291, %c192_292], %633 {strides = array<i32>} : memref<3x2x576xf32, #tpu.memory_space<vmem>>, vector<1x2x128xf32>,
    %634 = vector.extract_strided_slice %627 {offsets = [0, 64], sizes = [2, 64], strides = [1, 1]} : vector<2x128xf32> to vector<2x64xf32>
    %cst_293 = arith.constant dense<0.000000e+00> : vector<2xf32>
    %635 = vector.multi_reduction <add>, %634, %cst_293 [1] : vector<2x64xf32> to vector<2xf32>
    %636 = vector.shape_cast %635 : vector<2xf32> to vector<2x1xf32>
    %c1_i32_294 = arith.constant 1 : i32
    %637 = arith.cmpi eq, %580, %c1_i32_294 : i32
    %c1_i32_295 = arith.constant 1 : i32
    %c2_i32_296 = arith.constant 2 : i32
    %638 = arith.select %637, %c1_i32_295, %c2_i32_296 : i32
    %c2_i32_297 = arith.constant 2 : i32
    %639 = arith.cmpi eq, %580, %c2_i32_297 : i32
    %c2_i32_298 = arith.constant 2 : i32
    %640 = arith.select %639, %c2_i32_298, %638 : i32
    %c3_i32_299 = arith.constant 3 : i32
    %641 = arith.cmpi eq, %580, %c3_i32_299 : i32
    %c0_i32_300 = arith.constant 0 : i32
    %642 = arith.select %641, %c0_i32_300, %640 : i32
    %c4_i32_301 = arith.constant 4 : i32
    %643 = arith.cmpi eq, %580, %c4_i32_301 : i32
    %c1_i32_302 = arith.constant 1 : i32
    %644 = arith.select %643, %c1_i32_302, %642 : i32
    %c5_i32_303 = arith.constant 5 : i32
    %645 = arith.cmpi eq, %580, %c5_i32_303 : i32
    %c0_i32_304 = arith.constant 0 : i32
    %646 = arith.select %645, %c0_i32_304, %644 : i32
    %647 = vector.extract_strided_slice %503 {offsets = [0, 0], sizes = [2, 128], strides = [1, 1]} : vector<2x384xf32> to vector<2x128xf32>
    %c1_i32_305 = arith.constant 1 : i32
    %648 = arith.cmpi eq, %646, %c1_i32_305 : i32
    %649 = vector.extract_strided_slice %503 {offsets = [0, 128], sizes = [2, 128], strides = [1, 1]} : vector<2x384xf32> to vector<2x128xf32>
    %650 = arith.select %648, %649, %647 : vector<2x128xf32>
    %c2_i32_306 = arith.constant 2 : i32
    %651 = arith.cmpi eq, %646, %c2_i32_306 : i32
    %652 = vector.extract_strided_slice %503 {offsets = [0, 256], sizes = [2, 128], strides = [1, 1]} : vector<2x384xf32> to vector<2x128xf32>
    %653 = arith.select %651, %652, %650 : vector<2x128xf32>
    %654 = vector.broadcast %13 : vector<1x128xf32> to vector<2x128xf32>
    %655 = arith.mulf %653, %654 : vector<2x128xf32>
    %c2_307 = arith.constant 2 : index
    %c0_308 = arith.constant 0 : index
    %c192_309 = arith.constant 192 : index
    %656 = vector.load %arg6[%c2_307, %c0_308, %c192_309] : memref<3x2x576xf32, #tpu.memory_space<vmem>>, vector<1x2x128xf32>
    %657 = vector.shape_cast %656 : vector<1x2x128xf32> to vector<2x128xf32>
    %658 = arith.addf %657, %655 : vector<2x128xf32>
    %c2_310 = arith.constant 2 : index
    %c0_311 = arith.constant 0 : index
    %c192_312 = arith.constant 192 : index
    %659 = vector.load %arg6[%c2_310, %c0_311, %c192_312] : memref<3x2x576xf32, #tpu.memory_space<vmem>>, vector<1x2x128xf32>
    %660 = vector.shape_cast %659 : vector<1x2x128xf32> to vector<2x128xf32>
    %661 = vector.shape_cast %658 : vector<2x128xf32> to vector<1x2x128xf32>
    tpu.vector_store %arg6[%c2_310, %c0_311, %c192_312], %661 {strides = array<i32>} : memref<3x2x576xf32, #tpu.memory_space<vmem>>, vector<1x2x128xf32>,
    %662 = vector.extract_strided_slice %655 {offsets = [0, 64], sizes = [2, 64], strides = [1, 1]} : vector<2x128xf32> to vector<2x64xf32>
    %cst_313 = arith.constant dense<0.000000e+00> : vector<2xf32>
    %663 = vector.multi_reduction <add>, %662, %cst_313 [1] : vector<2x64xf32> to vector<2xf32>
    %664 = vector.shape_cast %663 : vector<2xf32> to vector<2x1xf32>
    %665 = vector.extract_strided_slice %12 {offsets = [8, 0], sizes = [2, 384], strides = [1, 1]} : vector<16x384xf32> to vector<2x384xf32>
    %666 = vector.extract_strided_slice %665 {offsets = [0, 0], sizes = [2, 64], strides = [1, 1]} : vector<2x384xf32> to vector<2x64xf32>
    %cst_314 = arith.constant dense<0.000000e+00> : vector<2xf32>
    %667 = vector.multi_reduction <add>, %666, %cst_314 [1] : vector<2x64xf32> to vector<2xf32>
    %668 = vector.shape_cast %667 : vector<2xf32> to vector<2x1xf32>
    %669 = vector.extract_strided_slice %665 {offsets = [0, 128], sizes = [2, 64], strides = [1, 1]} : vector<2x384xf32> to vector<2x64xf32>
    %cst_315 = arith.constant dense<0.000000e+00> : vector<2xf32>
    %670 = vector.multi_reduction <add>, %669, %cst_315 [1] : vector<2x64xf32> to vector<2xf32>
    %671 = vector.shape_cast %670 : vector<2xf32> to vector<2x1xf32>
    %672 = vector.extract_strided_slice %665 {offsets = [0, 256], sizes = [2, 64], strides = [1, 1]} : vector<2x384xf32> to vector<2x64xf32>
    %cst_316 = arith.constant dense<0.000000e+00> : vector<2xf32>
    %673 = vector.multi_reduction <add>, %672, %cst_316 [1] : vector<2x64xf32> to vector<2xf32>
    %674 = vector.shape_cast %673 : vector<2xf32> to vector<2x1xf32>
    %675 = arith.mulf %668, %608 : vector<2x1xf32>
    %676 = arith.mulf %671, %636 : vector<2x1xf32>
    %677 = arith.addf %675, %676 : vector<2x1xf32>
    %678 = arith.mulf %674, %664 : vector<2x1xf32>
    %679 = arith.addf %677, %678 : vector<2x1xf32>
    %680 = vector.shape_cast %679 : vector<2x1xf32> to vector<1x2x1xf32>
    %cst_317 = arith.constant dense<0.000000e+00> : vector<1xf32>
    %681 = vector.multi_reduction <add>, %680, %cst_317 [1, 2] : vector<1x2x1xf32> to vector<1xf32>
    %682 = vector.shape_cast %681 : vector<1xf32> to vector<1x1x1xf32>
    %683 = vector.extract %682[0, 0, 0] : f32 from vector<1x1x1xf32>
    %684 = arith.mulf %668, %608 : vector<2x1xf32>
    %685 = arith.mulf %674, %636 : vector<2x1xf32>
    %686 = arith.addf %684, %685 : vector<2x1xf32>
    %687 = arith.mulf %671, %664 : vector<2x1xf32>
    %688 = arith.addf %686, %687 : vector<2x1xf32>
    %689 = vector.shape_cast %688 : vector<2x1xf32> to vector<1x2x1xf32>
    %cst_318 = arith.constant dense<0.000000e+00> : vector<1xf32>
    %690 = vector.multi_reduction <add>, %689, %cst_318 [1, 2] : vector<1x2x1xf32> to vector<1xf32>
    %691 = vector.shape_cast %690 : vector<1xf32> to vector<1x1x1xf32>
    %692 = vector.extract %691[0, 0, 0] : f32 from vector<1x1x1xf32>
    %693 = arith.mulf %671, %608 : vector<2x1xf32>
    %694 = arith.mulf %668, %636 : vector<2x1xf32>
    %695 = arith.addf %693, %694 : vector<2x1xf32>
    %696 = arith.mulf %674, %664 : vector<2x1xf32>
    %697 = arith.addf %695, %696 : vector<2x1xf32>
    %698 = vector.shape_cast %697 : vector<2x1xf32> to vector<1x2x1xf32>
    %cst_319 = arith.constant dense<0.000000e+00> : vector<1xf32>
    %699 = vector.multi_reduction <add>, %698, %cst_319 [1, 2] : vector<1x2x1xf32> to vector<1xf32>
    %700 = vector.shape_cast %699 : vector<1xf32> to vector<1x1x1xf32>
    %701 = vector.extract %700[0, 0, 0] : f32 from vector<1x1x1xf32>
    %702 = arith.mulf %671, %608 : vector<2x1xf32>
    %703 = arith.mulf %674, %636 : vector<2x1xf32>
    %704 = arith.addf %702, %703 : vector<2x1xf32>
    %705 = arith.mulf %668, %664 : vector<2x1xf32>
    %706 = arith.addf %704, %705 : vector<2x1xf32>
    %707 = vector.shape_cast %706 : vector<2x1xf32> to vector<1x2x1xf32>
    %cst_320 = arith.constant dense<0.000000e+00> : vector<1xf32>
    %708 = vector.multi_reduction <add>, %707, %cst_320 [1, 2] : vector<1x2x1xf32> to vector<1xf32>
    %709 = vector.shape_cast %708 : vector<1xf32> to vector<1x1x1xf32>
    %710 = vector.extract %709[0, 0, 0] : f32 from vector<1x1x1xf32>
    %711 = arith.mulf %674, %608 : vector<2x1xf32>
    %712 = arith.mulf %668, %636 : vector<2x1xf32>
    %713 = arith.addf %711, %712 : vector<2x1xf32>
    %714 = arith.mulf %671, %664 : vector<2x1xf32>
    %715 = arith.addf %713, %714 : vector<2x1xf32>
    %716 = vector.shape_cast %715 : vector<2x1xf32> to vector<1x2x1xf32>
    %cst_321 = arith.constant dense<0.000000e+00> : vector<1xf32>
    %717 = vector.multi_reduction <add>, %716, %cst_321 [1, 2] : vector<1x2x1xf32> to vector<1xf32>
    %718 = vector.shape_cast %717 : vector<1xf32> to vector<1x1x1xf32>
    %719 = vector.extract %718[0, 0, 0] : f32 from vector<1x1x1xf32>
    %720 = arith.mulf %674, %608 : vector<2x1xf32>
    %721 = arith.mulf %671, %636 : vector<2x1xf32>
    %722 = arith.addf %720, %721 : vector<2x1xf32>
    %723 = arith.mulf %668, %664 : vector<2x1xf32>
    %724 = arith.addf %722, %723 : vector<2x1xf32>
    %725 = vector.shape_cast %724 : vector<2x1xf32> to vector<1x2x1xf32>
    %cst_322 = arith.constant dense<0.000000e+00> : vector<1xf32>
    %726 = vector.multi_reduction <add>, %725, %cst_322 [1, 2] : vector<1x2x1xf32> to vector<1xf32>
    %727 = vector.shape_cast %726 : vector<1xf32> to vector<1x1x1xf32>
    %728 = vector.extract %727[0, 0, 0] : f32 from vector<1x1x1xf32>
    %729 = arith.cmpf olt, %692, %683 : f32
    %730 = arith.select %729, %692, %683 : f32
    %c1_i32_323 = arith.constant 1 : i32
    %c0_i32_324 = arith.constant 0 : i32
    %731 = arith.select %729, %c1_i32_323, %c0_i32_324 : i32
    %732 = arith.cmpf olt, %701, %730 : f32
    %733 = arith.select %732, %701, %730 : f32
    %c2_i32_325 = arith.constant 2 : i32
    %734 = arith.select %732, %c2_i32_325, %731 : i32
    %735 = arith.cmpf olt, %710, %733 : f32
    %736 = arith.select %735, %710, %733 : f32
    %c3_i32_326 = arith.constant 3 : i32
    %737 = arith.select %735, %c3_i32_326, %734 : i32
    %738 = arith.cmpf olt, %719, %736 : f32
    %739 = arith.select %738, %719, %736 : f32
    %c4_i32_327 = arith.constant 4 : i32
    %740 = arith.select %738, %c4_i32_327, %737 : i32
    %741 = arith.cmpf olt, %728, %739 : f32
    %c5_i32_328 = arith.constant 5 : i32
    %742 = arith.select %741, %c5_i32_328, %740 : i32
    %c1_i32_329 = arith.constant 1 : i32
    %743 = arith.cmpi eq, %742, %c1_i32_329 : i32
    %c0_i32_330 = arith.constant 0 : i32
    %c0_i32_331 = arith.constant 0 : i32
    %744 = arith.select %743, %c0_i32_330, %c0_i32_331 : i32
    %c2_i32_332 = arith.constant 2 : i32
    %745 = arith.cmpi eq, %742, %c2_i32_332 : i32
    %c1_i32_333 = arith.constant 1 : i32
    %746 = arith.select %745, %c1_i32_333, %744 : i32
    %c3_i32_334 = arith.constant 3 : i32
    %747 = arith.cmpi eq, %742, %c3_i32_334 : i32
    %c1_i32_335 = arith.constant 1 : i32
    %748 = arith.select %747, %c1_i32_335, %746 : i32
    %c4_i32_336 = arith.constant 4 : i32
    %749 = arith.cmpi eq, %742, %c4_i32_336 : i32
    %c2_i32_337 = arith.constant 2 : i32
    %750 = arith.select %749, %c2_i32_337, %748 : i32
    %c5_i32_338 = arith.constant 5 : i32
    %751 = arith.cmpi eq, %742, %c5_i32_338 : i32
    %c2_i32_339 = arith.constant 2 : i32
    %752 = arith.select %751, %c2_i32_339, %750 : i32
    %753 = vector.extract_strided_slice %665 {offsets = [0, 0], sizes = [2, 128], strides = [1, 1]} : vector<2x384xf32> to vector<2x128xf32>
    %c1_i32_340 = arith.constant 1 : i32
    %754 = arith.cmpi eq, %752, %c1_i32_340 : i32
    %755 = vector.extract_strided_slice %665 {offsets = [0, 128], sizes = [2, 128], strides = [1, 1]} : vector<2x384xf32> to vector<2x128xf32>
    %756 = arith.select %754, %755, %753 : vector<2x128xf32>
    %c2_i32_341 = arith.constant 2 : i32
    %757 = arith.cmpi eq, %752, %c2_i32_341 : i32
    %758 = vector.extract_strided_slice %665 {offsets = [0, 256], sizes = [2, 128], strides = [1, 1]} : vector<2x384xf32> to vector<2x128xf32>
    %759 = arith.select %757, %758, %756 : vector<2x128xf32>
    %760 = vector.broadcast %13 : vector<1x128xf32> to vector<2x128xf32>
    %761 = arith.mulf %759, %760 : vector<2x128xf32>
    %c0_342 = arith.constant 0 : index
    %c0_343 = arith.constant 0 : index
    %c256 = arith.constant 256 : index
    %762 = vector.load %arg6[%c0_342, %c0_343, %c256] : memref<3x2x576xf32, #tpu.memory_space<vmem>>, vector<1x2x128xf32>
    %763 = vector.shape_cast %762 : vector<1x2x128xf32> to vector<2x128xf32>
    %764 = arith.addf %763, %761 : vector<2x128xf32>
    %c0_344 = arith.constant 0 : index
    %c0_345 = arith.constant 0 : index
    %c256_346 = arith.constant 256 : index
    %765 = vector.load %arg6[%c0_344, %c0_345, %c256_346] : memref<3x2x576xf32, #tpu.memory_space<vmem>>, vector<1x2x128xf32>
    %766 = vector.shape_cast %765 : vector<1x2x128xf32> to vector<2x128xf32>
    %767 = vector.shape_cast %764 : vector<2x128xf32> to vector<1x2x128xf32>
    tpu.vector_store %arg6[%c0_344, %c0_345, %c256_346], %767 {strides = array<i32>} : memref<3x2x576xf32, #tpu.memory_space<vmem>>, vector<1x2x128xf32>,
    %768 = vector.extract_strided_slice %761 {offsets = [0, 64], sizes = [2, 64], strides = [1, 1]} : vector<2x128xf32> to vector<2x64xf32>
    %cst_347 = arith.constant dense<0.000000e+00> : vector<2xf32>
    %769 = vector.multi_reduction <add>, %768, %cst_347 [1] : vector<2x64xf32> to vector<2xf32>
    %770 = vector.shape_cast %769 : vector<2xf32> to vector<2x1xf32>
    %c1_i32_348 = arith.constant 1 : i32
    %771 = arith.cmpi eq, %742, %c1_i32_348 : i32
    %c2_i32_349 = arith.constant 2 : i32
    %c1_i32_350 = arith.constant 1 : i32
    %772 = arith.select %771, %c2_i32_349, %c1_i32_350 : i32
    %c2_i32_351 = arith.constant 2 : i32
    %773 = arith.cmpi eq, %742, %c2_i32_351 : i32
    %c0_i32_352 = arith.constant 0 : i32
    %774 = arith.select %773, %c0_i32_352, %772 : i32
    %c3_i32_353 = arith.constant 3 : i32
    %775 = arith.cmpi eq, %742, %c3_i32_353 : i32
    %c2_i32_354 = arith.constant 2 : i32
    %776 = arith.select %775, %c2_i32_354, %774 : i32
    %c4_i32_355 = arith.constant 4 : i32
    %777 = arith.cmpi eq, %742, %c4_i32_355 : i32
    %c0_i32_356 = arith.constant 0 : i32
    %778 = arith.select %777, %c0_i32_356, %776 : i32
    %c5_i32_357 = arith.constant 5 : i32
    %779 = arith.cmpi eq, %742, %c5_i32_357 : i32
    %c1_i32_358 = arith.constant 1 : i32
    %780 = arith.select %779, %c1_i32_358, %778 : i32
    %781 = vector.extract_strided_slice %665 {offsets = [0, 0], sizes = [2, 128], strides = [1, 1]} : vector<2x384xf32> to vector<2x128xf32>
    %c1_i32_359 = arith.constant 1 : i32
    %782 = arith.cmpi eq, %780, %c1_i32_359 : i32
    %783 = vector.extract_strided_slice %665 {offsets = [0, 128], sizes = [2, 128], strides = [1, 1]} : vector<2x384xf32> to vector<2x128xf32>
    %784 = arith.select %782, %783, %781 : vector<2x128xf32>
    %c2_i32_360 = arith.constant 2 : i32
    %785 = arith.cmpi eq, %780, %c2_i32_360 : i32
    %786 = vector.extract_strided_slice %665 {offsets = [0, 256], sizes = [2, 128], strides = [1, 1]} : vector<2x384xf32> to vector<2x128xf32>
    %787 = arith.select %785, %786, %784 : vector<2x128xf32>
    %788 = vector.broadcast %13 : vector<1x128xf32> to vector<2x128xf32>
    %789 = arith.mulf %787, %788 : vector<2x128xf32>
    %c1_361 = arith.constant 1 : index
    %c0_362 = arith.constant 0 : index
    %c256_363 = arith.constant 256 : index
    %790 = vector.load %arg6[%c1_361, %c0_362, %c256_363] : memref<3x2x576xf32, #tpu.memory_space<vmem>>, vector<1x2x128xf32>
    %791 = vector.shape_cast %790 : vector<1x2x128xf32> to vector<2x128xf32>
    %792 = arith.addf %791, %789 : vector<2x128xf32>
    %c1_364 = arith.constant 1 : index
    %c0_365 = arith.constant 0 : index
    %c256_366 = arith.constant 256 : index
    %793 = vector.load %arg6[%c1_364, %c0_365, %c256_366] : memref<3x2x576xf32, #tpu.memory_space<vmem>>, vector<1x2x128xf32>
    %794 = vector.shape_cast %793 : vector<1x2x128xf32> to vector<2x128xf32>
    %795 = vector.shape_cast %792 : vector<2x128xf32> to vector<1x2x128xf32>
    tpu.vector_store %arg6[%c1_364, %c0_365, %c256_366], %795 {strides = array<i32>} : memref<3x2x576xf32, #tpu.memory_space<vmem>>, vector<1x2x128xf32>,
    %796 = vector.extract_strided_slice %789 {offsets = [0, 64], sizes = [2, 64], strides = [1, 1]} : vector<2x128xf32> to vector<2x64xf32>
    %cst_367 = arith.constant dense<0.000000e+00> : vector<2xf32>
    %797 = vector.multi_reduction <add>, %796, %cst_367 [1] : vector<2x64xf32> to vector<2xf32>
    %798 = vector.shape_cast %797 : vector<2xf32> to vector<2x1xf32>
    %c1_i32_368 = arith.constant 1 : i32
    %799 = arith.cmpi eq, %742, %c1_i32_368 : i32
    %c1_i32_369 = arith.constant 1 : i32
    %c2_i32_370 = arith.constant 2 : i32
    %800 = arith.select %799, %c1_i32_369, %c2_i32_370 : i32
    %c2_i32_371 = arith.constant 2 : i32
    %801 = arith.cmpi eq, %742, %c2_i32_371 : i32
    %c2_i32_372 = arith.constant 2 : i32
    %802 = arith.select %801, %c2_i32_372, %800 : i32
    %c3_i32_373 = arith.constant 3 : i32
    %803 = arith.cmpi eq, %742, %c3_i32_373 : i32
    %c0_i32_374 = arith.constant 0 : i32
    %804 = arith.select %803, %c0_i32_374, %802 : i32
    %c4_i32_375 = arith.constant 4 : i32
    %805 = arith.cmpi eq, %742, %c4_i32_375 : i32
    %c1_i32_376 = arith.constant 1 : i32
    %806 = arith.select %805, %c1_i32_376, %804 : i32
    %c5_i32_377 = arith.constant 5 : i32
    %807 = arith.cmpi eq, %742, %c5_i32_377 : i32
    %c0_i32_378 = arith.constant 0 : i32
    %808 = arith.select %807, %c0_i32_378, %806 : i32
    %809 = vector.extract_strided_slice %665 {offsets = [0, 0], sizes = [2, 128], strides = [1, 1]} : vector<2x384xf32> to vector<2x128xf32>
    %c1_i32_379 = arith.constant 1 : i32
    %810 = arith.cmpi eq, %808, %c1_i32_379 : i32
    %811 = vector.extract_strided_slice %665 {offsets = [0, 128], sizes = [2, 128], strides = [1, 1]} : vector<2x384xf32> to vector<2x128xf32>
    %812 = arith.select %810, %811, %809 : vector<2x128xf32>
    %c2_i32_380 = arith.constant 2 : i32
    %813 = arith.cmpi eq, %808, %c2_i32_380 : i32
    %814 = vector.extract_strided_slice %665 {offsets = [0, 256], sizes = [2, 128], strides = [1, 1]} : vector<2x384xf32> to vector<2x128xf32>
    %815 = arith.select %813, %814, %812 : vector<2x128xf32>
    %816 = vector.broadcast %13 : vector<1x128xf32> to vector<2x128xf32>
    %817 = arith.mulf %815, %816 : vector<2x128xf32>
    %c2_381 = arith.constant 2 : index
    %c0_382 = arith.constant 0 : index
    %c256_383 = arith.constant 256 : index
    %818 = vector.load %arg6[%c2_381, %c0_382, %c256_383] : memref<3x2x576xf32, #tpu.memory_space<vmem>>, vector<1x2x128xf32>
    %819 = vector.shape_cast %818 : vector<1x2x128xf32> to vector<2x128xf32>
    %820 = arith.addf %819, %817 : vector<2x128xf32>
    %c2_384 = arith.constant 2 : index
    %c0_385 = arith.constant 0 : index
    %c256_386 = arith.constant 256 : index
    %821 = vector.load %arg6[%c2_384, %c0_385, %c256_386] : memref<3x2x576xf32, #tpu.memory_space<vmem>>, vector<1x2x128xf32>
    %822 = vector.shape_cast %821 : vector<1x2x128xf32> to vector<2x128xf32>
    %823 = vector.shape_cast %820 : vector<2x128xf32> to vector<1x2x128xf32>
    tpu.vector_store %arg6[%c2_384, %c0_385, %c256_386], %823 {strides = array<i32>} : memref<3x2x576xf32, #tpu.memory_space<vmem>>, vector<1x2x128xf32>,
    %824 = vector.extract_strided_slice %817 {offsets = [0, 64], sizes = [2, 64], strides = [1, 1]} : vector<2x128xf32> to vector<2x64xf32>
    %cst_387 = arith.constant dense<0.000000e+00> : vector<2xf32>
    %825 = vector.multi_reduction <add>, %824, %cst_387 [1] : vector<2x64xf32> to vector<2xf32>
    %826 = vector.shape_cast %825 : vector<2xf32> to vector<2x1xf32>
    %827 = vector.extract_strided_slice %12 {offsets = [10, 0], sizes = [2, 384], strides = [1, 1]} : vector<16x384xf32> to vector<2x384xf32>
    %828 = vector.extract_strided_slice %827 {offsets = [0, 0], sizes = [2, 64], strides = [1, 1]} : vector<2x384xf32> to vector<2x64xf32>
    %cst_388 = arith.constant dense<0.000000e+00> : vector<2xf32>
    %829 = vector.multi_reduction <add>, %828, %cst_388 [1] : vector<2x64xf32> to vector<2xf32>
    %830 = vector.shape_cast %829 : vector<2xf32> to vector<2x1xf32>
    %831 = vector.extract_strided_slice %827 {offsets = [0, 128], sizes = [2, 64], strides = [1, 1]} : vector<2x384xf32> to vector<2x64xf32>
    %cst_389 = arith.constant dense<0.000000e+00> : vector<2xf32>
    %832 = vector.multi_reduction <add>, %831, %cst_389 [1] : vector<2x64xf32> to vector<2xf32>
    %833 = vector.shape_cast %832 : vector<2xf32> to vector<2x1xf32>
    %834 = vector.extract_strided_slice %827 {offsets = [0, 256], sizes = [2, 64], strides = [1, 1]} : vector<2x384xf32> to vector<2x64xf32>
    %cst_390 = arith.constant dense<0.000000e+00> : vector<2xf32>
    %835 = vector.multi_reduction <add>, %834, %cst_390 [1] : vector<2x64xf32> to vector<2xf32>
    %836 = vector.shape_cast %835 : vector<2xf32> to vector<2x1xf32>
    %837 = arith.mulf %830, %770 : vector<2x1xf32>
    %838 = arith.mulf %833, %798 : vector<2x1xf32>
    %839 = arith.addf %837, %838 : vector<2x1xf32>
    %840 = arith.mulf %836, %826 : vector<2x1xf32>
    %841 = arith.addf %839, %840 : vector<2x1xf32>
    %842 = vector.shape_cast %841 : vector<2x1xf32> to vector<1x2x1xf32>
    %cst_391 = arith.constant dense<0.000000e+00> : vector<1xf32>
    %843 = vector.multi_reduction <add>, %842, %cst_391 [1, 2] : vector<1x2x1xf32> to vector<1xf32>
    %844 = vector.shape_cast %843 : vector<1xf32> to vector<1x1x1xf32>
    %845 = vector.extract %844[0, 0, 0] : f32 from vector<1x1x1xf32>
    %846 = arith.mulf %830, %770 : vector<2x1xf32>
    %847 = arith.mulf %836, %798 : vector<2x1xf32>
    %848 = arith.addf %846, %847 : vector<2x1xf32>
    %849 = arith.mulf %833, %826 : vector<2x1xf32>
    %850 = arith.addf %848, %849 : vector<2x1xf32>
    %851 = vector.shape_cast %850 : vector<2x1xf32> to vector<1x2x1xf32>
    %cst_392 = arith.constant dense<0.000000e+00> : vector<1xf32>
    %852 = vector.multi_reduction <add>, %851, %cst_392 [1, 2] : vector<1x2x1xf32> to vector<1xf32>
    %853 = vector.shape_cast %852 : vector<1xf32> to vector<1x1x1xf32>
    %854 = vector.extract %853[0, 0, 0] : f32 from vector<1x1x1xf32>
    %855 = arith.mulf %833, %770 : vector<2x1xf32>
    %856 = arith.mulf %830, %798 : vector<2x1xf32>
    %857 = arith.addf %855, %856 : vector<2x1xf32>
    %858 = arith.mulf %836, %826 : vector<2x1xf32>
    %859 = arith.addf %857, %858 : vector<2x1xf32>
    %860 = vector.shape_cast %859 : vector<2x1xf32> to vector<1x2x1xf32>
    %cst_393 = arith.constant dense<0.000000e+00> : vector<1xf32>
    %861 = vector.multi_reduction <add>, %860, %cst_393 [1, 2] : vector<1x2x1xf32> to vector<1xf32>
    %862 = vector.shape_cast %861 : vector<1xf32> to vector<1x1x1xf32>
    %863 = vector.extract %862[0, 0, 0] : f32 from vector<1x1x1xf32>
    %864 = arith.mulf %833, %770 : vector<2x1xf32>
    %865 = arith.mulf %836, %798 : vector<2x1xf32>
    %866 = arith.addf %864, %865 : vector<2x1xf32>
    %867 = arith.mulf %830, %826 : vector<2x1xf32>
    %868 = arith.addf %866, %867 : vector<2x1xf32>
    %869 = vector.shape_cast %868 : vector<2x1xf32> to vector<1x2x1xf32>
    %cst_394 = arith.constant dense<0.000000e+00> : vector<1xf32>
    %870 = vector.multi_reduction <add>, %869, %cst_394 [1, 2] : vector<1x2x1xf32> to vector<1xf32>
    %871 = vector.shape_cast %870 : vector<1xf32> to vector<1x1x1xf32>
    %872 = vector.extract %871[0, 0, 0] : f32 from vector<1x1x1xf32>
    %873 = arith.mulf %836, %770 : vector<2x1xf32>
    %874 = arith.mulf %830, %798 : vector<2x1xf32>
    %875 = arith.addf %873, %874 : vector<2x1xf32>
    %876 = arith.mulf %833, %826 : vector<2x1xf32>
    %877 = arith.addf %875, %876 : vector<2x1xf32>
    %878 = vector.shape_cast %877 : vector<2x1xf32> to vector<1x2x1xf32>
    %cst_395 = arith.constant dense<0.000000e+00> : vector<1xf32>
    %879 = vector.multi_reduction <add>, %878, %cst_395 [1, 2] : vector<1x2x1xf32> to vector<1xf32>
    %880 = vector.shape_cast %879 : vector<1xf32> to vector<1x1x1xf32>
    %881 = vector.extract %880[0, 0, 0] : f32 from vector<1x1x1xf32>
    %882 = arith.mulf %836, %770 : vector<2x1xf32>
    %883 = arith.mulf %833, %798 : vector<2x1xf32>
    %884 = arith.addf %882, %883 : vector<2x1xf32>
    %885 = arith.mulf %830, %826 : vector<2x1xf32>
    %886 = arith.addf %884, %885 : vector<2x1xf32>
    %887 = vector.shape_cast %886 : vector<2x1xf32> to vector<1x2x1xf32>
    %cst_396 = arith.constant dense<0.000000e+00> : vector<1xf32>
    %888 = vector.multi_reduction <add>, %887, %cst_396 [1, 2] : vector<1x2x1xf32> to vector<1xf32>
    %889 = vector.shape_cast %888 : vector<1xf32> to vector<1x1x1xf32>
    %890 = vector.extract %889[0, 0, 0] : f32 from vector<1x1x1xf32>
    %891 = arith.cmpf olt, %854, %845 : f32
    %892 = arith.select %891, %854, %845 : f32
    %c1_i32_397 = arith.constant 1 : i32
    %c0_i32_398 = arith.constant 0 : i32
    %893 = arith.select %891, %c1_i32_397, %c0_i32_398 : i32
    %894 = arith.cmpf olt, %863, %892 : f32
    %895 = arith.select %894, %863, %892 : f32
    %c2_i32_399 = arith.constant 2 : i32
    %896 = arith.select %894, %c2_i32_399, %893 : i32
    %897 = arith.cmpf olt, %872, %895 : f32
    %898 = arith.select %897, %872, %895 : f32
    %c3_i32_400 = arith.constant 3 : i32
    %899 = arith.select %897, %c3_i32_400, %896 : i32
    %900 = arith.cmpf olt, %881, %898 : f32
    %901 = arith.select %900, %881, %898 : f32
    %c4_i32_401 = arith.constant 4 : i32
    %902 = arith.select %900, %c4_i32_401, %899 : i32
    %903 = arith.cmpf olt, %890, %901 : f32
    %c5_i32_402 = arith.constant 5 : i32
    %904 = arith.select %903, %c5_i32_402, %902 : i32
    %c1_i32_403 = arith.constant 1 : i32
    %905 = arith.cmpi eq, %904, %c1_i32_403 : i32
    %c0_i32_404 = arith.constant 0 : i32
    %c0_i32_405 = arith.constant 0 : i32
    %906 = arith.select %905, %c0_i32_404, %c0_i32_405 : i32
    %c2_i32_406 = arith.constant 2 : i32
    %907 = arith.cmpi eq, %904, %c2_i32_406 : i32
    %c1_i32_407 = arith.constant 1 : i32
    %908 = arith.select %907, %c1_i32_407, %906 : i32
    %c3_i32_408 = arith.constant 3 : i32
    %909 = arith.cmpi eq, %904, %c3_i32_408 : i32
    %c1_i32_409 = arith.constant 1 : i32
    %910 = arith.select %909, %c1_i32_409, %908 : i32
    %c4_i32_410 = arith.constant 4 : i32
    %911 = arith.cmpi eq, %904, %c4_i32_410 : i32
    %c2_i32_411 = arith.constant 2 : i32
    %912 = arith.select %911, %c2_i32_411, %910 : i32
    %c5_i32_412 = arith.constant 5 : i32
    %913 = arith.cmpi eq, %904, %c5_i32_412 : i32
    %c2_i32_413 = arith.constant 2 : i32
    %914 = arith.select %913, %c2_i32_413, %912 : i32
    %915 = vector.extract_strided_slice %827 {offsets = [0, 0], sizes = [2, 128], strides = [1, 1]} : vector<2x384xf32> to vector<2x128xf32>
    %c1_i32_414 = arith.constant 1 : i32
    %916 = arith.cmpi eq, %914, %c1_i32_414 : i32
    %917 = vector.extract_strided_slice %827 {offsets = [0, 128], sizes = [2, 128], strides = [1, 1]} : vector<2x384xf32> to vector<2x128xf32>
    %918 = arith.select %916, %917, %915 : vector<2x128xf32>
    %c2_i32_415 = arith.constant 2 : i32
    %919 = arith.cmpi eq, %914, %c2_i32_415 : i32
    %920 = vector.extract_strided_slice %827 {offsets = [0, 256], sizes = [2, 128], strides = [1, 1]} : vector<2x384xf32> to vector<2x128xf32>
    %921 = arith.select %919, %920, %918 : vector<2x128xf32>
    %922 = vector.broadcast %13 : vector<1x128xf32> to vector<2x128xf32>
    %923 = arith.mulf %921, %922 : vector<2x128xf32>
    %c0_416 = arith.constant 0 : index
    %c0_417 = arith.constant 0 : index
    %c320 = arith.constant 320 : index
    %924 = vector.load %arg6[%c0_416, %c0_417, %c320] : memref<3x2x576xf32, #tpu.memory_space<vmem>>, vector<1x2x128xf32>
    %925 = vector.shape_cast %924 : vector<1x2x128xf32> to vector<2x128xf32>
    %926 = arith.addf %925, %923 : vector<2x128xf32>
    %c0_418 = arith.constant 0 : index
    %c0_419 = arith.constant 0 : index
    %c320_420 = arith.constant 320 : index
    %927 = vector.load %arg6[%c0_418, %c0_419, %c320_420] : memref<3x2x576xf32, #tpu.memory_space<vmem>>, vector<1x2x128xf32>
    %928 = vector.shape_cast %927 : vector<1x2x128xf32> to vector<2x128xf32>
    %929 = vector.shape_cast %926 : vector<2x128xf32> to vector<1x2x128xf32>
    tpu.vector_store %arg6[%c0_418, %c0_419, %c320_420], %929 {strides = array<i32>} : memref<3x2x576xf32, #tpu.memory_space<vmem>>, vector<1x2x128xf32>,
    %930 = vector.extract_strided_slice %923 {offsets = [0, 64], sizes = [2, 64], strides = [1, 1]} : vector<2x128xf32> to vector<2x64xf32>
    %cst_421 = arith.constant dense<0.000000e+00> : vector<2xf32>
    %931 = vector.multi_reduction <add>, %930, %cst_421 [1] : vector<2x64xf32> to vector<2xf32>
    %932 = vector.shape_cast %931 : vector<2xf32> to vector<2x1xf32>
    %c1_i32_422 = arith.constant 1 : i32
    %933 = arith.cmpi eq, %904, %c1_i32_422 : i32
    %c2_i32_423 = arith.constant 2 : i32
    %c1_i32_424 = arith.constant 1 : i32
    %934 = arith.select %933, %c2_i32_423, %c1_i32_424 : i32
    %c2_i32_425 = arith.constant 2 : i32
    %935 = arith.cmpi eq, %904, %c2_i32_425 : i32
    %c0_i32_426 = arith.constant 0 : i32
    %936 = arith.select %935, %c0_i32_426, %934 : i32
    %c3_i32_427 = arith.constant 3 : i32
    %937 = arith.cmpi eq, %904, %c3_i32_427 : i32
    %c2_i32_428 = arith.constant 2 : i32
    %938 = arith.select %937, %c2_i32_428, %936 : i32
    %c4_i32_429 = arith.constant 4 : i32
    %939 = arith.cmpi eq, %904, %c4_i32_429 : i32
    %c0_i32_430 = arith.constant 0 : i32
    %940 = arith.select %939, %c0_i32_430, %938 : i32
    %c5_i32_431 = arith.constant 5 : i32
    %941 = arith.cmpi eq, %904, %c5_i32_431 : i32
    %c1_i32_432 = arith.constant 1 : i32
    %942 = arith.select %941, %c1_i32_432, %940 : i32
    %943 = vector.extract_strided_slice %827 {offsets = [0, 0], sizes = [2, 128], strides = [1, 1]} : vector<2x384xf32> to vector<2x128xf32>
    %c1_i32_433 = arith.constant 1 : i32
    %944 = arith.cmpi eq, %942, %c1_i32_433 : i32
    %945 = vector.extract_strided_slice %827 {offsets = [0, 128], sizes = [2, 128], strides = [1, 1]} : vector<2x384xf32> to vector<2x128xf32>
    %946 = arith.select %944, %945, %943 : vector<2x128xf32>
    %c2_i32_434 = arith.constant 2 : i32
    %947 = arith.cmpi eq, %942, %c2_i32_434 : i32
    %948 = vector.extract_strided_slice %827 {offsets = [0, 256], sizes = [2, 128], strides = [1, 1]} : vector<2x384xf32> to vector<2x128xf32>
    %949 = arith.select %947, %948, %946 : vector<2x128xf32>
    %950 = vector.broadcast %13 : vector<1x128xf32> to vector<2x128xf32>
    %951 = arith.mulf %949, %950 : vector<2x128xf32>
    %c1_435 = arith.constant 1 : index
    %c0_436 = arith.constant 0 : index
    %c320_437 = arith.constant 320 : index
    %952 = vector.load %arg6[%c1_435, %c0_436, %c320_437] : memref<3x2x576xf32, #tpu.memory_space<vmem>>, vector<1x2x128xf32>
    %953 = vector.shape_cast %952 : vector<1x2x128xf32> to vector<2x128xf32>
    %954 = arith.addf %953, %951 : vector<2x128xf32>
    %c1_438 = arith.constant 1 : index
    %c0_439 = arith.constant 0 : index
    %c320_440 = arith.constant 320 : index
    %955 = vector.load %arg6[%c1_438, %c0_439, %c320_440] : memref<3x2x576xf32, #tpu.memory_space<vmem>>, vector<1x2x128xf32>
    %956 = vector.shape_cast %955 : vector<1x2x128xf32> to vector<2x128xf32>
    %957 = vector.shape_cast %954 : vector<2x128xf32> to vector<1x2x128xf32>
    tpu.vector_store %arg6[%c1_438, %c0_439, %c320_440], %957 {strides = array<i32>} : memref<3x2x576xf32, #tpu.memory_space<vmem>>, vector<1x2x128xf32>,
    %958 = vector.extract_strided_slice %951 {offsets = [0, 64], sizes = [2, 64], strides = [1, 1]} : vector<2x128xf32> to vector<2x64xf32>
    %cst_441 = arith.constant dense<0.000000e+00> : vector<2xf32>
    %959 = vector.multi_reduction <add>, %958, %cst_441 [1] : vector<2x64xf32> to vector<2xf32>
    %960 = vector.shape_cast %959 : vector<2xf32> to vector<2x1xf32>
    %c1_i32_442 = arith.constant 1 : i32
    %961 = arith.cmpi eq, %904, %c1_i32_442 : i32
    %c1_i32_443 = arith.constant 1 : i32
    %c2_i32_444 = arith.constant 2 : i32
    %962 = arith.select %961, %c1_i32_443, %c2_i32_444 : i32
    %c2_i32_445 = arith.constant 2 : i32
    %963 = arith.cmpi eq, %904, %c2_i32_445 : i32
    %c2_i32_446 = arith.constant 2 : i32
    %964 = arith.select %963, %c2_i32_446, %962 : i32
    %c3_i32_447 = arith.constant 3 : i32
    %965 = arith.cmpi eq, %904, %c3_i32_447 : i32
    %c0_i32_448 = arith.constant 0 : i32
    %966 = arith.select %965, %c0_i32_448, %964 : i32
    %c4_i32_449 = arith.constant 4 : i32
    %967 = arith.cmpi eq, %904, %c4_i32_449 : i32
    %c1_i32_450 = arith.constant 1 : i32
    %968 = arith.select %967, %c1_i32_450, %966 : i32
    %c5_i32_451 = arith.constant 5 : i32
    %969 = arith.cmpi eq, %904, %c5_i32_451 : i32
    %c0_i32_452 = arith.constant 0 : i32
    %970 = arith.select %969, %c0_i32_452, %968 : i32
    %971 = vector.extract_strided_slice %827 {offsets = [0, 0], sizes = [2, 128], strides = [1, 1]} : vector<2x384xf32> to vector<2x128xf32>
    %c1_i32_453 = arith.constant 1 : i32
    %972 = arith.cmpi eq, %970, %c1_i32_453 : i32
    %973 = vector.extract_strided_slice %827 {offsets = [0, 128], sizes = [2, 128], strides = [1, 1]} : vector<2x384xf32> to vector<2x128xf32>
    %974 = arith.select %972, %973, %971 : vector<2x128xf32>
    %c2_i32_454 = arith.constant 2 : i32
    %975 = arith.cmpi eq, %970, %c2_i32_454 : i32
    %976 = vector.extract_strided_slice %827 {offsets = [0, 256], sizes = [2, 128], strides = [1, 1]} : vector<2x384xf32> to vector<2x128xf32>
    %977 = arith.select %975, %976, %974 : vector<2x128xf32>
    %978 = vector.broadcast %13 : vector<1x128xf32> to vector<2x128xf32>
    %979 = arith.mulf %977, %978 : vector<2x128xf32>
    %c2_455 = arith.constant 2 : index
    %c0_456 = arith.constant 0 : index
    %c320_457 = arith.constant 320 : index
    %980 = vector.load %arg6[%c2_455, %c0_456, %c320_457] : memref<3x2x576xf32, #tpu.memory_space<vmem>>, vector<1x2x128xf32>
    %981 = vector.shape_cast %980 : vector<1x2x128xf32> to vector<2x128xf32>
    %982 = arith.addf %981, %979 : vector<2x128xf32>
    %c2_458 = arith.constant 2 : index
    %c0_459 = arith.constant 0 : index
    %c320_460 = arith.constant 320 : index
    %983 = vector.load %arg6[%c2_458, %c0_459, %c320_460] : memref<3x2x576xf32, #tpu.memory_space<vmem>>, vector<1x2x128xf32>
    %984 = vector.shape_cast %983 : vector<1x2x128xf32> to vector<2x128xf32>
    %985 = vector.shape_cast %982 : vector<2x128xf32> to vector<1x2x128xf32>
    tpu.vector_store %arg6[%c2_458, %c0_459, %c320_460], %985 {strides = array<i32>} : memref<3x2x576xf32, #tpu.memory_space<vmem>>, vector<1x2x128xf32>,
    %986 = vector.extract_strided_slice %979 {offsets = [0, 64], sizes = [2, 64], strides = [1, 1]} : vector<2x128xf32> to vector<2x64xf32>
    %cst_461 = arith.constant dense<0.000000e+00> : vector<2xf32>
    %987 = vector.multi_reduction <add>, %986, %cst_461 [1] : vector<2x64xf32> to vector<2xf32>
    %988 = vector.shape_cast %987 : vector<2xf32> to vector<2x1xf32>
    %989 = vector.extract_strided_slice %12 {offsets = [12, 0], sizes = [2, 384], strides = [1, 1]} : vector<16x384xf32> to vector<2x384xf32>
    %990 = vector.extract_strided_slice %989 {offsets = [0, 0], sizes = [2, 64], strides = [1, 1]} : vector<2x384xf32> to vector<2x64xf32>
    %cst_462 = arith.constant dense<0.000000e+00> : vector<2xf32>
    %991 = vector.multi_reduction <add>, %990, %cst_462 [1] : vector<2x64xf32> to vector<2xf32>
    %992 = vector.shape_cast %991 : vector<2xf32> to vector<2x1xf32>
    %993 = vector.extract_strided_slice %989 {offsets = [0, 128], sizes = [2, 64], strides = [1, 1]} : vector<2x384xf32> to vector<2x64xf32>
    %cst_463 = arith.constant dense<0.000000e+00> : vector<2xf32>
    %994 = vector.multi_reduction <add>, %993, %cst_463 [1] : vector<2x64xf32> to vector<2xf32>
    %995 = vector.shape_cast %994 : vector<2xf32> to vector<2x1xf32>
    %996 = vector.extract_strided_slice %989 {offsets = [0, 256], sizes = [2, 64], strides = [1, 1]} : vector<2x384xf32> to vector<2x64xf32>
    %cst_464 = arith.constant dense<0.000000e+00> : vector<2xf32>
    %997 = vector.multi_reduction <add>, %996, %cst_464 [1] : vector<2x64xf32> to vector<2xf32>
    %998 = vector.shape_cast %997 : vector<2xf32> to vector<2x1xf32>
    %999 = arith.mulf %992, %932 : vector<2x1xf32>
    %1000 = arith.mulf %995, %960 : vector<2x1xf32>
    %1001 = arith.addf %999, %1000 : vector<2x1xf32>
    %1002 = arith.mulf %998, %988 : vector<2x1xf32>
    %1003 = arith.addf %1001, %1002 : vector<2x1xf32>
    %1004 = vector.shape_cast %1003 : vector<2x1xf32> to vector<1x2x1xf32>
    %cst_465 = arith.constant dense<0.000000e+00> : vector<1xf32>
    %1005 = vector.multi_reduction <add>, %1004, %cst_465 [1, 2] : vector<1x2x1xf32> to vector<1xf32>
    %1006 = vector.shape_cast %1005 : vector<1xf32> to vector<1x1x1xf32>
    %1007 = vector.extract %1006[0, 0, 0] : f32 from vector<1x1x1xf32>
    %1008 = arith.mulf %992, %932 : vector<2x1xf32>
    %1009 = arith.mulf %998, %960 : vector<2x1xf32>
    %1010 = arith.addf %1008, %1009 : vector<2x1xf32>
    %1011 = arith.mulf %995, %988 : vector<2x1xf32>
    %1012 = arith.addf %1010, %1011 : vector<2x1xf32>
    %1013 = vector.shape_cast %1012 : vector<2x1xf32> to vector<1x2x1xf32>
    %cst_466 = arith.constant dense<0.000000e+00> : vector<1xf32>
    %1014 = vector.multi_reduction <add>, %1013, %cst_466 [1, 2] : vector<1x2x1xf32> to vector<1xf32>
    %1015 = vector.shape_cast %1014 : vector<1xf32> to vector<1x1x1xf32>
    %1016 = vector.extract %1015[0, 0, 0] : f32 from vector<1x1x1xf32>
    %1017 = arith.mulf %995, %932 : vector<2x1xf32>
    %1018 = arith.mulf %992, %960 : vector<2x1xf32>
    %1019 = arith.addf %1017, %1018 : vector<2x1xf32>
    %1020 = arith.mulf %998, %988 : vector<2x1xf32>
    %1021 = arith.addf %1019, %1020 : vector<2x1xf32>
    %1022 = vector.shape_cast %1021 : vector<2x1xf32> to vector<1x2x1xf32>
    %cst_467 = arith.constant dense<0.000000e+00> : vector<1xf32>
    %1023 = vector.multi_reduction <add>, %1022, %cst_467 [1, 2] : vector<1x2x1xf32> to vector<1xf32>
    %1024 = vector.shape_cast %1023 : vector<1xf32> to vector<1x1x1xf32>
    %1025 = vector.extract %1024[0, 0, 0] : f32 from vector<1x1x1xf32>
    %1026 = arith.mulf %995, %932 : vector<2x1xf32>
    %1027 = arith.mulf %998, %960 : vector<2x1xf32>
    %1028 = arith.addf %1026, %1027 : vector<2x1xf32>
    %1029 = arith.mulf %992, %988 : vector<2x1xf32>
    %1030 = arith.addf %1028, %1029 : vector<2x1xf32>
    %1031 = vector.shape_cast %1030 : vector<2x1xf32> to vector<1x2x1xf32>
    %cst_468 = arith.constant dense<0.000000e+00> : vector<1xf32>
    %1032 = vector.multi_reduction <add>, %1031, %cst_468 [1, 2] : vector<1x2x1xf32> to vector<1xf32>
    %1033 = vector.shape_cast %1032 : vector<1xf32> to vector<1x1x1xf32>
    %1034 = vector.extract %1033[0, 0, 0] : f32 from vector<1x1x1xf32>
    %1035 = arith.mulf %998, %932 : vector<2x1xf32>
    %1036 = arith.mulf %992, %960 : vector<2x1xf32>
    %1037 = arith.addf %1035, %1036 : vector<2x1xf32>
    %1038 = arith.mulf %995, %988 : vector<2x1xf32>
    %1039 = arith.addf %1037, %1038 : vector<2x1xf32>
    %1040 = vector.shape_cast %1039 : vector<2x1xf32> to vector<1x2x1xf32>
    %cst_469 = arith.constant dense<0.000000e+00> : vector<1xf32>
    %1041 = vector.multi_reduction <add>, %1040, %cst_469 [1, 2] : vector<1x2x1xf32> to vector<1xf32>
    %1042 = vector.shape_cast %1041 : vector<1xf32> to vector<1x1x1xf32>
    %1043 = vector.extract %1042[0, 0, 0] : f32 from vector<1x1x1xf32>
    %1044 = arith.mulf %998, %932 : vector<2x1xf32>
    %1045 = arith.mulf %995, %960 : vector<2x1xf32>
    %1046 = arith.addf %1044, %1045 : vector<2x1xf32>
    %1047 = arith.mulf %992, %988 : vector<2x1xf32>
    %1048 = arith.addf %1046, %1047 : vector<2x1xf32>
    %1049 = vector.shape_cast %1048 : vector<2x1xf32> to vector<1x2x1xf32>
    %cst_470 = arith.constant dense<0.000000e+00> : vector<1xf32>
    %1050 = vector.multi_reduction <add>, %1049, %cst_470 [1, 2] : vector<1x2x1xf32> to vector<1xf32>
    %1051 = vector.shape_cast %1050 : vector<1xf32> to vector<1x1x1xf32>
    %1052 = vector.extract %1051[0, 0, 0] : f32 from vector<1x1x1xf32>
    %1053 = arith.cmpf olt, %1016, %1007 : f32
    %1054 = arith.select %1053, %1016, %1007 : f32
    %c1_i32_471 = arith.constant 1 : i32
    %c0_i32_472 = arith.constant 0 : i32
    %1055 = arith.select %1053, %c1_i32_471, %c0_i32_472 : i32
    %1056 = arith.cmpf olt, %1025, %1054 : f32
    %1057 = arith.select %1056, %1025, %1054 : f32
    %c2_i32_473 = arith.constant 2 : i32
    %1058 = arith.select %1056, %c2_i32_473, %1055 : i32
    %1059 = arith.cmpf olt, %1034, %1057 : f32
    %1060 = arith.select %1059, %1034, %1057 : f32
    %c3_i32_474 = arith.constant 3 : i32
    %1061 = arith.select %1059, %c3_i32_474, %1058 : i32
    %1062 = arith.cmpf olt, %1043, %1060 : f32
    %1063 = arith.select %1062, %1043, %1060 : f32
    %c4_i32_475 = arith.constant 4 : i32
    %1064 = arith.select %1062, %c4_i32_475, %1061 : i32
    %1065 = arith.cmpf olt, %1052, %1063 : f32
    %c5_i32_476 = arith.constant 5 : i32
    %1066 = arith.select %1065, %c5_i32_476, %1064 : i32
    %c1_i32_477 = arith.constant 1 : i32
    %1067 = arith.cmpi eq, %1066, %c1_i32_477 : i32
    %c0_i32_478 = arith.constant 0 : i32
    %c0_i32_479 = arith.constant 0 : i32
    %1068 = arith.select %1067, %c0_i32_478, %c0_i32_479 : i32
    %c2_i32_480 = arith.constant 2 : i32
    %1069 = arith.cmpi eq, %1066, %c2_i32_480 : i32
    %c1_i32_481 = arith.constant 1 : i32
    %1070 = arith.select %1069, %c1_i32_481, %1068 : i32
    %c3_i32_482 = arith.constant 3 : i32
    %1071 = arith.cmpi eq, %1066, %c3_i32_482 : i32
    %c1_i32_483 = arith.constant 1 : i32
    %1072 = arith.select %1071, %c1_i32_483, %1070 : i32
    %c4_i32_484 = arith.constant 4 : i32
    %1073 = arith.cmpi eq, %1066, %c4_i32_484 : i32
    %c2_i32_485 = arith.constant 2 : i32
    %1074 = arith.select %1073, %c2_i32_485, %1072 : i32
    %c5_i32_486 = arith.constant 5 : i32
    %1075 = arith.cmpi eq, %1066, %c5_i32_486 : i32
    %c2_i32_487 = arith.constant 2 : i32
    %1076 = arith.select %1075, %c2_i32_487, %1074 : i32
    %1077 = vector.extract_strided_slice %989 {offsets = [0, 0], sizes = [2, 128], strides = [1, 1]} : vector<2x384xf32> to vector<2x128xf32>
    %c1_i32_488 = arith.constant 1 : i32
    %1078 = arith.cmpi eq, %1076, %c1_i32_488 : i32
    %1079 = vector.extract_strided_slice %989 {offsets = [0, 128], sizes = [2, 128], strides = [1, 1]} : vector<2x384xf32> to vector<2x128xf32>
    %1080 = arith.select %1078, %1079, %1077 : vector<2x128xf32>
    %c2_i32_489 = arith.constant 2 : i32
    %1081 = arith.cmpi eq, %1076, %c2_i32_489 : i32
    %1082 = vector.extract_strided_slice %989 {offsets = [0, 256], sizes = [2, 128], strides = [1, 1]} : vector<2x384xf32> to vector<2x128xf32>
    %1083 = arith.select %1081, %1082, %1080 : vector<2x128xf32>
    %1084 = vector.broadcast %13 : vector<1x128xf32> to vector<2x128xf32>
    %1085 = arith.mulf %1083, %1084 : vector<2x128xf32>
    %c0_490 = arith.constant 0 : index
    %c0_491 = arith.constant 0 : index
    %c384 = arith.constant 384 : index
    %1086 = vector.load %arg6[%c0_490, %c0_491, %c384] : memref<3x2x576xf32, #tpu.memory_space<vmem>>, vector<1x2x128xf32>
    %1087 = vector.shape_cast %1086 : vector<1x2x128xf32> to vector<2x128xf32>
    %1088 = arith.addf %1087, %1085 : vector<2x128xf32>
    %c0_492 = arith.constant 0 : index
    %c0_493 = arith.constant 0 : index
    %c384_494 = arith.constant 384 : index
    %1089 = vector.load %arg6[%c0_492, %c0_493, %c384_494] : memref<3x2x576xf32, #tpu.memory_space<vmem>>, vector<1x2x128xf32>
    %1090 = vector.shape_cast %1089 : vector<1x2x128xf32> to vector<2x128xf32>
    %1091 = vector.shape_cast %1088 : vector<2x128xf32> to vector<1x2x128xf32>
    tpu.vector_store %arg6[%c0_492, %c0_493, %c384_494], %1091 {strides = array<i32>} : memref<3x2x576xf32, #tpu.memory_space<vmem>>, vector<1x2x128xf32>,
    %1092 = vector.extract_strided_slice %1085 {offsets = [0, 64], sizes = [2, 64], strides = [1, 1]} : vector<2x128xf32> to vector<2x64xf32>
    %cst_495 = arith.constant dense<0.000000e+00> : vector<2xf32>
    %1093 = vector.multi_reduction <add>, %1092, %cst_495 [1] : vector<2x64xf32> to vector<2xf32>
    %1094 = vector.shape_cast %1093 : vector<2xf32> to vector<2x1xf32>
    %c1_i32_496 = arith.constant 1 : i32
    %1095 = arith.cmpi eq, %1066, %c1_i32_496 : i32
    %c2_i32_497 = arith.constant 2 : i32
    %c1_i32_498 = arith.constant 1 : i32
    %1096 = arith.select %1095, %c2_i32_497, %c1_i32_498 : i32
    %c2_i32_499 = arith.constant 2 : i32
    %1097 = arith.cmpi eq, %1066, %c2_i32_499 : i32
    %c0_i32_500 = arith.constant 0 : i32
    %1098 = arith.select %1097, %c0_i32_500, %1096 : i32
    %c3_i32_501 = arith.constant 3 : i32
    %1099 = arith.cmpi eq, %1066, %c3_i32_501 : i32
    %c2_i32_502 = arith.constant 2 : i32
    %1100 = arith.select %1099, %c2_i32_502, %1098 : i32
    %c4_i32_503 = arith.constant 4 : i32
    %1101 = arith.cmpi eq, %1066, %c4_i32_503 : i32
    %c0_i32_504 = arith.constant 0 : i32
    %1102 = arith.select %1101, %c0_i32_504, %1100 : i32
    %c5_i32_505 = arith.constant 5 : i32
    %1103 = arith.cmpi eq, %1066, %c5_i32_505 : i32
    %c1_i32_506 = arith.constant 1 : i32
    %1104 = arith.select %1103, %c1_i32_506, %1102 : i32
    %1105 = vector.extract_strided_slice %989 {offsets = [0, 0], sizes = [2, 128], strides = [1, 1]} : vector<2x384xf32> to vector<2x128xf32>
    %c1_i32_507 = arith.constant 1 : i32
    %1106 = arith.cmpi eq, %1104, %c1_i32_507 : i32
    %1107 = vector.extract_strided_slice %989 {offsets = [0, 128], sizes = [2, 128], strides = [1, 1]} : vector<2x384xf32> to vector<2x128xf32>
    %1108 = arith.select %1106, %1107, %1105 : vector<2x128xf32>
    %c2_i32_508 = arith.constant 2 : i32
    %1109 = arith.cmpi eq, %1104, %c2_i32_508 : i32
    %1110 = vector.extract_strided_slice %989 {offsets = [0, 256], sizes = [2, 128], strides = [1, 1]} : vector<2x384xf32> to vector<2x128xf32>
    %1111 = arith.select %1109, %1110, %1108 : vector<2x128xf32>
    %1112 = vector.broadcast %13 : vector<1x128xf32> to vector<2x128xf32>
    %1113 = arith.mulf %1111, %1112 : vector<2x128xf32>
    %c1_509 = arith.constant 1 : index
    %c0_510 = arith.constant 0 : index
    %c384_511 = arith.constant 384 : index
    %1114 = vector.load %arg6[%c1_509, %c0_510, %c384_511] : memref<3x2x576xf32, #tpu.memory_space<vmem>>, vector<1x2x128xf32>
    %1115 = vector.shape_cast %1114 : vector<1x2x128xf32> to vector<2x128xf32>
    %1116 = arith.addf %1115, %1113 : vector<2x128xf32>
    %c1_512 = arith.constant 1 : index
    %c0_513 = arith.constant 0 : index
    %c384_514 = arith.constant 384 : index
    %1117 = vector.load %arg6[%c1_512, %c0_513, %c384_514] : memref<3x2x576xf32, #tpu.memory_space<vmem>>, vector<1x2x128xf32>
    %1118 = vector.shape_cast %1117 : vector<1x2x128xf32> to vector<2x128xf32>
    %1119 = vector.shape_cast %1116 : vector<2x128xf32> to vector<1x2x128xf32>
    tpu.vector_store %arg6[%c1_512, %c0_513, %c384_514], %1119 {strides = array<i32>} : memref<3x2x576xf32, #tpu.memory_space<vmem>>, vector<1x2x128xf32>,
    %1120 = vector.extract_strided_slice %1113 {offsets = [0, 64], sizes = [2, 64], strides = [1, 1]} : vector<2x128xf32> to vector<2x64xf32>
    %cst_515 = arith.constant dense<0.000000e+00> : vector<2xf32>
    %1121 = vector.multi_reduction <add>, %1120, %cst_515 [1] : vector<2x64xf32> to vector<2xf32>
    %1122 = vector.shape_cast %1121 : vector<2xf32> to vector<2x1xf32>
    %c1_i32_516 = arith.constant 1 : i32
    %1123 = arith.cmpi eq, %1066, %c1_i32_516 : i32
    %c1_i32_517 = arith.constant 1 : i32
    %c2_i32_518 = arith.constant 2 : i32
    %1124 = arith.select %1123, %c1_i32_517, %c2_i32_518 : i32
    %c2_i32_519 = arith.constant 2 : i32
    %1125 = arith.cmpi eq, %1066, %c2_i32_519 : i32
    %c2_i32_520 = arith.constant 2 : i32
    %1126 = arith.select %1125, %c2_i32_520, %1124 : i32
    %c3_i32_521 = arith.constant 3 : i32
    %1127 = arith.cmpi eq, %1066, %c3_i32_521 : i32
    %c0_i32_522 = arith.constant 0 : i32
    %1128 = arith.select %1127, %c0_i32_522, %1126 : i32
    %c4_i32_523 = arith.constant 4 : i32
    %1129 = arith.cmpi eq, %1066, %c4_i32_523 : i32
    %c1_i32_524 = arith.constant 1 : i32
    %1130 = arith.select %1129, %c1_i32_524, %1128 : i32
    %c5_i32_525 = arith.constant 5 : i32
    %1131 = arith.cmpi eq, %1066, %c5_i32_525 : i32
    %c0_i32_526 = arith.constant 0 : i32
    %1132 = arith.select %1131, %c0_i32_526, %1130 : i32
    %1133 = vector.extract_strided_slice %989 {offsets = [0, 0], sizes = [2, 128], strides = [1, 1]} : vector<2x384xf32> to vector<2x128xf32>
    %c1_i32_527 = arith.constant 1 : i32
    %1134 = arith.cmpi eq, %1132, %c1_i32_527 : i32
    %1135 = vector.extract_strided_slice %989 {offsets = [0, 128], sizes = [2, 128], strides = [1, 1]} : vector<2x384xf32> to vector<2x128xf32>
    %1136 = arith.select %1134, %1135, %1133 : vector<2x128xf32>
    %c2_i32_528 = arith.constant 2 : i32
    %1137 = arith.cmpi eq, %1132, %c2_i32_528 : i32
    %1138 = vector.extract_strided_slice %989 {offsets = [0, 256], sizes = [2, 128], strides = [1, 1]} : vector<2x384xf32> to vector<2x128xf32>
    %1139 = arith.select %1137, %1138, %1136 : vector<2x128xf32>
    %1140 = vector.broadcast %13 : vector<1x128xf32> to vector<2x128xf32>
    %1141 = arith.mulf %1139, %1140 : vector<2x128xf32>
    %c2_529 = arith.constant 2 : index
    %c0_530 = arith.constant 0 : index
    %c384_531 = arith.constant 384 : index
    %1142 = vector.load %arg6[%c2_529, %c0_530, %c384_531] : memref<3x2x576xf32, #tpu.memory_space<vmem>>, vector<1x2x128xf32>
    %1143 = vector.shape_cast %1142 : vector<1x2x128xf32> to vector<2x128xf32>
    %1144 = arith.addf %1143, %1141 : vector<2x128xf32>
    %c2_532 = arith.constant 2 : index
    %c0_533 = arith.constant 0 : index
    %c384_534 = arith.constant 384 : index
    %1145 = vector.load %arg6[%c2_532, %c0_533, %c384_534] : memref<3x2x576xf32, #tpu.memory_space<vmem>>, vector<1x2x128xf32>
    %1146 = vector.shape_cast %1145 : vector<1x2x128xf32> to vector<2x128xf32>
    %1147 = vector.shape_cast %1144 : vector<2x128xf32> to vector<1x2x128xf32>
    tpu.vector_store %arg6[%c2_532, %c0_533, %c384_534], %1147 {strides = array<i32>} : memref<3x2x576xf32, #tpu.memory_space<vmem>>, vector<1x2x128xf32>,
    %1148 = vector.extract_strided_slice %1141 {offsets = [0, 64], sizes = [2, 64], strides = [1, 1]} : vector<2x128xf32> to vector<2x64xf32>
    %cst_535 = arith.constant dense<0.000000e+00> : vector<2xf32>
    %1149 = vector.multi_reduction <add>, %1148, %cst_535 [1] : vector<2x64xf32> to vector<2xf32>
    %1150 = vector.shape_cast %1149 : vector<2xf32> to vector<2x1xf32>
    %1151 = vector.extract_strided_slice %12 {offsets = [14, 0], sizes = [2, 384], strides = [1, 1]} : vector<16x384xf32> to vector<2x384xf32>
    %1152 = vector.extract_strided_slice %1151 {offsets = [0, 0], sizes = [2, 64], strides = [1, 1]} : vector<2x384xf32> to vector<2x64xf32>
    %cst_536 = arith.constant dense<0.000000e+00> : vector<2xf32>
    %1153 = vector.multi_reduction <add>, %1152, %cst_536 [1] : vector<2x64xf32> to vector<2xf32>
    %1154 = vector.shape_cast %1153 : vector<2xf32> to vector<2x1xf32>
    %1155 = vector.extract_strided_slice %1151 {offsets = [0, 128], sizes = [2, 64], strides = [1, 1]} : vector<2x384xf32> to vector<2x64xf32>
    %cst_537 = arith.constant dense<0.000000e+00> : vector<2xf32>
    %1156 = vector.multi_reduction <add>, %1155, %cst_537 [1] : vector<2x64xf32> to vector<2xf32>
    %1157 = vector.shape_cast %1156 : vector<2xf32> to vector<2x1xf32>
    %1158 = vector.extract_strided_slice %1151 {offsets = [0, 256], sizes = [2, 64], strides = [1, 1]} : vector<2x384xf32> to vector<2x64xf32>
    %cst_538 = arith.constant dense<0.000000e+00> : vector<2xf32>
    %1159 = vector.multi_reduction <add>, %1158, %cst_538 [1] : vector<2x64xf32> to vector<2xf32>
    %1160 = vector.shape_cast %1159 : vector<2xf32> to vector<2x1xf32>
    %1161 = arith.mulf %1154, %1094 : vector<2x1xf32>
    %1162 = arith.mulf %1157, %1122 : vector<2x1xf32>
    %1163 = arith.addf %1161, %1162 : vector<2x1xf32>
    %1164 = arith.mulf %1160, %1150 : vector<2x1xf32>
    %1165 = arith.addf %1163, %1164 : vector<2x1xf32>
    %1166 = vector.shape_cast %1165 : vector<2x1xf32> to vector<1x2x1xf32>
    %cst_539 = arith.constant dense<0.000000e+00> : vector<1xf32>
    %1167 = vector.multi_reduction <add>, %1166, %cst_539 [1, 2] : vector<1x2x1xf32> to vector<1xf32>
    %1168 = vector.shape_cast %1167 : vector<1xf32> to vector<1x1x1xf32>
    %1169 = vector.extract %1168[0, 0, 0] : f32 from vector<1x1x1xf32>
    %1170 = arith.mulf %1154, %1094 : vector<2x1xf32>
    %1171 = arith.mulf %1160, %1122 : vector<2x1xf32>
    %1172 = arith.addf %1170, %1171 : vector<2x1xf32>
    %1173 = arith.mulf %1157, %1150 : vector<2x1xf32>
    %1174 = arith.addf %1172, %1173 : vector<2x1xf32>
    %1175 = vector.shape_cast %1174 : vector<2x1xf32> to vector<1x2x1xf32>
    %cst_540 = arith.constant dense<0.000000e+00> : vector<1xf32>
    %1176 = vector.multi_reduction <add>, %1175, %cst_540 [1, 2] : vector<1x2x1xf32> to vector<1xf32>
    %1177 = vector.shape_cast %1176 : vector<1xf32> to vector<1x1x1xf32>
    %1178 = vector.extract %1177[0, 0, 0] : f32 from vector<1x1x1xf32>
    %1179 = arith.mulf %1157, %1094 : vector<2x1xf32>
    %1180 = arith.mulf %1154, %1122 : vector<2x1xf32>
    %1181 = arith.addf %1179, %1180 : vector<2x1xf32>
    %1182 = arith.mulf %1160, %1150 : vector<2x1xf32>
    %1183 = arith.addf %1181, %1182 : vector<2x1xf32>
    %1184 = vector.shape_cast %1183 : vector<2x1xf32> to vector<1x2x1xf32>
    %cst_541 = arith.constant dense<0.000000e+00> : vector<1xf32>
    %1185 = vector.multi_reduction <add>, %1184, %cst_541 [1, 2] : vector<1x2x1xf32> to vector<1xf32>
    %1186 = vector.shape_cast %1185 : vector<1xf32> to vector<1x1x1xf32>
    %1187 = vector.extract %1186[0, 0, 0] : f32 from vector<1x1x1xf32>
    %1188 = arith.mulf %1157, %1094 : vector<2x1xf32>
    %1189 = arith.mulf %1160, %1122 : vector<2x1xf32>
    %1190 = arith.addf %1188, %1189 : vector<2x1xf32>
    %1191 = arith.mulf %1154, %1150 : vector<2x1xf32>
    %1192 = arith.addf %1190, %1191 : vector<2x1xf32>
    %1193 = vector.shape_cast %1192 : vector<2x1xf32> to vector<1x2x1xf32>
    %cst_542 = arith.constant dense<0.000000e+00> : vector<1xf32>
    %1194 = vector.multi_reduction <add>, %1193, %cst_542 [1, 2] : vector<1x2x1xf32> to vector<1xf32>
    %1195 = vector.shape_cast %1194 : vector<1xf32> to vector<1x1x1xf32>
    %1196 = vector.extract %1195[0, 0, 0] : f32 from vector<1x1x1xf32>
    %1197 = arith.mulf %1160, %1094 : vector<2x1xf32>
    %1198 = arith.mulf %1154, %1122 : vector<2x1xf32>
    %1199 = arith.addf %1197, %1198 : vector<2x1xf32>
    %1200 = arith.mulf %1157, %1150 : vector<2x1xf32>
    %1201 = arith.addf %1199, %1200 : vector<2x1xf32>
    %1202 = vector.shape_cast %1201 : vector<2x1xf32> to vector<1x2x1xf32>
    %cst_543 = arith.constant dense<0.000000e+00> : vector<1xf32>
    %1203 = vector.multi_reduction <add>, %1202, %cst_543 [1, 2] : vector<1x2x1xf32> to vector<1xf32>
    %1204 = vector.shape_cast %1203 : vector<1xf32> to vector<1x1x1xf32>
    %1205 = vector.extract %1204[0, 0, 0] : f32 from vector<1x1x1xf32>
    %1206 = arith.mulf %1160, %1094 : vector<2x1xf32>
    %1207 = arith.mulf %1157, %1122 : vector<2x1xf32>
    %1208 = arith.addf %1206, %1207 : vector<2x1xf32>
    %1209 = arith.mulf %1154, %1150 : vector<2x1xf32>
    %1210 = arith.addf %1208, %1209 : vector<2x1xf32>
    %1211 = vector.shape_cast %1210 : vector<2x1xf32> to vector<1x2x1xf32>
    %cst_544 = arith.constant dense<0.000000e+00> : vector<1xf32>
    %1212 = vector.multi_reduction <add>, %1211, %cst_544 [1, 2] : vector<1x2x1xf32> to vector<1xf32>
    %1213 = vector.shape_cast %1212 : vector<1xf32> to vector<1x1x1xf32>
    %1214 = vector.extract %1213[0, 0, 0] : f32 from vector<1x1x1xf32>
    %1215 = arith.cmpf olt, %1178, %1169 : f32
    %1216 = arith.select %1215, %1178, %1169 : f32
    %c1_i32_545 = arith.constant 1 : i32
    %c0_i32_546 = arith.constant 0 : i32
    %1217 = arith.select %1215, %c1_i32_545, %c0_i32_546 : i32
    %1218 = arith.cmpf olt, %1187, %1216 : f32
    %1219 = arith.select %1218, %1187, %1216 : f32
    %c2_i32_547 = arith.constant 2 : i32
    %1220 = arith.select %1218, %c2_i32_547, %1217 : i32
    %1221 = arith.cmpf olt, %1196, %1219 : f32
    %1222 = arith.select %1221, %1196, %1219 : f32
    %c3_i32_548 = arith.constant 3 : i32
    %1223 = arith.select %1221, %c3_i32_548, %1220 : i32
    %1224 = arith.cmpf olt, %1205, %1222 : f32
    %1225 = arith.select %1224, %1205, %1222 : f32
    %c4_i32_549 = arith.constant 4 : i32
    %1226 = arith.select %1224, %c4_i32_549, %1223 : i32
    %1227 = arith.cmpf olt, %1214, %1225 : f32
    %c5_i32_550 = arith.constant 5 : i32
    %1228 = arith.select %1227, %c5_i32_550, %1226 : i32
    %c1_i32_551 = arith.constant 1 : i32
    %1229 = arith.cmpi eq, %1228, %c1_i32_551 : i32
    %c0_i32_552 = arith.constant 0 : i32
    %c0_i32_553 = arith.constant 0 : i32
    %1230 = arith.select %1229, %c0_i32_552, %c0_i32_553 : i32
    %c2_i32_554 = arith.constant 2 : i32
    %1231 = arith.cmpi eq, %1228, %c2_i32_554 : i32
    %c1_i32_555 = arith.constant 1 : i32
    %1232 = arith.select %1231, %c1_i32_555, %1230 : i32
    %c3_i32_556 = arith.constant 3 : i32
    %1233 = arith.cmpi eq, %1228, %c3_i32_556 : i32
    %c1_i32_557 = arith.constant 1 : i32
    %1234 = arith.select %1233, %c1_i32_557, %1232 : i32
    %c4_i32_558 = arith.constant 4 : i32
    %1235 = arith.cmpi eq, %1228, %c4_i32_558 : i32
    %c2_i32_559 = arith.constant 2 : i32
    %1236 = arith.select %1235, %c2_i32_559, %1234 : i32
    %c5_i32_560 = arith.constant 5 : i32
    %1237 = arith.cmpi eq, %1228, %c5_i32_560 : i32
    %c2_i32_561 = arith.constant 2 : i32
    %1238 = arith.select %1237, %c2_i32_561, %1236 : i32
    %1239 = vector.extract_strided_slice %1151 {offsets = [0, 0], sizes = [2, 128], strides = [1, 1]} : vector<2x384xf32> to vector<2x128xf32>
    %c1_i32_562 = arith.constant 1 : i32
    %1240 = arith.cmpi eq, %1238, %c1_i32_562 : i32
    %1241 = vector.extract_strided_slice %1151 {offsets = [0, 128], sizes = [2, 128], strides = [1, 1]} : vector<2x384xf32> to vector<2x128xf32>
    %1242 = arith.select %1240, %1241, %1239 : vector<2x128xf32>
    %c2_i32_563 = arith.constant 2 : i32
    %1243 = arith.cmpi eq, %1238, %c2_i32_563 : i32
    %1244 = vector.extract_strided_slice %1151 {offsets = [0, 256], sizes = [2, 128], strides = [1, 1]} : vector<2x384xf32> to vector<2x128xf32>
    %1245 = arith.select %1243, %1244, %1242 : vector<2x128xf32>
    %1246 = vector.broadcast %13 : vector<1x128xf32> to vector<2x128xf32>
    %1247 = arith.mulf %1245, %1246 : vector<2x128xf32>
    %c0_564 = arith.constant 0 : index
    %c0_565 = arith.constant 0 : index
    %c448 = arith.constant 448 : index
    %1248 = vector.load %arg6[%c0_564, %c0_565, %c448] : memref<3x2x576xf32, #tpu.memory_space<vmem>>, vector<1x2x128xf32>
    %1249 = vector.shape_cast %1248 : vector<1x2x128xf32> to vector<2x128xf32>
    %1250 = arith.addf %1249, %1247 : vector<2x128xf32>
    %c0_566 = arith.constant 0 : index
    %c0_567 = arith.constant 0 : index
    %c448_568 = arith.constant 448 : index
    %1251 = vector.load %arg6[%c0_566, %c0_567, %c448_568] : memref<3x2x576xf32, #tpu.memory_space<vmem>>, vector<1x2x128xf32>
    %1252 = vector.shape_cast %1251 : vector<1x2x128xf32> to vector<2x128xf32>
    %1253 = vector.shape_cast %1250 : vector<2x128xf32> to vector<1x2x128xf32>
    tpu.vector_store %arg6[%c0_566, %c0_567, %c448_568], %1253 {strides = array<i32>} : memref<3x2x576xf32, #tpu.memory_space<vmem>>, vector<1x2x128xf32>,
    %1254 = vector.extract_strided_slice %1247 {offsets = [0, 64], sizes = [2, 64], strides = [1, 1]} : vector<2x128xf32> to vector<2x64xf32>
    %cst_569 = arith.constant dense<0.000000e+00> : vector<2xf32>
    %1255 = vector.multi_reduction <add>, %1254, %cst_569 [1] : vector<2x64xf32> to vector<2xf32>
    %1256 = vector.shape_cast %1255 : vector<2xf32> to vector<2x1xf32>
    %c1_i32_570 = arith.constant 1 : i32
    %1257 = arith.cmpi eq, %1228, %c1_i32_570 : i32
    %c2_i32_571 = arith.constant 2 : i32
    %c1_i32_572 = arith.constant 1 : i32
    %1258 = arith.select %1257, %c2_i32_571, %c1_i32_572 : i32
    %c2_i32_573 = arith.constant 2 : i32
    %1259 = arith.cmpi eq, %1228, %c2_i32_573 : i32
    %c0_i32_574 = arith.constant 0 : i32
    %1260 = arith.select %1259, %c0_i32_574, %1258 : i32
    %c3_i32_575 = arith.constant 3 : i32
    %1261 = arith.cmpi eq, %1228, %c3_i32_575 : i32
    %c2_i32_576 = arith.constant 2 : i32
    %1262 = arith.select %1261, %c2_i32_576, %1260 : i32
    %c4_i32_577 = arith.constant 4 : i32
    %1263 = arith.cmpi eq, %1228, %c4_i32_577 : i32
    %c0_i32_578 = arith.constant 0 : i32
    %1264 = arith.select %1263, %c0_i32_578, %1262 : i32
    %c5_i32_579 = arith.constant 5 : i32
    %1265 = arith.cmpi eq, %1228, %c5_i32_579 : i32
    %c1_i32_580 = arith.constant 1 : i32
    %1266 = arith.select %1265, %c1_i32_580, %1264 : i32
    %1267 = vector.extract_strided_slice %1151 {offsets = [0, 0], sizes = [2, 128], strides = [1, 1]} : vector<2x384xf32> to vector<2x128xf32>
    %c1_i32_581 = arith.constant 1 : i32
    %1268 = arith.cmpi eq, %1266, %c1_i32_581 : i32
    %1269 = vector.extract_strided_slice %1151 {offsets = [0, 128], sizes = [2, 128], strides = [1, 1]} : vector<2x384xf32> to vector<2x128xf32>
    %1270 = arith.select %1268, %1269, %1267 : vector<2x128xf32>
    %c2_i32_582 = arith.constant 2 : i32
    %1271 = arith.cmpi eq, %1266, %c2_i32_582 : i32
    %1272 = vector.extract_strided_slice %1151 {offsets = [0, 256], sizes = [2, 128], strides = [1, 1]} : vector<2x384xf32> to vector<2x128xf32>
    %1273 = arith.select %1271, %1272, %1270 : vector<2x128xf32>
    %1274 = vector.broadcast %13 : vector<1x128xf32> to vector<2x128xf32>
    %1275 = arith.mulf %1273, %1274 : vector<2x128xf32>
    %c1_583 = arith.constant 1 : index
    %c0_584 = arith.constant 0 : index
    %c448_585 = arith.constant 448 : index
    %1276 = vector.load %arg6[%c1_583, %c0_584, %c448_585] : memref<3x2x576xf32, #tpu.memory_space<vmem>>, vector<1x2x128xf32>
    %1277 = vector.shape_cast %1276 : vector<1x2x128xf32> to vector<2x128xf32>
    %1278 = arith.addf %1277, %1275 : vector<2x128xf32>
    %c1_586 = arith.constant 1 : index
    %c0_587 = arith.constant 0 : index
    %c448_588 = arith.constant 448 : index
    %1279 = vector.load %arg6[%c1_586, %c0_587, %c448_588] : memref<3x2x576xf32, #tpu.memory_space<vmem>>, vector<1x2x128xf32>
    %1280 = vector.shape_cast %1279 : vector<1x2x128xf32> to vector<2x128xf32>
    %1281 = vector.shape_cast %1278 : vector<2x128xf32> to vector<1x2x128xf32>
    tpu.vector_store %arg6[%c1_586, %c0_587, %c448_588], %1281 {strides = array<i32>} : memref<3x2x576xf32, #tpu.memory_space<vmem>>, vector<1x2x128xf32>,
    %1282 = vector.extract_strided_slice %1275 {offsets = [0, 64], sizes = [2, 64], strides = [1, 1]} : vector<2x128xf32> to vector<2x64xf32>
    %cst_589 = arith.constant dense<0.000000e+00> : vector<2xf32>
    %1283 = vector.multi_reduction <add>, %1282, %cst_589 [1] : vector<2x64xf32> to vector<2xf32>
    %1284 = vector.shape_cast %1283 : vector<2xf32> to vector<2x1xf32>
    %c1_i32_590 = arith.constant 1 : i32
    %1285 = arith.cmpi eq, %1228, %c1_i32_590 : i32
    %c1_i32_591 = arith.constant 1 : i32
    %c2_i32_592 = arith.constant 2 : i32
    %1286 = arith.select %1285, %c1_i32_591, %c2_i32_592 : i32
    %c2_i32_593 = arith.constant 2 : i32
    %1287 = arith.cmpi eq, %1228, %c2_i32_593 : i32
    %c2_i32_594 = arith.constant 2 : i32
    %1288 = arith.select %1287, %c2_i32_594, %1286 : i32
    %c3_i32_595 = arith.constant 3 : i32
    %1289 = arith.cmpi eq, %1228, %c3_i32_595 : i32
    %c0_i32_596 = arith.constant 0 : i32
    %1290 = arith.select %1289, %c0_i32_596, %1288 : i32
    %c4_i32_597 = arith.constant 4 : i32
    %1291 = arith.cmpi eq, %1228, %c4_i32_597 : i32
    %c1_i32_598 = arith.constant 1 : i32
    %1292 = arith.select %1291, %c1_i32_598, %1290 : i32
    %c5_i32_599 = arith.constant 5 : i32
    %1293 = arith.cmpi eq, %1228, %c5_i32_599 : i32
    %c0_i32_600 = arith.constant 0 : i32
    %1294 = arith.select %1293, %c0_i32_600, %1292 : i32
    %1295 = vector.extract_strided_slice %1151 {offsets = [0, 0], sizes = [2, 128], strides = [1, 1]} : vector<2x384xf32> to vector<2x128xf32>
    %c1_i32_601 = arith.constant 1 : i32
    %1296 = arith.cmpi eq, %1294, %c1_i32_601 : i32
    %1297 = vector.extract_strided_slice %1151 {offsets = [0, 128], sizes = [2, 128], strides = [1, 1]} : vector<2x384xf32> to vector<2x128xf32>
    %1298 = arith.select %1296, %1297, %1295 : vector<2x128xf32>
    %c2_i32_602 = arith.constant 2 : i32
    %1299 = arith.cmpi eq, %1294, %c2_i32_602 : i32
    %1300 = vector.extract_strided_slice %1151 {offsets = [0, 256], sizes = [2, 128], strides = [1, 1]} : vector<2x384xf32> to vector<2x128xf32>
    %1301 = arith.select %1299, %1300, %1298 : vector<2x128xf32>
    %1302 = vector.broadcast %13 : vector<1x128xf32> to vector<2x128xf32>
    %1303 = arith.mulf %1301, %1302 : vector<2x128xf32>
    %c2_603 = arith.constant 2 : index
    %c0_604 = arith.constant 0 : index
    %c448_605 = arith.constant 448 : index
    %1304 = vector.load %arg6[%c2_603, %c0_604, %c448_605] : memref<3x2x576xf32, #tpu.memory_space<vmem>>, vector<1x2x128xf32>
    %1305 = vector.shape_cast %1304 : vector<1x2x128xf32> to vector<2x128xf32>
    %1306 = arith.addf %1305, %1303 : vector<2x128xf32>
    %c2_606 = arith.constant 2 : index
    %c0_607 = arith.constant 0 : index
    %c448_608 = arith.constant 448 : index
    %1307 = vector.load %arg6[%c2_606, %c0_607, %c448_608] : memref<3x2x576xf32, #tpu.memory_space<vmem>>, vector<1x2x128xf32>
    %1308 = vector.shape_cast %1307 : vector<1x2x128xf32> to vector<2x128xf32>
    %1309 = vector.shape_cast %1306 : vector<2x128xf32> to vector<1x2x128xf32>
    tpu.vector_store %arg6[%c2_606, %c0_607, %c448_608], %1309 {strides = array<i32>} : memref<3x2x576xf32, #tpu.memory_space<vmem>>, vector<1x2x128xf32>,
    %1310 = vector.extract_strided_slice %1303 {offsets = [0, 64], sizes = [2, 64], strides = [1, 1]} : vector<2x128xf32> to vector<2x64xf32>
    %cst_609 = arith.constant dense<0.000000e+00> : vector<2xf32>
    %1311 = vector.multi_reduction <add>, %1310, %cst_609 [1] : vector<2x64xf32> to vector<2xf32>
    %1312 = vector.shape_cast %1311 : vector<2xf32> to vector<2x1xf32>
    %c0_610 = arith.constant 0 : index
    %c0_611 = arith.constant 0 : index
    %1313 = vector.load %arg8[%c0_610, %c0_611] : memref<2x3xf32, #tpu.memory_space<vmem>>, vector<2x1xf32>
    tpu.vector_store %arg8[%c0_610, %c0_611], %1256 {strides = array<i32>} : memref<2x3xf32, #tpu.memory_space<vmem>>, vector<2x1xf32>,
    %c0_612 = arith.constant 0 : index
    %c1_613 = arith.constant 1 : index
    %1314 = vector.load %arg8[%c0_612, %c1_613] : memref<2x3xf32, #tpu.memory_space<vmem>>, vector<2x1xf32>
    tpu.vector_store %arg8[%c0_612, %c1_613], %1284 {strides = array<i32>} : memref<2x3xf32, #tpu.memory_space<vmem>>, vector<2x1xf32>,
    %c0_614 = arith.constant 0 : index
    %c2_615 = arith.constant 2 : index
    %1315 = vector.load %arg8[%c0_614, %c2_615] : memref<2x3xf32, #tpu.memory_space<vmem>>, vector<2x1xf32>
    tpu.vector_store %arg8[%c0_614, %c2_615], %1312 {strides = array<i32>} : memref<2x3xf32, #tpu.memory_space<vmem>>, vector<2x1xf32>,
    %c0_616 = arith.constant 0 : index
    %c0_617 = arith.constant 0 : index
    %c0_618 = arith.constant 0 : index
    %1316 = vector.load %arg6[%c0_616, %c0_617, %c0_618] : memref<3x2x576xf32, #tpu.memory_space<vmem>>, vector<3x2x512xf32>
    %c0_619 = arith.constant 0 : index
    %c0_620 = arith.constant 0 : index
    %c0_621 = arith.constant 0 : index
    %1317 = vector.load %arg5[%c0_619, %c0_620, %c0_621] : memref<3x2x512xf32, #tpu.memory_space<vmem>>, vector<3x2x512xf32>
    tpu.vector_store %arg5[%c0_619, %c0_620, %c0_621], %1316 {strides = array<i32>} : memref<3x2x512xf32, #tpu.memory_space<vmem>>, vector<3x2x512xf32>,
    %c0_622 = arith.constant 0 : index
    %c0_623 = arith.constant 0 : index
    %c512 = arith.constant 512 : index
    %1318 = vector.load %arg6[%c0_622, %c0_623, %c512] : memref<3x2x576xf32, #tpu.memory_space<vmem>>, vector<3x2x64xf32>
    %c0_624 = arith.constant 0 : index
    %c0_625 = arith.constant 0 : index
    %c0_626 = arith.constant 0 : index
    %1319 = vector.load %arg7[%c0_624, %c0_625, %c0_626] : memref<3x2x64xf32, #tpu.memory_space<vmem>>, vector<3x2x64xf32>
    tpu.vector_store %arg7[%c0_624, %c0_625, %c0_626], %1318 {strides = array<i32>} : memref<3x2x64xf32, #tpu.memory_space<vmem>>, vector<3x2x64xf32>,
    return
  }
  func.func @transform_0(%arg0: i32) -> (i32, i32) {
    %c0_i32 = arith.constant 0 : i32
    %c0_i32_0 = arith.constant 0 : i32
    return %arg0, %c0_i32 : i32, i32
  }
  func.func @transform_1(%arg0: i32) -> (i32, i32) {
    %c0_i32 = arith.constant 0 : i32
    %c0_i32_0 = arith.constant 0 : i32
    %c0_i32_1 = arith.constant 0 : i32
    return %c0_i32, %c0_i32_0 : i32, i32
  }
  func.func @transform_2(%arg0: i32) -> (i32, i32) {
    %c0_i32 = arith.constant 0 : i32
    %c0_i32_0 = arith.constant 0 : i32
    %c0_i32_1 = arith.constant 0 : i32
    return %c0_i32, %c0_i32_0 : i32, i32
  }
  func.func @transform_3(%arg0: i32) -> (i32, i32) {
    %c0_i32 = arith.constant 0 : i32
    %c0_i32_0 = arith.constant 0 : i32
    %c0_i32_1 = arith.constant 0 : i32
    return %c0_i32, %c0_i32_0 : i32, i32
  }
  func.func @transform_4(%arg0: i32) -> (i32, i32, i32) {
    %c0_i32 = arith.constant 0 : i32
    %c0_i32_0 = arith.constant 0 : i32
    %c0_i32_1 = arith.constant 0 : i32
    return %c0_i32, %c0_i32_0, %arg0 : i32, i32, i32
  }
}

</mosaic_0001>

<bundles_post_ra>
// kernel: tpu_custom_call.1
= control target key start
LH: loop header
LB: loop body
LE: loop exit
PB: predicated region body
PF: predicated region fallthrough
CT: control target
= control target key end

     0   :  { %9 = vsyncpa [#allocation6], 0  ;;  %s3848_s0 = inlined_call_operand.hbm [shape: f32[80,128], index: 0, kind: input, shape index: {}]   ;;  %s3849_s1 = inlined_call_operand.hbm [shape: f32[128,384], index: 1, kind: input, shape index: {}]   ;;  %s3850_s2 = inlined_call_operand.vmem [shape: f32[1,384], index: 2, kind: input, shape index: {}]   ;;  %s3851_s3 = inlined_call_operand.vmem [shape: f32[1,128], index: 3, kind: input, shape index: {}]   ;;  %s3852_s4 = inlined_call_operand.hbm [shape: f32[3,2,2560], index: 4, kind: output, shape index: {}]  }
   0x1   :  { %11 = vsyncpa [#allocation6 + $0x1], 0 }
   0x2   :  { %12 = vsyncpa [#allocation9], 0 }
   0x3   :  { %13 = vsyncpa [#allocation7], 0 }
   0x4   :  { %15 = vsyncpa [#allocation7 + $0x1], 0  ;;  %s2972_s15 = smov 0   ;;  %s2974_s16 = smov 0  }
   0x5   :  { %s2976_s17 = smov 0   ;;  %s2978_s18 = smov 0  }
   0x6 LB: > { %s2993_s19 = sadd.s32 4294967295, %s2929_s18   ;;  %s2497_s20 = sadd.s32 4294967294, %s2929_s18   ;;  %s2929_s18 = sphi %s2978_s18, %s3874_s18   ;;  %s2925_s17 = sphi %s2976_s17, %s3873_s17   ;;  %s2921_s16 = sphi %s2974_s16, %s3872_s16   ;;  %s2917_s15 = sphi %s2972_s15, %s3871_s15  }
   0x7   : > { %p41_p0 = scmp.ne.s32.totalorder %s2921_s16, %s2917_s15  ;;  %p3853_p1 = scmp.eq.s32.totalorder %s2993_s19, 0 }
   0x8   : > { %p134_p3 = scmp.eq.s32.totalorder %s2497_s20, 4  ;;  %p2498_p5 = scmp.ge.s32.totalorder %s2929_s18, 1 }
   0x9   : > { %p3002_p4 = por %p3853_p1, %p41_p0  ;;  %p141_p7 = scmp.lt.s32.totalorder %s2929_s18, 6 }
   0xa   : > { %p3007_p6 = por %p134_p3, %p41_p0  ;;  %s2931_s24 = smov [#allocation8]  }
   0xb   : > { %s3856_s21 = scalar_select %p3002_p4, 1, 0 }
   0xc   : > { %s3857_s22 = scalar_select %p3007_p6, 1, 0 }
   0xd   : > { %p3013_p9 = pnand %p2498_p5, %p141_p7  ;;  %s153_s25 = sshll.u32 %s2931_s24, 4  ;;  %s154_s25 = int_to_ptr.vmem [resolvable:$true] %s153_s25 }
   0xe   : > { %s3026_s27 = sadd.s32 1, %s2929_s18   ;;  %s28_s28 = sadd.s32 1, %s2925_s17 }
   0xf   : > { %s3858_s23 = scalar_select %p3013_p9, 1, 0 }
  0x10   : > { %p2737_p10 = pneg %p3013_p9  ;;  %s25_s29 = ssub.s32 %s2929_s18, %s3026_s27 }
  0x11   : > { %s2801_s6 = scalar_lea.hbm %s3849_s1, 6144 }
  0x12   : > { %p3021_p11 = pnand %p2737_p10, %p3853_p1  ;;  %p2802_p12 = scmp.ne.s32.totalorder %s3849_s1, %s2801_s6 }
  0x13   : > { %p2808_p5 = scmp.lt.u32.totalorder %s2801_s6, %s3849_s1 }
  0x14   : > { %p2803_p13 = pneg %p3021_p11 }
  0x16   : > { %p2804_p0 = pnand %p2803_p13, %p2802_p12 }
  0x18   : > { %p2805_p3 = pneg %p2804_p0 }
  0x1a   : > { %p2810_p7 = pnand %p2808_p5, %p2805_p3 }
  0x1c   : > { %2813 = shalt.err (!%p2810_p7)
}
  0x1d   : > { %s2814_s11 = scalar_lea.vmem %s154_s25, 6144  ;;  %p2822_p2 = scmp.lt.s32.totalorder %s154_s25, %s154_s25 }
  0x1e   : > { %p2815_p10 = scmp.ne.s32.totalorder %s154_s25, %s2814_s11  ;;  %p2823_p6 = scmp.lt.s32.totalorder %s2814_s11, %s2814_s11 }
  0x20   : > { %p2817_p8 = pnand %p2815_p10, %p2803_p13  ;;  %p2824_p4 = por %p2823_p6, %p2822_p2 }
  0x22   : > { %p2818_p1 = pneg %p2817_p8 }
  0x24   : > { %p2825_p9 = pnand %p2824_p4, %p2818_p1 }
  0x26   : > { %2828 = shalt.err (!%p2825_p9)
}
  0x27   : > { %s2932_s12 = smov 384   ;;  %s2933_s13 = smov 24  }
  0x28   : > { %2740 = dma.hbm_to_vmem [thread:$0]  (!%p3021_p11), %s3849_s1, 6144, %s154_s25, [#allocation9], %s2932_s12, %s2932_s12, %s2933_s13  }
  0x29   : > { %p26_p8 = scmp.eq.s32.totalorder %s25_s29, 0  ;;  %p35_p2 = scmp.ne.s32.totalorder %s2925_s17, %s2921_s16 }
  0x2a   : > { %p36_p1 = scmp.eq.s32.totalorder %s2929_s18, 0  ;;  %p2750_p4 = scmp.lt.s32.totalorder %s2929_s18, 5 }
  0x2b   : > { %s3052_s24 = scalar_select %p26_p8, %s2925_s17, %s28_s28  }
  0x2c   : > { %p37_p6 = por %p36_p1, %p35_p2  ;;  %p3860_p9 = scmp.eq.s32.totalorder %s2993_s19, 4 }
  0x2d   : > { %s173_s5 = sand.u32 1, %s2925_s17   ;;  %s2513_s6 = sshll.u32 %s2929_s18, 8 }
  0x2e   : > { %p3056_p12 = por %p3860_p9, %p35_p2  ;;  %s2501_s7 = sshll.u32 %s173_s5, 4 }
  0x2f   : > { %s3065_s9 = scalar_lea.hbm %s3848_s0, %s2513_s6  ;;  %s177_s25 = scalar_lea.vmem [#allocation5], %s2501_s7 }
  0x30   : > { %s184_s28 = sshll.u32 %s177_s25, 4  ;;  %p3067_p11 = pnand %p2750_p4, %p37_p6  ;;  %s3071_s28 = int_to_ptr.vmem [resolvable:$true] %s184_s28 }
  0x31   : > { %s3073_s10 = scalar_lea.sflag [#allocation6], %s173_s5  ;;  %s2829_s11 = scalar_lea.hbm %s3065_s9, 256 }
  0x32   : > { %p2830_p13 = scmp.ne.s32.totalorder %s3065_s9, %s2829_s11  ;;  %p2831_p0 = pneg %p3067_p11 }
  0x33   : > { %s2834_s14 = scalar_lea.hbm %s3848_s0, 1280  ;;  %p2835_p7 = scmp.lt.u32.totalorder %s3065_s9, %s3848_s0 }
  0x34   : > { %p2832_p3 = pnand %p2831_p0, %p2830_p13  ;;  %p2836_p10 = scmp.lt.u32.totalorder %s2834_s14, %s2829_s11 }
  0x35   : > { %p2838_p2 = scmp.lt.u32.totalorder %s2829_s11, %s3065_s9 }
  0x36   : > { %p2833_p5 = pneg %p2832_p3  ;;  %p2837_p8 = por %p2836_p10, %p2835_p7 }
  0x38   : > { %p2839_p1 = por %p2838_p2, %p2837_p8 }
  0x3a   : > { %p2840_p4 = pnand %p2839_p1, %p2833_p5 }
  0x3c   : > { %2843 = shalt.err (!%p2840_p4)
}
  0x3d   : > { %s2844_s5 = scalar_lea.vmem %s3071_s28, 256  ;;  %s2934_s7 = smov [#allocation5]  }
  0x3e   : > { %p2845_p6 = scmp.ne.s32.totalorder %s3071_s28, %s2844_s5  ;;  %s2849_s26 = sshll.u32 %s2934_s7, 4  ;;  %s2850_s26 = int_to_ptr.vmem [resolvable:$false] %s2849_s26 }
  0x3f   : > { %s2851_s8 = scalar_lea.vmem %s2850_s26, 512  ;;  %p2852_p3 = scmp.lt.s32.totalorder %s3071_s28, %s2850_s26 }
  0x40   : > { %p2847_p9 = pnand %p2845_p6, %p2831_p0  ;;  %p2853_p7 = scmp.lt.s32.totalorder %s2851_s8, %s2844_s5 }
  0x42   : > { %p2848_p13 = pneg %p2847_p9  ;;  %p2854_p10 = por %p2853_p7, %p2852_p3 }
  0x44   : > { %p2855_p8 = pnand %p2854_p10, %p2848_p13 }
  0x46   : > { %2858 = shalt.err (!%p2855_p8)
}
  0x47   : > { %s2935_s25 = smov 128   ;;  %s2936_s11 = smov 8  }
  0x48   : > { %2744 = dma.hbm_to_vmem [thread:$0]  (!%p3067_p11), %s3065_s9, 256, %s3071_s28, %s3073_s10, %s2935_s25, %s2935_s25, %s2936_s11  }
  0x49   : > { %p3863_p0 = scmp.ne.s32.totalorder %s3858_s23, 0 }
  0x4a   : > { %s3104_s12 = sand.u32 (!%p3863_p0), 1, %s2921_s16   ;;  %p3864_p5 = scmp.ne.s32.totalorder (!%p3863_p0), %s3856_s21, 0 }
  0x4b   : > { %196 = sbr.rel (%p3863_p0) target bundleno = 5044 (0x13b4), region = 36  ;;  %s2505_s13 = sshll.u32 (!%p3863_p0), %s3104_s12, 4 }
  0x4c   : > { %s199_s14 = scalar_lea.sflag (!%p3863_p0), [#allocation6], %s3104_s12  ;;  %s3108_s20 = scalar_lea.vmem (!%p3863_p0), [#allocation5], %s2505_s13 }
  0x52   : > { %2904 = dma.done.wait (%p3864_p5), %s199_s14, 256  }
  0x53   : > { %2906 = vsyncadd (%p3864_p5), %s199_s14, 4294967040  ;;  %p3865_p11 = scmp.eq.s32.totalorder %s2993_s19, 0 }
  0x55   : > { %2908 = dma.done.wait (%p3865_p11), [#allocation9], 6144   ;;  %p3866_p2 = pmov %p3865_p11 }
  0x56   : > { %s2632_s23 = smul.u32 24, %s3104_s12  ;;  %p3867_p1 = scmp.ne.s32.totalorder %s2993_s19, 0 }
  0x57   : > { %2910 = vsyncadd (%p3866_p2), [#allocation9], 4294961152  ;;  %vm237_vm0 = vcmask (!%p3867_p1), 517120   ;;  %vm241_vm1 = vcmask (!%p3867_p1), 17408   ;;  %v2937_v0 = vmov (!%p3867_p1), 0.0  }
  0x58   : > { %s3119_s9 = scalar_lea.vmem [#allocation10], %s2632_s23  ;;  %236 = sbr.rel (%p3867_p1) target bundleno = 95 (0x5f), region = 48  ;;  %238 = vst.msk [vmem:[#allocation3] sm:$0x3] (!%p3867_p1), %vm237_vm0, %v2937_v0  ;;  %239 = vst.msk [vmem:[#allocation3 + $0x2] sm:$0x3] (!%p3867_p1), %vm237_vm0, %v2937_v0 }
  0x59   : > { %240 = vst.msk [vmem:[#allocation3 + $0x4] sm:$0x3] (!%p3867_p1), %vm237_vm0, %v2937_v0 }
  0x5a   : > { %242 = vst.msk [vmem:[#allocation4] sm:$0x3] (!%p3867_p1), %vm241_vm1, %v2937_v0 }
  0x5f PF: > { %v259_v1 = vld [vmem:[#allocation8 + $0x8] sm:$0xff]  ;;  %v262_v2 = vld [vmem:[#allocation8 + $0x20] sm:$0xff]  ;;  %v261_v5 = vld [vmem:[#allocation8 + $0x18] sm:$0xff]  ;;  %v2938_v8 = vmov 0.0   ;;  %vm244_vm2 = vcmask 517120   ;;  %s2939_s29 = smov 127  }
  0x60   : > { %v258_v3 = vld [vmem:[#allocation8] sm:$0xff]  ;;  %v2568_v4 = vpack.c.bf16 %v262_v2, %v259_v1  ;;  %v260_v6 = vld [vmem:[#allocation8 + $0x10] sm:$0xff]  ;;  %v263_v7 = vld [vmem:[#allocation8 + $0x28] sm:$0xff]  ;;  %387 = vmatprep.mubr.f32.mxu0 %v2938_v8  ;;  %243 = vst [vmem:[#allocation2] sm:$0xff] %v2938_v8  ;;  %s2940_s10 = smov 126   ;;  %vm499_vm3 = vcmask 1024  }
  0x61   : > { %246 = vst [vmem:[#allocation2 + $0xa] sm:$0xff] %v2938_v8  ;;  %248 = vst [vmem:[#allocation2 + $0x14] sm:$0xff] %v2938_v8  ;;  %v2570_v9 = vpack.c.bf16 %v261_v5, %v258_v3  ;;  %v2600_v10 = vpack.c.bf16 %v263_v7, %v260_v6  ;;  %v265_v11 = vld [vmem:[#allocation8 + $0x38] sm:$0xff]  ;;  %v268_v12 = vld [vmem:[#allocation8 + $0x50] sm:$0xff]  ;;  %vm687_vm10 = vcmask 519170   ;;  %vm943_vm1 = vcmask 521220  }
  0x62   : > { %v264_v13 = vld [vmem:[#allocation8 + $0x30] sm:$0xff]  ;;  %2569 = vmatprep.subr.bf16.mxu0 %v2568_v4  ;;  %v2572_v14 = vpack.c.bf16 %v268_v12, %v265_v11  ;;  %v267_v15 = vld [vmem:[#allocation8 + $0x48] sm:$0xff]  ;;  %v266_v16 = vld [vmem:[#allocation8 + $0x40] sm:$0xff]  ;;  %245 = vst.msk [vmem:[#allocation2 + $0x8] sm:$0x3] %vm244_vm2, %v2938_v8 }
  0x63   : > { %v269_v17 = vld [vmem:[#allocation8 + $0x58] sm:$0xff]  ;;  %2571 = vmatpush1.bf16.msra.mxu0 %v2570_v9  ;;  %2601 = vmatprep.subr.bf16.mxu1 %v2600_v10  ;;  %v2574_v18 = vpack.c.bf16 %v267_v15, %v264_v13  ;;  %v271_v20 = vld [vmem:[#allocation8 + $0x68] sm:$0xff]  ;;  %v274_v21 = vld [vmem:[#allocation8 + $0x80] sm:$0xff]  ;;  %247 = vst.msk [vmem:[#allocation2 + $0x12] sm:$0x3] %vm244_vm2, %v2938_v8  ;;  %v308_v13 = vlaneseq }
  0x64   : > { %v2604_v19 = vpack.c.bf16 %v269_v17, %v266_v16  ;;  %v270_v22 = vld [vmem:[#allocation8 + $0x60] sm:$0xff]  ;;  %2573 = vmatprep.subr.bf16.mxu0 %v2572_v14  ;;  %2603 = vmatpush3.bf16.msra.mxu1 %v2600_v10  ;;  %v2576_v23 = vpack.c.bf16 %v274_v21, %v271_v20  ;;  %v273_v24 = vld [vmem:[#allocation8 + $0x78] sm:$0xff]  ;;  %v272_v25 = vld [vmem:[#allocation8 + $0x70] sm:$0xff]  ;;  %249 = vst.msk [vmem:[#allocation2 + $0x1c] sm:$0x3] %vm244_vm2, %v2938_v8 }
  0x65   : > { %v275_v26 = vld [vmem:[#allocation8 + $0x88] sm:$0xff]  ;;  %v277_v28 = vld [vmem:[#allocation8 + $0x98] sm:$0xff]  ;;  %v280_v29 = vld [vmem:[#allocation8 + $0xb0] sm:$0xff]  ;;  %v2578_v32 = vpack.c.bf16 %v273_v24, %v270_v22  ;;  %v3136_v14 = vshrl.u32 %v308_v13, 7 }
  0x66   : > { %2605 = vmatprep.subr.bf16.mxu1 %v2604_v19  ;;  %v2608_v27 = vpack.c.bf16 %v275_v26, %v272_v25  ;;  %v278_v30 = vld [vmem:[#allocation8 + $0xa0] sm:$0xff]  ;;  %v281_v31 = vld [vmem:[#allocation8 + $0xb8] sm:$0xff]  ;;  %v2580_v33 = vpack.c.bf16 %v280_v29, %v277_v28  ;;  %v276_v34 = vld [vmem:[#allocation8 + $0x90] sm:$0xff] }
  0x67   : > { %2575 = vmatpush1.bf16.msra.mxu0 %v2574_v18  ;;  %v279_v35 = vld [vmem:[#allocation8 + $0xa8] sm:$0xff]  ;;  %v2612_v36 = vpack.c.bf16 %v281_v31, %v278_v30  ;;  %v286_v38 = vld [vmem:[#allocation8 + $0xe0] sm:$0xff]  ;;  %v284_v39 = vld [vmem:[#allocation8 + $0xd0] sm:$0xff]  ;;  %v310_v15 = vsub.s32 0, %v3136_v14  ;;  %v314_v17 = vsub.s32 1, %v3136_v14  ;;  %v318_v18 = vsub.s32 2, %v3136_v14 }
  0x68   : > { %2577 = vmatprep.subr.bf16.mxu0 %v2576_v23  ;;  %2607 = vmatpush3.bf16.msra.mxu1 %v2604_v19  ;;  %v283_v37 = vld [vmem:[#allocation8 + $0xc8] sm:$0xff]  ;;  %v2582_v41 = vpack.c.bf16 %v279_v35, %v276_v34  ;;  %v282_v43 = vld [vmem:[#allocation8 + $0xc0] sm:$0xff]  ;;  %v285_v44 = vld [vmem:[#allocation8 + $0xd8] sm:$0xff] }
  0x69   : > { %2609 = vmatprep.subr.bf16.mxu1 %v2608_v27  ;;  %v287_v40 = vld [vmem:[#allocation8 + $0xe8] sm:$0xff]  ;;  %v2584_v42 = vpack.c.bf16 %v286_v38, %v283_v37  ;;  %v289_v46 = vld [vmem:[#allocation8 + $0xf8] sm:$0xff]  ;;  %v292_v47 = vld [vmem:[#allocation8 + $0x110] sm:$0xff]  ;;  %v2586_v50 = vpack.c.bf16 %v285_v44, %v282_v43 }
  0x6a   : > { %v2616_v45 = vpack.c.bf16 %v287_v40, %v284_v39  ;;  %v290_v48 = vld [vmem:[#allocation8 + $0x100] sm:$0xff]  ;;  %v293_v49 = vld [vmem:[#allocation8 + $0x118] sm:$0xff]  ;;  %v2588_v51 = vpack.c.bf16 %v292_v47, %v289_v46  ;;  %v288_v52 = vld [vmem:[#allocation8 + $0xf0] sm:$0xff] }
  0x6b   : > { %2579 = vmatpush1.bf16.msra.mxu0 %v2578_v32  ;;  %v291_v53 = vld [vmem:[#allocation8 + $0x108] sm:$0xff]  ;;  %v256_v54 = vld [vmem:[%s3108_s20] sm:$0xff]  ;;  %v2620_v55 = vpack.c.bf16 %v293_v49, %v290_v48  ;;  %v297_v63 = vld [vmem:[#allocation8 + $0x138] sm:$0xff] }
  0x6c   : > { %2581 = vmatprep.subr.bf16.mxu0 %v2580_v33  ;;  %2611 = vmatpush3.bf16.msra.mxu1 %v2608_v27  ;;  %v295_v56 = vld [vmem:[#allocation8 + $0x128] sm:$0xff]  ;;  %v298_v57 = vld [vmem:[#allocation8 + $0x140] sm:$0xff]  ;;  %v296_v58 = vld [vmem:[#allocation8 + $0x130] sm:$0xff]  ;;  %v2590_v60 = vpack.c.bf16 %v291_v53, %v288_v52 }
  0x6d   : > { %2613 = vmatprep.subr.bf16.mxu1 %v2612_v36  ;;  %2565 = vmatprep.mubr.f32.mxu1 %v256_v54  ;;  %v299_v59 = vld [vmem:[#allocation8 + $0x148] sm:$0xff]  ;;  %v2592_v61 = vpack.c.bf16 %v298_v57, %v295_v56  ;;  %v294_v62 = vld [vmem:[#allocation8 + $0x120] sm:$0xff]  ;;  %v301_v1 = vld [vmem:[#allocation8 + $0x158] sm:$0xff] }
  0x6e   : > { %v2624_v0 = vpack.c.bf16 %v299_v59, %v296_v58  ;;  %v304_v2 = vld [vmem:[#allocation8 + $0x170] sm:$0xff]  ;;  %v302_v3 = vld [vmem:[#allocation8 + $0x160] sm:$0xff]  ;;  %v305_v4 = vld [vmem:[#allocation8 + $0x178] sm:$0xff]  ;;  %v2594_v5 = vpack.c.bf16 %v297_v63, %v294_v62 }
  0x6f   : > { %2583 = vmatpush1.bf16.msra.mxu0 %v2582_v41  ;;  %v2596_v6 = vpack.c.bf16 %v304_v2, %v301_v1  ;;  %v300_v7 = vld [vmem:[#allocation8 + $0x150] sm:$0xff]  ;;  %v303_v9 = vld [vmem:[#allocation8 + $0x168] sm:$0xff]  ;;  %v2628_v10 = vpack.c.bf16 %v305_v4, %v302_v3  ;;  %v306_v16 = vld [vmem:[%s3850_s2] sm:$0x7] }
  0x70   : > { %2585 = vmatprep.subr.bf16.mxu0 %v2584_v42  ;;  %2615 = vmatpush3.bf16.msra.mxu1 %v2612_v36  ;;  %v2598_v11 = vpack.c.bf16 %v303_v9, %v300_v7  ;;  %v257_v12 = vld [vmem:[%s3108_s20 + $0x8] sm:$0xff]  ;;  %v3144_v19 = vrot.slane %v306_v16, %v310_v15  ;;  %v3146_v20 = vrot.slane %v306_v16, %v314_v17 }
  0x71   : > { %2617 = vmatprep.subr.bf16.mxu1 %v2616_v45  ;;  %v319_v21 = vrot.slane %v306_v16, %v318_v18  ;;  %v476_v32 = vld [vmem:[#allocation4] sm:$0x3]  ;;  %v250_v63 = vld [vmem:[#allocation3] sm:$0x3]  ;;  %v252_v1 = vld [vmem:[#allocation3 + $0x4] sm:$0x3] }
  0x72   : > { %253 = vst.msk [vmem:[#allocation2] sm:$0x3] %vm244_vm2, %v250_v63  ;;  %255 = vst.msk [vmem:[#allocation2 + $0x14] sm:$0x3] %vm244_vm2, %v252_v1 }
  0x73   : > { %2587 = vmatpush1.bf16.msra.mxu0 %v2586_v50 }
  0x74   : > { %2589 = vmatprep.subr.bf16.mxu0 %v2588_v51  ;;  %2619 = vmatpush3.bf16.msra.mxu1 %v2616_v45 }
  0x75   : > { %2621 = vmatprep.subr.bf16.mxu1 %v2620_v55 }
  0x77   : > { %2591 = vmatpush1.bf16.msra.mxu0 %v2590_v60 }
  0x78   : > { %2593 = vmatprep.subr.bf16.mxu0 %v2592_v61  ;;  %2623 = vmatpush3.bf16.msra.mxu1 %v2620_v55 }
  0x79   : > { %2625 = vmatprep.subr.bf16.mxu1 %v2624_v0 }
  0x7b   : > { %2595 = vmatpush1.bf16.msra.mxu0 %v2594_v5 }
  0x7c   : > { %2597 = vmatprep.subr.bf16.mxu0 %v2596_v6  ;;  %2627 = vmatpush3.bf16.msra.mxu1 %v2624_v0  ;;  %v251_v0 = vld [vmem:[#allocation3 + $0x2] sm:$0x3] }
  0x7d   : > { %2629 = vmatprep.subr.bf16.mxu1 %v2628_v10  ;;  %254 = vst.msk [vmem:[#allocation2 + $0xa] sm:$0x3] %vm244_vm2, %v251_v0 }
  0x7f   : > { %2599 = vmatpush1.bf16.msra.mxu0 %v2598_v11 }
  0x80   : > { %2631 = vmatpush3.bf16.msra.mxu1 %v2628_v10 }
  0x82   : > { %388 = vmatmul.mubr.f32.vlgmr.msra.gmra.mrb[0].mxu0 %v256_v54 }
  0x83   : > { %2566 = vmatmul.mubr.f32.vlgmr.msra.gmra.mrb[0].mxu1 %v257_v12  ;;  %393 = vmatprep.mubr.f32.mxu0 %v2938_v8 }
  0x84   : > { %v650_v63 = vld [vmem:[#allocation2 + $0xa] sm:$0x3] }
  0x86   : > { %394 = vmatmul.mubr.f32.gmra.mrb[2].mxu0 %v257_v12 }
 0x155   : > { %v389_v22 = vpop.f32.mrb[0].mxu0 }
 0x156   : > { %v3149_v8 = vadd.f32 %v389_v22, %v3144_v19  ;;  %v391_v23 = vpop.f32.mrb[1].mxu0  ;;  %v2567_v24 = vpop.f32.mrb[0].mxu1 }
 0x157   : > { %v3152_v25 = vadd.f32 %v391_v23, %v3146_v20  ;;  %v3154_v26 = vadd.f32 %v2567_v24, %v319_v21  ;;  %v466_v27 = vpop.f32.mrb[1].mxu1 }
 0x158   : > { %v3156_v28 = vadd.f32 %v466_v27, %v319_v21  ;;  %v477_v29 = vsel %vm244_vm2, %v3149_v8, 0.0 }
 0x159   : > { %478 = vadd.xlane.f32.xlu1 %v477_v29  ;;  %v480_v30 = vsel %vm244_vm2, %v3152_v25, 0.0 }
 0x15a   : > { %481 = vadd.xlane.f32.xlu0 %v480_v30  ;;  %v483_v31 = vsel %vm244_vm2, %v3156_v28, 0.0 }
 0x15e   : > { %484 = vadd.xlane.f32.xlu0 %v483_v31 }
 0x1e6   : > { %v479_v37 = vpop.xlane.xlu1 %478 }
 0x1e7   : > { %v482_v33 = vpop.xlane.xlu0 %481  ;;  %v486_v38 = vmul.f32 %v479_v37, %v476_v32 }
 0x1e8   : > { %v487_v34 = vmul.f32 %v482_v33, %v476_v32 }
 0x1ea   : > { %489 = vrot.lane.b32.xlu1 %v487_v34, %s2939_s29 }
 0x1eb   : > { %v485_v35 = vpop.xlane.xlu0 %484 }
 0x1ec   : > { %v493_v36 = vmul.f32 %v485_v35, %v476_v32 }
 0x1ee   : > { %510 = vrot.lane.b32.xlu0 %v493_v36, %s2939_s29  ;;  %495 = vrot.lane.b32.xlu1 %v493_v36, %s2940_s10 }
 0x1f2   : > { %514 = vrot.lane.b32.xlu1 %v487_v34, %s2940_s10  ;;  %545 = vrot.lane.b32.xlu0 %v486_v38, %s2940_s10 }
 0x1f6   : > { %529 = vrot.lane.b32.xlu1 %v486_v38, %s2939_s29 }
 0x25c   : > { %v490_v39 = vpop.permute.xlu1 %489 }
 0x25d   : > { %v492_v40 = vadd.f32 %v490_v39, %v486_v38  ;;  %v571_v59 = vadd.f32 %v493_v36, %v490_v39 }
 0x260   : > { %v511_v41 = vpop.permute.xlu0 %510  ;;  %v496_v42 = vpop.permute.xlu1 %495 }
 0x261   : > { %v498_v43 = vadd.f32 %v496_v42, %v492_v40  ;;  %v513_v44 = vadd.f32 %v511_v41, %v486_v38  ;;  %v544_v53 = vadd.f32 %v511_v41, %v487_v34 }
 0x263   : > { %v500_v45 = vsel %vm499_vm3, %v498_v43, 0.0 }
 0x264   : > { %501 = vadd.xlane.f32.xlu1 %v500_v45  ;;  %v515_v46 = vpop.permute.xlu1 %514  ;;  %v546_v52 = vpop.permute.xlu0 %545 }
 0x265   : > { %v517_v47 = vadd.f32 %v515_v46, %v513_v44  ;;  %v548_v58 = vadd.f32 %v546_v52, %v544_v53  ;;  %v572_v61 = vadd.f32 %v571_v59, %v546_v52  ;;  %v3199_v52 = vld [vmem:[%s3851_s3] ss:$0 sm:$0xff] }
 0x267   : > { %v518_v48 = vsel %vm499_vm3, %v517_v47, 0.0  ;;  %v549_v60 = vsel %vm499_vm3, %v548_v58, 0.0  ;;  %v573_v62 = vsel %vm499_vm3, %v572_v61, 0.0 }
 0x268   : > { %519 = vadd.xlane.f32.xlu0 %v518_v48  ;;  %v530_v49 = vpop.permute.xlu1 %529 }
 0x269   : > { %v532_v50 = vadd.f32 %v530_v49, %v487_v34  ;;  %v559_v51 = vadd.f32 %v530_v49, %v493_v36 }
 0x26b   : > { %v560_v54 = vadd.f32 %v559_v51, %v515_v46  ;;  %v533_v55 = vadd.f32 %v532_v50, %v496_v42 }
 0x26d   : > { %v561_v56 = vsel %vm499_vm3, %v560_v54, 0.0  ;;  %v534_v57 = vsel %vm499_vm3, %v533_v55, 0.0 }
 0x26e   : > { %562 = vadd.xlane.f32.xlu1 %v561_v56  ;;  %535 = vadd.xlane.f32.xlu0 %v534_v57  ;;  %v622_v56 = vld [vmem:[#allocation2] sm:$0x3] }
 0x272   : > { %550 = vadd.xlane.f32.xlu0 %v549_v60 }
 0x276   : > { %574 = vadd.xlane.f32.xlu0 %v573_v62 }
 0x2f1   : > { %v502_v2 = vpop.xlane.xlu1 %501 }
 0x2f2   : > { %v503_v3 = vrot.slane %v502_v2, 4 }
 0x2f4   : > { %v504_v4 = vadd.f32 %v503_v3, %v502_v2 }
 0x2f5   : > { %v520_v5 = vpop.xlane.xlu0 %519 }
 0x2f6   : > { %v521_v6 = vrot.slane %v520_v5, 4  ;;  %v505_v7 = vrot.slane %v504_v4, 2 }
 0x2f8   : > { %v522_v9 = vadd.f32 %v521_v6, %v520_v5  ;;  %v506_v10 = vadd.f32 %v505_v7, %v504_v4  ;;  %v677_v6 = vld [vmem:[#allocation2 + $0x14] sm:$0x3] }
 0x2fa   : > { %v507_v11 = vrot.slane %v506_v10, 1  ;;  %v523_v12 = vrot.slane %v522_v9, 2 }
 0x2fb   : > { %v536_v13 = vpop.xlane.xlu0 %535  ;;  %v563_v15 = vpop.xlane.xlu1 %562 }
 0x2fc   : > { %v537_v16 = vrot.slane %v536_v13, 4  ;;  %v564_v17 = vrot.slane %v563_v15, 4  ;;  %v508_v18 = vadd.f32 %v507_v11, %v506_v10  ;;  %v524_v21 = vadd.f32 %v523_v12, %v522_v9 }
 0x2fd   : > { %v688_v10 = vsel %vm687_vm10, %v3149_v8, 0.0 }
 0x2fe   : > { %v538_v22 = vadd.f32 %v537_v16, %v536_v13  ;;  %v565_v23 = vadd.f32 %v564_v17, %v563_v15  ;;  %2633 = vpush %v508_v18  ;;  %v525_v24 = vrot.slane %v524_v21, 1  ;;  %v694_v13 = vsel %vm687_vm10, %v3156_v28, 0.0 }
 0x2ff   : > { %v551_v27 = vpop.xlane.xlu0 %550 }
 0x300   : > { %v552_v29 = vrot.slane %v551_v27, 4  ;;  %v526_v30 = vadd.f32 %v525_v24, %v524_v21  ;;  %v539_v31 = vrot.slane %v538_v22, 2  ;;  %v566_v32 = vrot.slane %v565_v23, 2 }
 0x301   : > { %v691_v21 = vsel %vm687_vm10, %v3152_v25, 0.0 }
 0x302   : > { %v553_v33 = vadd.f32 %v552_v29, %v551_v27  ;;  %2635 = vpush %v526_v30  ;;  %v540_v34 = vadd.f32 %v539_v31, %v538_v22  ;;  %v567_v36 = vadd.f32 %v566_v32, %v565_v23 }
 0x303   : > { %v575_v35 = vpop.xlane.xlu0 %574 }
 0x304   : > { %v576_v37 = vrot.slane %v575_v35, 4  ;;  %v541_v38 = vrot.slane %v540_v34, 1  ;;  %v554_v39 = vrot.slane %v553_v33, 2  ;;  %v568_v43 = vrot.slane %v567_v36, 1 }
 0x306   : > { %v577_v40 = vadd.f32 %v576_v37, %v575_v35  ;;  %v542_v41 = vadd.f32 %v541_v38, %v540_v34  ;;  %v555_v42 = vadd.f32 %v554_v39, %v553_v33  ;;  %v569_v48 = vadd.f32 %v568_v43, %v567_v36 }
 0x308   : > { %2637 = vpush %v542_v41  ;;  %v556_v44 = vrot.slane %v555_v42, 1  ;;  %v578_v45 = vrot.slane %v577_v40, 2 }
 0x30a   : > { %v557_v46 = vadd.f32 %v556_v44, %v555_v42  ;;  %v579_v47 = vadd.f32 %v578_v45, %v577_v40 }
 0x30c   : > { %2639 = vpush %v557_v46  ;;  %v580_v49 = vrot.slane %v579_v47, 1 }
 0x30d   : > { %2641 = vpush %v569_v48 }
 0x30e   : > { %v581_v50 = vadd.f32 %v580_v49, %v579_v47 }
 0x310   : > { %2643 = vpush %v581_v50 }
 0x32f   : > { %s2634_s6 = spop %2633 }
 0x333   : > { %s2636_s5 = spop %2635 }
 0x334   : > { %p583_p4 = scmp.lt.f32.partialorder %s2636_s5, %s2634_s6 }
 0x336   : > { %s3876_s5 = smov (!%p583_p4, %s2636_s5), %s2634_s6 }
 0x337   : > { %s585_s26 = scalar_select %p583_p4, 1, 0 }
 0x339   : > { %s2638_s7 = spop %2637 }
 0x33a   : > { %p586_p6 = scmp.lt.f32.partialorder %s2638_s7, %s3876_s5 }
 0x33c   : > { %s3878_s7 = smov (!%p586_p6, %s2638_s7), %s3876_s5  ;;  %s3880_s26 = smov (%p586_p6, %s585_s26), 2 }
 0x33d   : > { %s2640_s8 = spop %2639  ;;  %s2941_s5 = smov 64  }
 0x33e   : > { %p589_p9 = scmp.lt.f32.partialorder %s2640_s8, %s3878_s7  ;;  %s2642_s25 = spop %2641 }
 0x340   : > { %s3882_s8 = smov (!%p589_p9, %s2640_s8), %s3878_s7  ;;  %s3884_s26 = smov (%p589_p9, %s3880_s26), 3 }
 0x341   : > { %p592_p13 = scmp.lt.f32.partialorder %s2642_s25, %s3882_s8  ;;  %s2644_s11 = spop %2643 }
 0x343   : > { %s3886_s25 = smov (!%p592_p13, %s2642_s25), %s3882_s8  ;;  %s3888_s26 = smov (%p592_p13, %s3884_s26), 4 }
 0x344   : > { %p595_p3 = scmp.lt.f32.partialorder %s2644_s11, %s3886_s25 }
 0x346   : > { %s3890_s26 = smov (%p595_p3, %s3888_s26), 5 }
 0x347   : > { %p597_p7 = scmp.eq.s32.totalorder %s3890_s26, 2  ;;  %p599_p10 = scmp.eq.s32.totalorder %s3890_s26, 3 }
 0x348   : > { %p601_p8 = scmp.eq.s32.totalorder %s3890_s26, 4  ;;  %p632_p0 = scmp.eq.s32.totalorder %s3890_s26, 1 }
 0x349   : > { %s598_s13 = scalar_select %p597_p7, 1, 0 }
 0x34a   : > { %s633_s14 = scalar_select %p632_p0, 2, 1 }
 0x34b   : > { %s660_s20 = scalar_select %p632_p0, 1, 2 }
 0x34c   : > { %s3892_s13 = smov (%p599_p10, %s598_s13), 1  ;;  %p603_p5 = scmp.eq.s32.totalorder %s3890_s26, 5 }
 0x34d   : > { %s3894_s13 = smov (%p601_p8, %s3892_s13), 2  ;;  %s3896_s14 = smov (%p597_p7, %s633_s14), 0 }
 0x34e   : > { %s3898_s13 = smov (%p603_p5, %s3894_s13), 2  ;;  %s3900_s14 = smov (%p599_p10, %s3896_s14), 2 }
 0x34f   : > { %p605_p11 = scmp.eq.s32.totalorder %s3898_s13, 1  ;;  %p610_p2 = scmp.eq.s32.totalorder %s3898_s13, 2 }
 0x350   : > { %s3902_s14 = smov (%p601_p8, %s3900_s14), 0  ;;  %s3906_s20 = smov (%p597_p7, %s660_s20), 2 }
 0x351   : > { %s606_s23 = scalar_select %p605_p11, 1, 0 }
 0x352   : > { %s611_s21 = scalar_select %p610_p2, 1, 0 }
 0x353   : > { %v607_v51 = vstv %s606_s23  ;;  %s3904_s14 = smov (%p603_p5, %s3902_s14), 1  ;;  %s3908_s20 = smov (%p599_p10, %s3906_s20), 0 }
 0x354   : > { %vm608_vm4 = vcmp.eq.s32.totalorder %v607_v51, 1  ;;  %v612_v53 = vstv %s611_s21  ;;  %p638_p1 = scmp.eq.s32.totalorder %s3904_s14, 1  ;;  %p643_p4 = scmp.eq.s32.totalorder %s3904_s14, 2 }
 0x355   : > { %v609_v54 = vsel %vm608_vm4, %v3152_v25, %v3149_v8  ;;  %vm613_vm5 = vcmp.eq.s32.totalorder %v612_v53, 1  ;;  %s3910_s20 = smov (%p601_p8, %s3908_s20), 1 }
 0x356   : > { %v614_v55 = vsel %vm613_vm5, %v3156_v28, %v609_v54  ;;  %s639_s10 = scalar_select %p638_p1, 1, 0 }
 0x357   : > { %v621_v57 = vmul.f32 %v3199_v52, %v614_v55  ;;  %s644_s6 = scalar_select %p643_p4, 1, 0 }
 0x358   : > { %v640_v59 = vstv %s639_s10  ;;  %s3912_s20 = smov (%p603_p5, %s3910_s20), 0 }
 0x359   : > { %626 = vrot.lane.b32.xlu1 %v621_v57, %s2941_s5  ;;  %v623_v58 = vadd.f32 %v622_v56, %v621_v57  ;;  %vm641_vm6 = vcmp.eq.s32.totalorder %v640_v59, 1  ;;  %v645_v60 = vstv %s644_s6  ;;  %p665_p6 = scmp.eq.s32.totalorder %s3912_s20, 1  ;;  %p670_p9 = scmp.eq.s32.totalorder %s3912_s20, 2 }
 0x35a   : > { %v642_v61 = vsel %vm641_vm6, %v3152_v25, %v3149_v8  ;;  %vm646_vm7 = vcmp.eq.s32.totalorder %v645_v60, 1 }
 0x35b   : > { %624 = vst [vmem:[#allocation2] sm:$0x3] %v623_v58  ;;  %v647_v62 = vsel %vm646_vm7, %v3156_v28, %v642_v61  ;;  %s666_s7 = scalar_select %p665_p6, 1, 0 }
 0x35c   : > { %v648_v0 = vmul.f32 %v3199_v52, %v647_v62  ;;  %s671_s8 = scalar_select %p670_p9, 1, 0 }
 0x35d   : > { %v667_v2 = vstv %s666_s7 }
 0x35e   : > { %654 = vrot.lane.b32.xlu0 %v648_v0, %s2941_s5  ;;  %v651_v1 = vadd.f32 %v650_v63, %v648_v0  ;;  %vm668_vm8 = vcmp.eq.s32.totalorder %v667_v2, 1  ;;  %v672_v3 = vstv %s671_s8 }
 0x35f   : > { %v669_v4 = vsel %vm668_vm8, %v3152_v25, %v3149_v8  ;;  %vm673_vm9 = vcmp.eq.s32.totalorder %v672_v3, 1 }
 0x360   : > { %652 = vst [vmem:[#allocation2 + $0xa] sm:$0x3] %v651_v1  ;;  %v674_v5 = vsel %vm673_vm9, %v3156_v28, %v669_v4 }
 0x361   : > { %v675_v7 = vmul.f32 %v3199_v52, %v674_v5 }
 0x363   : > { %681 = vrot.lane.b32.xlu1 %v675_v7, %s2941_s5  ;;  %v678_v9 = vadd.f32 %v677_v6, %v675_v7 }
 0x365   : > { %679 = vst [vmem:[#allocation2 + $0x14] sm:$0x3] %v678_v9 }
 0x387   : > { %689 = vadd.xlane.f32.xlu1 %v688_v10 }
 0x3cb   : > { %v627_v11 = vpop.permute.xlu1 %626 }
 0x3cc   : > { %v629_v12 = vsel %vm244_vm2, %v627_v11, 0.0 }
 0x3cd   : > { %630 = vadd.xlane.f32.xlu1 %v629_v12 }
 0x3d0   : > { %v655_v15 = vpop.permute.xlu0 %654 }
 0x3d1   : > { %695 = vadd.xlane.f32.xlu1 %v694_v13  ;;  %v657_v16 = vsel %vm244_vm2, %v655_v15, 0.0 }
 0x3d2   : > { %658 = vadd.xlane.f32.xlu0 %v657_v16 }
 0x3d5   : > { %v682_v17 = vpop.permute.xlu1 %681 }
 0x3d6   : > { %v684_v18 = vsel %vm244_vm2, %v682_v17, 0.0 }
 0x3d7   : > { %685 = vadd.xlane.f32.xlu0 %v684_v18 }
 0x3db   : > { %692 = vadd.xlane.f32.xlu0 %v691_v21 }
 0x414   : > { %v690_v22 = vpop.xlane.xlu1 %689 }
 0x45a   : > { %v631_v23 = vpop.xlane.xlu1 %630 }
 0x45b   : > { %v698_v30 = vrot.slane %v631_v23, 6 }
 0x45d   : > { %v700_v34 = vmul.f32 %v698_v30, %v690_v22 }
 0x45e   : > { %v696_v29 = vpop.xlane.xlu1 %695 }
 0x45f   : > { %v659_v24 = vpop.xlane.xlu0 %658  ;;  %v774_v41 = vmul.f32 %v698_v30, %v696_v29 }
 0x460   : > { %v702_v27 = vrot.slane %v659_v24, 6 }
 0x462   : > { %v724_v32 = vmul.f32 %v702_v27, %v696_v29  ;;  %v742_v35 = vmul.f32 %v702_v27, %v690_v22 }
 0x464   : > { %v686_v31 = vpop.xlane.xlu0 %685  ;;  %v725_v39 = vadd.f32 %v724_v32, %v700_v34  ;;  %v775_v54 = vadd.f32 %v774_v41, %v742_v35 }
 0x465   : > { %v707_v33 = vrot.slane %v686_v31, 6 }
 0x467   : > { %v709_v42 = vmul.f32 %v707_v33, %v696_v29  ;;  %v759_v43 = vmul.f32 %v707_v33, %v690_v22 }
 0x468   : > { %v693_v36 = vpop.xlane.xlu0 %692 }
 0x469   : > { %v704_v37 = vmul.f32 %v702_v27, %v693_v36  ;;  %v741_v38 = vmul.f32 %v698_v30, %v693_v36  ;;  %v726_v40 = vmul.f32 %v707_v33, %v693_v36 }
 0x46b   : > { %v727_v44 = vadd.f32 %v726_v40, %v725_v39  ;;  %v705_v45 = vadd.f32 %v704_v37, %v700_v34  ;;  %v758_v46 = vadd.f32 %v741_v38, %v724_v32  ;;  %v743_v47 = vadd.f32 %v742_v35, %v741_v38 }
 0x46c   : > { %v790_v48 = vadd.f32 %v774_v41, %v704_v37  ;;  %v776_v61 = vadd.f32 %v775_v54, %v726_v40 }
 0x46d   : > { %v729_v49 = vrot.slane %v727_v44, 2  ;;  %v710_v50 = vadd.f32 %v709_v42, %v705_v45  ;;  %v760_v51 = vadd.f32 %v759_v43, %v758_v46  ;;  %v744_v53 = vadd.f32 %v743_v47, %v709_v42 }
 0x46e   : > { %v791_v58 = vadd.f32 %v790_v48, %v759_v43  ;;  %v778_v1 = vrot.slane %v776_v61, 2 }
 0x46f   : > { %v731_v55 = vsel %vm499_vm3, %v729_v49, 0.0  ;;  %v712_v56 = vrot.slane %v710_v50, 2  ;;  %v762_v57 = vrot.slane %v760_v51, 2  ;;  %v746_v60 = vrot.slane %v744_v53, 2 }
 0x470   : > { %732 = vadd.xlane.f32.xlu1 %v731_v55  ;;  %v793_v63 = vrot.slane %v791_v58, 2  ;;  %v780_v3 = vsel %vm499_vm3, %v778_v1, 0.0 }
 0x471   : > { %v714_v59 = vsel %vm499_vm3, %v712_v56, 0.0  ;;  %v764_v62 = vsel %vm499_vm3, %v762_v57, 0.0  ;;  %v748_v0 = vsel %vm499_vm3, %v746_v60, 0.0 }
 0x472   : > { %715 = vadd.xlane.f32.xlu0 %v714_v59  ;;  %v795_v2 = vsel %vm499_vm3, %v793_v63, 0.0 }
 0x474   : > { %765 = vadd.xlane.f32.xlu1 %v764_v62 }
 0x476   : > { %749 = vadd.xlane.f32.xlu0 %v748_v0 }
 0x478   : > { %796 = vadd.xlane.f32.xlu1 %v795_v2 }
 0x47a   : > { %781 = vadd.xlane.f32.xlu0 %v780_v3 }
 0x4fd   : > { %v733_v4 = vpop.xlane.xlu1 %732 }
 0x4fe   : > { %v734_v5 = vrot.slane %v733_v4, 4 }
 0x4ff   : > { %v716_v6 = vpop.xlane.xlu0 %715 }
 0x500   : > { %v735_v7 = vadd.f32 %v734_v5, %v733_v4  ;;  %v717_v9 = vrot.slane %v716_v6, 4  ;;  %v944_v5 = vsel %vm943_vm1, %v3149_v8, 0.0 }
 0x501   : > { %v766_v10 = vpop.xlane.xlu1 %765 }
 0x502   : > { %v718_v11 = vadd.f32 %v717_v9, %v716_v6  ;;  %v767_v12 = vrot.slane %v766_v10, 4  ;;  %v736_v13 = vrot.slane %v735_v7, 2  ;;  %v947_v9 = vsel %vm943_vm1, %v3152_v25, 0.0 }
 0x503   : > { %v750_v15 = vpop.xlane.xlu0 %749 }
 0x504   : > { %v768_v16 = vadd.f32 %v767_v12, %v766_v10  ;;  %v751_v17 = vrot.slane %v750_v15, 4  ;;  %v719_v18 = vrot.slane %v718_v11, 2  ;;  %v737_v21 = vadd.f32 %v736_v13, %v735_v7 }
 0x505   : > { %v797_v22 = vpop.xlane.xlu1 %796 }
 0x506   : > { %v752_v23 = vadd.f32 %v751_v17, %v750_v15  ;;  %v798_v24 = vrot.slane %v797_v22, 4  ;;  %v720_v27 = vadd.f32 %v719_v18, %v718_v11  ;;  %v738_v30 = vrot.slane %v737_v21, 1 }
 0x507   : > { %v782_v29 = vpop.xlane.xlu0 %781  ;;  %v769_v31 = vrot.slane %v768_v16, 2  ;;  %v950_v15 = vsel %vm943_vm1, %v3156_v28, 0.0 }
 0x508   : > { %v799_v32 = vadd.f32 %v798_v24, %v797_v22  ;;  %v783_v33 = vrot.slane %v782_v29, 4  ;;  %v721_v34 = vrot.slane %v720_v27, 1  ;;  %v753_v35 = vrot.slane %v752_v23, 2 }
 0x509   : > { %v770_v36 = vadd.f32 %v769_v31, %v768_v16  ;;  %v739_v40 = vadd.f32 %v738_v30, %v737_v21 }
 0x50a   : > { %v784_v37 = vadd.f32 %v783_v33, %v782_v29  ;;  %v722_v38 = vadd.f32 %v721_v34, %v720_v27  ;;  %v800_v39 = vrot.slane %v799_v32, 2  ;;  %v754_v41 = vadd.f32 %v753_v35, %v752_v23 }
 0x50b   : > { %v771_v42 = vrot.slane %v770_v36, 1 }
 0x50c   : > { %2645 = vpush %v722_v38  ;;  %v785_v43 = vrot.slane %v784_v37, 2  ;;  %v801_v44 = vadd.f32 %v800_v39, %v799_v32  ;;  %v755_v45 = vrot.slane %v754_v41, 1 }
 0x50d   : > { %2647 = vpush %v739_v40  ;;  %v772_v49 = vadd.f32 %v771_v42, %v770_v36 }
 0x50e   : > { %v786_v46 = vadd.f32 %v785_v43, %v784_v37  ;;  %v756_v47 = vadd.f32 %v755_v45, %v754_v41  ;;  %v802_v48 = vrot.slane %v801_v44, 1 }
 0x510   : > { %v787_v50 = vrot.slane %v786_v46, 1  ;;  %2649 = vpush %v756_v47  ;;  %v803_v53 = vadd.f32 %v802_v48, %v801_v44 }
 0x511   : > { %2651 = vpush %v772_v49 }
 0x512   : > { %v788_v51 = vadd.f32 %v787_v50, %v786_v46 }
 0x514   : > { %2653 = vpush %v788_v51 }
 0x515   : > { %2655 = vpush %v803_v53 }
 0x53d   : > { %s2646_s26 = spop %2645 }
 0x53e   : > { %s2648_s25 = spop %2647 }
 0x53f   : > { %p805_p13 = scmp.lt.f32.partialorder %s2648_s25, %s2646_s26 }
 0x541   : > { %s3914_s25 = smov (!%p805_p13, %s2648_s25), %s2646_s26  ;;  %s2650_s11 = spop %2649 }
 0x542   : > { %p808_p3 = scmp.lt.f32.partialorder %s2650_s11, %s3914_s25  ;;  %s2652_s14 = spop %2651 }
 0x543   : > { %s807_s13 = scalar_select %p805_p13, 1, 0 }
 0x544   : > { %s3916_s11 = smov (!%p808_p3, %s2650_s11), %s3914_s25 }
 0x545   : > { %p811_p7 = scmp.lt.f32.partialorder %s2652_s14, %s3916_s11  ;;  %s2654_s20 = spop %2653 }
 0x546   : > { %s3920_s13 = smov (%p808_p3, %s807_s13), 2  ;;  %s2656_s23 = spop %2655 }
 0x547   : > { %s3918_s14 = smov (!%p811_p7, %s2652_s14), %s3916_s11  ;;  %s3922_s13 = smov (%p811_p7, %s3920_s13), 3 }
 0x548   : > { %p814_p10 = scmp.lt.f32.partialorder %s2654_s20, %s3918_s14 }
 0x54a   : > { %s3924_s20 = smov (!%p814_p10, %s2654_s20), %s3918_s14  ;;  %s3926_s13 = smov (%p814_p10, %s3922_s13), 4 }
 0x54b   : > { %p817_p8 = scmp.lt.f32.partialorder %s2656_s23, %s3924_s20 }
 0x54d   : > { %s3928_s13 = smov (%p817_p8, %s3926_s13), 5 }
 0x54e   : > { %p819_p0 = scmp.eq.s32.totalorder %s3928_s13, 2  ;;  %p821_p5 = scmp.eq.s32.totalorder %s3928_s13, 3 }
 0x54f   : > { %p823_p11 = scmp.eq.s32.totalorder %s3928_s13, 4  ;;  %p864_p2 = scmp.eq.s32.totalorder %s3928_s13, 1 }
 0x550   : > { %s820_s21 = scalar_select %p819_p0, 1, 0 }
 0x551   : > { %s865_s28 = scalar_select %p864_p2, 2, 1 }
 0x552   : > { %s904_s29 = scalar_select %p864_p2, 1, 2 }
 0x553   : > { %s3930_s21 = smov (%p821_p5, %s820_s21), 1  ;;  %p825_p1 = scmp.eq.s32.totalorder %s3928_s13, 5 }
 0x554   : > { %s3932_s21 = smov (%p823_p11, %s3930_s21), 2  ;;  %s3934_s28 = smov (%p819_p0, %s865_s28), 0 }
 0x555   : > { %s3936_s21 = smov (%p825_p1, %s3932_s21), 2  ;;  %s3938_s28 = smov (%p821_p5, %s3934_s28), 2 }
 0x556   : > { %p827_p4 = scmp.eq.s32.totalorder %s3936_s21, 1  ;;  %p832_p6 = scmp.eq.s32.totalorder %s3936_s21, 2 }
 0x557   : > { %s3940_s28 = smov (%p823_p11, %s3938_s28), 0  ;;  %s3944_s29 = smov (%p819_p0, %s904_s29), 2 }
 0x558   : > { %s828_s10 = scalar_select %p827_p4, 1, 0 }
 0x559   : > { %s833_s6 = scalar_select %p832_p6, 1, 0 }
 0x55a   : > { %v829_v54 = vstv %s828_s10  ;;  %s3942_s28 = smov (%p825_p1, %s3940_s28), 1  ;;  %s3946_s29 = smov (%p821_p5, %s3944_s29), 0 }
 0x55b   : > { %vm830_vm11 = vcmp.eq.s32.totalorder %v829_v54, 1  ;;  %v834_v55 = vstv %s833_s6  ;;  %p870_p9 = scmp.eq.s32.totalorder %s3942_s28, 1  ;;  %p875_p13 = scmp.eq.s32.totalorder %s3942_s28, 2 }
 0x55c   : > { %v831_v56 = vsel %vm830_vm11, %v3152_v25, %v3149_v8  ;;  %vm835_vm12 = vcmp.eq.s32.totalorder %v834_v55, 1  ;;  %s3948_s29 = smov (%p823_p11, %s3946_s29), 1  ;;  %vm1184_vm11 = vcmask 523270  }
 0x55d   : > { %v836_v57 = vsel %vm835_vm12, %v3156_v28, %v831_v56  ;;  %s871_s7 = scalar_select %p870_p9, 1, 0 }
 0x55e   : > { %v3270_v58 = vmul.f32 %v3199_v52, %v836_v57  ;;  %s876_s8 = scalar_select %p875_p13, 1, 0 }
 0x55f   : > { %v872_v59 = vstv %s871_s7  ;;  %s3950_s29 = smov (%p825_p1, %s3948_s29), 0 }
 0x560   : > { %858 = vrot.lane.b32.xlu0 %v3270_v58, %s2941_s5  ;;  %vm873_vm13 = vcmp.eq.s32.totalorder %v872_v59, 1  ;;  %v877_v60 = vstv %s876_s8  ;;  %p909_p3 = scmp.eq.s32.totalorder %s3950_s29, 1  ;;  %p914_p7 = scmp.eq.s32.totalorder %s3950_s29, 2 }
 0x561   : > { %v874_v61 = vsel %vm873_vm13, %v3152_v25, %v3149_v8  ;;  %vm878_vm14 = vcmp.eq.s32.totalorder %v877_v60, 1 }
 0x562   : > { %v879_v62 = vsel %vm878_vm14, %v3156_v28, %v874_v61  ;;  %s910_s26 = scalar_select %p909_p3, 1, 0 }
 0x563   : > { %v3282_v63 = vmul.f32 %v3199_v52, %v879_v62  ;;  %s915_s25 = scalar_select %p914_p7, 1, 0 }
 0x564   : > { %v911_v0 = vstv %s910_s26 }
 0x565   : > { %898 = vrot.lane.b32.xlu1 %v3282_v63, %s2941_s5  ;;  %vm912_vm15 = vcmp.eq.s32.totalorder %v911_v0, 1  ;;  %v916_v1 = vstv %s915_s25 }
 0x566   : > { %v913_v2 = vsel %vm912_vm15, %v3152_v25, %v3149_v8  ;;  %vm917_vm0 = vcmp.eq.s32.totalorder %v916_v1, 1 }
 0x567   : > { %v918_v3 = vsel %vm917_vm0, %v3156_v28, %v913_v2 }
 0x568   : > { %v3290_v4 = vmul.f32 %v3199_v52, %v918_v3 }
 0x56a   : > { %937 = vrot.lane.b32.xlu1 %v3290_v4, %s2941_s5 }
 0x57f   : > { %945 = vadd.xlane.f32.xlu0 %v944_v5 }
 0x5d2   : > { %v859_v6 = vpop.permute.xlu0 %858 }
 0x5d3   : > { %v861_v7 = vsel %vm687_vm10, %v859_v6, 0.0 }
 0x5d4   : > { %862 = vadd.xlane.f32.xlu1 %v861_v7 }
 0x5d7   : > { %v899_v10 = vpop.permute.xlu1 %898 }
 0x5d8   : > { %948 = vadd.xlane.f32.xlu1 %v947_v9  ;;  %v901_v11 = vsel %vm687_vm10, %v899_v10, 0.0 }
 0x5d9   : > { %902 = vadd.xlane.f32.xlu0 %v901_v11 }
 0x5dc   : > { %v938_v12 = vpop.permute.xlu1 %937 }
 0x5dd   : > { %v940_v13 = vsel %vm687_vm10, %v938_v12, 0.0 }
 0x5de   : > { %941 = vadd.xlane.f32.xlu0 %v940_v13 }
 0x5e2   : > { %951 = vadd.xlane.f32.xlu0 %v950_v15 }
 0x60c   : > { %v946_v16 = vpop.xlane.xlu0 %945 }
 0x661   : > { %v863_v17 = vpop.xlane.xlu1 %862 }
 0x662   : > { %v954_v23 = vrot.slane %v863_v17, 6 }
 0x664   : > { %v956_v31 = vmul.f32 %v954_v23, %v946_v16 }
 0x665   : > { %v949_v22 = vpop.xlane.xlu1 %948 }
 0x666   : > { %v903_v18 = vpop.xlane.xlu0 %902  ;;  %v997_v30 = vmul.f32 %v954_v23, %v949_v22 }
 0x667   : > { %v958_v21 = vrot.slane %v903_v18, 6 }
 0x669   : > { %v960_v24 = vmul.f32 %v958_v21, %v949_v22  ;;  %v998_v29 = vmul.f32 %v958_v21, %v946_v16 }
 0x66b   : > { %v942_v27 = vpop.xlane.xlu0 %941  ;;  %v961_v34 = vadd.f32 %v960_v24, %v956_v31  ;;  %v999_v38 = vadd.f32 %v998_v29, %v997_v30 }
 0x66c   : > { %v963_v32 = vrot.slane %v942_v27, 6 }
 0x66e   : > { %v982_v39 = vmul.f32 %v963_v32, %v949_v22  ;;  %v1015_v40 = vmul.f32 %v963_v32, %v946_v16 }
 0x66f   : > { %v952_v33 = vpop.xlane.xlu0 %951 }
 0x670   : > { %v965_v35 = vmul.f32 %v963_v32, %v952_v33  ;;  %v980_v36 = vmul.f32 %v958_v21, %v952_v33  ;;  %v1030_v37 = vmul.f32 %v954_v23, %v952_v33 }
 0x672   : > { %v966_v41 = vadd.f32 %v965_v35, %v961_v34  ;;  %v981_v42 = vadd.f32 %v980_v36, %v956_v31  ;;  %v1000_v43 = vadd.f32 %v999_v38, %v965_v35  ;;  %v1014_v44 = vadd.f32 %v997_v30, %v980_v36 }
 0x673   : > { %v1031_v45 = vadd.f32 %v1030_v37, %v998_v29  ;;  %v1046_v49 = vadd.f32 %v1030_v37, %v960_v24 }
 0x674   : > { %v968_v46 = vrot.slane %v966_v41, 4  ;;  %v983_v47 = vadd.f32 %v982_v39, %v981_v42  ;;  %v1016_v48 = vadd.f32 %v1015_v40, %v1014_v44  ;;  %v1002_v53 = vrot.slane %v1000_v43, 4 }
 0x675   : > { %v1032_v54 = vadd.f32 %v1031_v45, %v982_v39  ;;  %v1047_v57 = vadd.f32 %v1046_v49, %v1015_v40 }
 0x676   : > { %v970_v50 = vsel %vm499_vm3, %v968_v46, 0.0  ;;  %v985_v51 = vrot.slane %v983_v47, 4  ;;  %v1018_v56 = vrot.slane %v1016_v48, 4  ;;  %v1004_v59 = vsel %vm499_vm3, %v1002_v53, 0.0 }
 0x677   : > { %971 = vadd.xlane.f32.xlu1 %v970_v50  ;;  %v1034_v60 = vrot.slane %v1032_v54, 4  ;;  %v1049_v62 = vrot.slane %v1047_v57, 4 }
 0x678   : > { %v987_v55 = vsel %vm499_vm3, %v985_v51, 0.0  ;;  %v1020_v61 = vsel %vm499_vm3, %v1018_v56, 0.0 }
 0x679   : > { %988 = vadd.xlane.f32.xlu0 %v987_v55  ;;  %v1036_v0 = vsel %vm499_vm3, %v1034_v60, 0.0  ;;  %v1051_v1 = vsel %vm499_vm3, %v1049_v62, 0.0 }
 0x67b   : > { %1005 = vadd.xlane.f32.xlu1 %v1004_v59 }
 0x67d   : > { %1021 = vadd.xlane.f32.xlu0 %v1020_v61 }
 0x67f   : > { %1037 = vadd.xlane.f32.xlu1 %v1036_v0 }
 0x681   : > { %1052 = vadd.xlane.f32.xlu0 %v1051_v1 }
 0x704   : > { %v972_v2 = vpop.xlane.xlu1 %971 }
 0x705   : > { %v973_v3 = vrot.slane %v972_v2, 4 }
 0x706   : > { %v989_v5 = vpop.xlane.xlu0 %988 }
 0x707   : > { %v974_v6 = vadd.f32 %v973_v3, %v972_v2  ;;  %v990_v7 = vrot.slane %v989_v5, 4 }
 0x708   : > { %v1006_v9 = vpop.xlane.xlu1 %1005 }
 0x709   : > { %v991_v10 = vadd.f32 %v990_v7, %v989_v5  ;;  %v1007_v11 = vrot.slane %v1006_v9, 4  ;;  %v975_v12 = vrot.slane %v974_v6, 2  ;;  %v1185_v7 = vsel %vm1184_vm11, %v3149_v8, 0.0 }
 0x70a   : > { %v1022_v13 = vpop.xlane.xlu0 %1021 }
 0x70b   : > { %v992_v15 = vrot.slane %v991_v10, 2  ;;  %v1008_v16 = vadd.f32 %v1007_v11, %v1006_v9  ;;  %v1023_v17 = vrot.slane %v1022_v13, 4  ;;  %v976_v18 = vadd.f32 %v975_v12, %v974_v6 }
 0x70c   : > { %v1038_v21 = vpop.xlane.xlu1 %1037  ;;  %v1191_v11 = vsel %vm1184_vm11, %v3156_v28, 0.0 }
 0x70d   : > { %v1024_v22 = vadd.f32 %v1023_v17, %v1022_v13  ;;  %v1039_v23 = vrot.slane %v1038_v21, 4  ;;  %v977_v24 = vrot.slane %v976_v18, 1  ;;  %v993_v27 = vadd.f32 %v992_v15, %v991_v10 }
 0x70e   : > { %v1053_v29 = vpop.xlane.xlu0 %1052  ;;  %v1009_v30 = vrot.slane %v1008_v16, 2 }
 0x70f   : > { %v1025_v31 = vrot.slane %v1024_v22, 2  ;;  %v1040_v32 = vadd.f32 %v1039_v23, %v1038_v21  ;;  %v1054_v33 = vrot.slane %v1053_v29, 4  ;;  %v978_v34 = vadd.f32 %v977_v24, %v976_v18 }
 0x710   : > { %v994_v35 = vrot.slane %v993_v27, 1  ;;  %v1010_v36 = vadd.f32 %v1009_v30, %v1008_v16  ;;  %v1188_v16 = vsel %vm1184_vm11, %v3152_v25, 0.0 }
 0x711   : > { %v1055_v37 = vadd.f32 %v1054_v33, %v1053_v29  ;;  %2657 = vpush %v978_v34  ;;  %v1026_v38 = vadd.f32 %v1025_v31, %v1024_v22  ;;  %v1041_v39 = vrot.slane %v1040_v32, 2 }
 0x712   : > { %v995_v40 = vadd.f32 %v994_v35, %v993_v27  ;;  %v1011_v41 = vrot.slane %v1010_v36, 1 }
 0x713   : > { %v1056_v42 = vrot.slane %v1055_v37, 2  ;;  %v1027_v43 = vrot.slane %v1026_v38, 1  ;;  %v1042_v44 = vadd.f32 %v1041_v39, %v1040_v32 }
 0x714   : > { %2659 = vpush %v995_v40  ;;  %v1012_v45 = vadd.f32 %v1011_v41, %v1010_v36 }
 0x715   : > { %v1028_v46 = vadd.f32 %v1027_v43, %v1026_v38  ;;  %v1043_v47 = vrot.slane %v1042_v44, 1  ;;  %v1057_v48 = vadd.f32 %v1056_v42, %v1055_v37 }
 0x716   : > { %2661 = vpush %v1012_v45 }
 0x717   : > { %2663 = vpush %v1028_v46  ;;  %v1044_v49 = vadd.f32 %v1043_v47, %v1042_v44  ;;  %v1058_v50 = vrot.slane %v1057_v48, 1 }
 0x719   : > { %2665 = vpush %v1044_v49  ;;  %v1059_v51 = vadd.f32 %v1058_v50, %v1057_v48 }
 0x71b   : > { %2667 = vpush %v1059_v51 }
 0x742   : > { %s2658_s11 = spop %2657 }
 0x745   : > { %s2660_s13 = spop %2659 }
 0x746   : > { %p1061_p10 = scmp.lt.f32.partialorder %s2660_s13, %s2658_s11 }
 0x747   : > { %s2662_s14 = spop %2661 }
 0x748   : > { %s3952_s13 = smov (!%p1061_p10, %s2660_s13), %s2658_s11  ;;  %s2664_s23 = spop %2663 }
 0x749   : > { %p1064_p8 = scmp.lt.f32.partialorder %s2662_s14, %s3952_s13 }
 0x74a   : > { %s1063_s20 = scalar_select %p1061_p10, 1, 0 }
 0x74b   : > { %s3954_s14 = smov (!%p1064_p8, %s2662_s14), %s3952_s13  ;;  %s2666_s21 = spop %2665 }
 0x74c   : > { %p1067_p0 = scmp.lt.f32.partialorder %s2664_s23, %s3954_s14  ;;  %s3958_s20 = smov (%p1064_p8, %s1063_s20), 2 }
 0x74d   : > { %s2668_s28 = spop %2667 }
 0x74e   : > { %s3956_s23 = smov (!%p1067_p0, %s2664_s23), %s3954_s14  ;;  %s3960_s20 = smov (%p1067_p0, %s3958_s20), 3 }
 0x74f   : > { %p1070_p5 = scmp.lt.f32.partialorder %s2666_s21, %s3956_s23 }
 0x751   : > { %s3962_s21 = smov (!%p1070_p5, %s2666_s21), %s3956_s23  ;;  %s3964_s20 = smov (%p1070_p5, %s3960_s20), 4 }
 0x752   : > { %p1073_p11 = scmp.lt.f32.partialorder %s2668_s28, %s3962_s21 }
 0x754   : > { %s3966_s20 = smov (%p1073_p11, %s3964_s20), 5 }
 0x755   : > { %p1075_p2 = scmp.eq.s32.totalorder %s3966_s20, 2  ;;  %p1077_p1 = scmp.eq.s32.totalorder %s3966_s20, 3 }
 0x756   : > { %p1079_p4 = scmp.eq.s32.totalorder %s3966_s20, 4  ;;  %p1113_p6 = scmp.eq.s32.totalorder %s3966_s20, 1 }
 0x757   : > { %s1076_s29 = scalar_select %p1075_p2, 1, 0 }
 0x758   : > { %s1114_s10 = scalar_select %p1113_p6, 2, 1 }
 0x759   : > { %s1149_s6 = scalar_select %p1113_p6, 1, 2 }
 0x75a   : > { %s3968_s29 = smov (%p1077_p1, %s1076_s29), 1  ;;  %p1081_p9 = scmp.eq.s32.totalorder %s3966_s20, 5 }
 0x75b   : > { %s3970_s29 = smov (%p1079_p4, %s3968_s29), 2  ;;  %s3972_s10 = smov (%p1075_p2, %s1114_s10), 0 }
 0x75c   : > { %s3974_s29 = smov (%p1081_p9, %s3970_s29), 2  ;;  %s3976_s10 = smov (%p1077_p1, %s3972_s10), 2 }
 0x75d   : > { %p1083_p13 = scmp.eq.s32.totalorder %s3974_s29, 1  ;;  %p1088_p3 = scmp.eq.s32.totalorder %s3974_s29, 2 }
 0x75e   : > { %s3978_s10 = smov (%p1079_p4, %s3976_s10), 0  ;;  %s3982_s6 = smov (%p1075_p2, %s1149_s6), 2 }
 0x75f   : > { %s1084_s7 = scalar_select %p1083_p13, 1, 0 }
 0x760   : > { %s1089_s8 = scalar_select %p1088_p3, 1, 0 }
 0x761   : > { %v1085_v53 = vstv %s1084_s7  ;;  %s3980_s10 = smov (%p1081_p9, %s3978_s10), 1  ;;  %s3984_s6 = smov (%p1077_p1, %s3982_s6), 0 }
 0x762   : > { %vm1086_vm4 = vcmp.eq.s32.totalorder %v1085_v53, 1  ;;  %v1090_v54 = vstv %s1089_s8  ;;  %p1119_p7 = scmp.eq.s32.totalorder %s3980_s10, 1  ;;  %p1124_p10 = scmp.eq.s32.totalorder %s3980_s10, 2 }
 0x763   : > { %v1087_v55 = vsel %vm1086_vm4, %v3152_v25, %v3149_v8  ;;  %vm1091_vm5 = vcmp.eq.s32.totalorder %v1090_v54, 1  ;;  %s3986_s6 = smov (%p1079_p4, %s3984_s6), 1 }
 0x764   : > { %v1092_v56 = vsel %vm1091_vm5, %v3156_v28, %v1087_v55  ;;  %s1120_s26 = scalar_select %p1119_p7, 1, 0 }
 0x765   : > { %v3340_v57 = vmul.f32 %v3199_v52, %v1092_v56  ;;  %s1125_s25 = scalar_select %p1124_p10, 1, 0 }
 0x766   : > { %v1121_v59 = vstv %s1120_s26  ;;  %s3988_s6 = smov (%p1081_p9, %s3986_s6), 0 }
 0x767   : > { %1107 = vrot.lane.b32.xlu1 %v3340_v57, %s2941_s5  ;;  %vm1122_vm6 = vcmp.eq.s32.totalorder %v1121_v59, 1  ;;  %v1126_v60 = vstv %s1125_s25  ;;  %p1154_p8 = scmp.eq.s32.totalorder %s3988_s6, 1  ;;  %p1159_p0 = scmp.eq.s32.totalorder %s3988_s6, 2 }
 0x768   : > { %v1123_v61 = vsel %vm1122_vm6, %v3152_v25, %v3149_v8  ;;  %vm1127_vm7 = vcmp.eq.s32.totalorder %v1126_v60, 1 }
 0x769   : > { %v1128_v62 = vsel %vm1127_vm7, %v3156_v28, %v1123_v61  ;;  %s1155_s11 = scalar_select %p1154_p8, 1, 0 }
 0x76a   : > { %v3352_v0 = vmul.f32 %v3199_v52, %v1128_v62  ;;  %s1160_s13 = scalar_select %p1159_p0, 1, 0 }
 0x76b   : > { %v1156_v1 = vstv %s1155_s11 }
 0x76c   : > { %1143 = vrot.lane.b32.xlu0 %v3352_v0, %s2941_s5  ;;  %vm1157_vm8 = vcmp.eq.s32.totalorder %v1156_v1, 1  ;;  %v1161_v2 = vstv %s1160_s13 }
 0x76d   : > { %v1158_v3 = vsel %vm1157_vm8, %v3152_v25, %v3149_v8  ;;  %vm1162_vm9 = vcmp.eq.s32.totalorder %v1161_v2, 1 }
 0x76e   : > { %v1163_v5 = vsel %vm1162_vm9, %v3156_v28, %v1158_v3 }
 0x76f   : > { %v3360_v6 = vmul.f32 %v3199_v52, %v1163_v5 }
 0x771   : > { %1178 = vrot.lane.b32.xlu1 %v3360_v6, %s2941_s5 }
 0x795   : > { %1186 = vadd.xlane.f32.xlu1 %v1185_v7  ;;  %v3379_v7 = vpop.f32.mrb[2].mxu0 }
 0x7d9   : > { %v1108_v9 = vpop.permute.xlu1 %1107 }
 0x7da   : > { %v1110_v10 = vsel %vm943_vm1, %v1108_v9, 0.0  ;;  %v3381_v9 = vpop.f32.mrb[3].mxu0 }
 0x7db   : > { %1111 = vadd.xlane.f32.xlu1 %v1110_v10 }
 0x7de   : > { %v1144_v12 = vpop.permute.xlu0 %1143 }
 0x7df   : > { %1192 = vadd.xlane.f32.xlu1 %v1191_v11  ;;  %v1146_v52 = vsel %vm943_vm1, %v1144_v12, 0.0 }
 0x7e0   : > { %1147 = vadd.xlane.f32.xlu0 %v1146_v52 }
 0x7e3   : > { %v1179_v13 = vpop.permute.xlu1 %1178 }
 0x7e4   : > { %v1181_v15 = vsel %vm943_vm1, %v1179_v13, 0.0 }
 0x7e5   : > { %1182 = vadd.xlane.f32.xlu0 %v1181_v15 }
 0x7e9   : > { %1189 = vadd.xlane.f32.xlu0 %v1188_v16 }
 0x822   : > { %v1187_v17 = vpop.xlane.xlu1 %1186 }
 0x868   : > { %v1112_v18 = vpop.xlane.xlu1 %1111 }
 0x869   : > { %v1195_v24 = vrot.slane %v1112_v18, 6 }
 0x86b   : > { %v1197_v31 = vmul.f32 %v1195_v24, %v1187_v17 }
 0x86c   : > { %v1193_v23 = vpop.xlane.xlu1 %1192 }
 0x86d   : > { %v1148_v21 = vpop.xlane.xlu0 %1147  ;;  %v1271_v38 = vmul.f32 %v1195_v24, %v1193_v23 }
 0x86e   : > { %v1199_v22 = vrot.slane %v1148_v21, 6 }
 0x870   : > { %v1221_v29 = vmul.f32 %v1199_v22, %v1193_v23  ;;  %v1239_v32 = vmul.f32 %v1199_v22, %v1187_v17 }
 0x872   : > { %v1183_v27 = vpop.xlane.xlu0 %1182  ;;  %v1222_v37 = vadd.f32 %v1221_v29, %v1197_v31  ;;  %v1272_v50 = vadd.f32 %v1271_v38, %v1239_v32 }
 0x873   : > { %v1204_v30 = vrot.slane %v1183_v27, 6 }
 0x875   : > { %v1206_v39 = vmul.f32 %v1204_v30, %v1193_v23  ;;  %v1256_v40 = vmul.f32 %v1204_v30, %v1187_v17 }
 0x876   : > { %v1190_v33 = vpop.xlane.xlu0 %1189 }
 0x877   : > { %v1201_v34 = vmul.f32 %v1199_v22, %v1190_v33  ;;  %v1223_v35 = vmul.f32 %v1204_v30, %v1190_v33  ;;  %v1238_v36 = vmul.f32 %v1195_v24, %v1190_v33 }
 0x879   : > { %v1224_v41 = vadd.f32 %v1223_v35, %v1222_v37  ;;  %v1202_v42 = vadd.f32 %v1201_v34, %v1197_v31  ;;  %v1255_v43 = vadd.f32 %v1238_v36, %v1221_v29  ;;  %v1240_v44 = vadd.f32 %v1239_v32, %v1238_v36 }
 0x87a   : > { %v1287_v45 = vadd.f32 %v1271_v38, %v1201_v34  ;;  %v1273_v60 = vadd.f32 %v1272_v50, %v1223_v35 }
 0x87b   : > { %v1226_v46 = vrot.slane %v1224_v41, 6  ;;  %v1207_v47 = vadd.f32 %v1206_v39, %v1202_v42  ;;  %v1257_v48 = vadd.f32 %v1256_v40, %v1255_v43  ;;  %v1241_v49 = vadd.f32 %v1240_v44, %v1206_v39 }
 0x87c   : > { %v1288_v55 = vadd.f32 %v1287_v45, %v1256_v40  ;;  %v1275_v2 = vrot.slane %v1273_v60, 6 }
 0x87d   : > { %v1228_v51 = vsel %vm499_vm3, %v1226_v46, 0.0  ;;  %v1209_v53 = vrot.slane %v1207_v47, 6  ;;  %v1259_v54 = vrot.slane %v1257_v48, 6  ;;  %v1243_v59 = vrot.slane %v1241_v49, 6 }
 0x87e   : > { %1229 = vadd.xlane.f32.xlu1 %v1228_v51  ;;  %v1290_v62 = vrot.slane %v1288_v55, 6  ;;  %v1277_v5 = vsel %vm499_vm3, %v1275_v2, 0.0  ;;  %v3416_v2 = vld [vmem:[%s3851_s3] ss:$0 sm:$0xff] }
 0x87f   : > { %v1211_v56 = vsel %vm499_vm3, %v1209_v53, 0.0  ;;  %v1261_v61 = vsel %vm499_vm3, %v1259_v54, 0.0  ;;  %v1245_v1 = vsel %vm499_vm3, %v1243_v59, 0.0 }
 0x880   : > { %1212 = vadd.xlane.f32.xlu0 %v1211_v56  ;;  %v1292_v3 = vsel %vm499_vm3, %v1290_v62, 0.0 }
 0x882   : > { %1262 = vadd.xlane.f32.xlu1 %v1261_v61 }
 0x884   : > { %1246 = vadd.xlane.f32.xlu0 %v1245_v1 }
 0x886   : > { %1293 = vadd.xlane.f32.xlu1 %v1292_v3 }
 0x888   : > { %1278 = vadd.xlane.f32.xlu0 %v1277_v5 }
 0x90b   : > { %v1230_v10 = vpop.xlane.xlu1 %1229 }
 0x90c   : > { %v1231_v11 = vrot.slane %v1230_v10, 4 }
 0x90d   : > { %v1213_v12 = vpop.xlane.xlu0 %1212 }
 0x90e   : > { %v1232_v52 = vadd.f32 %v1231_v11, %v1230_v10  ;;  %v1214_v13 = vrot.slane %v1213_v12, 4 }
 0x90f   : > { %v1263_v15 = vpop.xlane.xlu1 %1262 }
 0x910   : > { %v1233_v16 = vrot.slane %v1232_v52, 2  ;;  %v1215_v17 = vadd.f32 %v1214_v13, %v1213_v12  ;;  %v1264_v18 = vrot.slane %v1263_v15, 4 }
 0x911   : > { %v1247_v21 = vpop.xlane.xlu0 %1246 }
 0x912   : > { %v1216_v22 = vrot.slane %v1215_v17, 2  ;;  %v1265_v23 = vadd.f32 %v1264_v18, %v1263_v15  ;;  %v1248_v24 = vrot.slane %v1247_v21, 4  ;;  %v1234_v27 = vadd.f32 %v1233_v16, %v1232_v52 }
 0x913   : > { %v1294_v29 = vpop.xlane.xlu1 %1293 }
 0x914   : > { %v1266_v30 = vrot.slane %v1265_v23, 2  ;;  %v1249_v31 = vadd.f32 %v1248_v24, %v1247_v21  ;;  %v1295_v32 = vrot.slane %v1294_v29, 4  ;;  %v1217_v33 = vadd.f32 %v1216_v22, %v1215_v17 }
 0x915   : > { %v1279_v34 = vpop.xlane.xlu0 %1278  ;;  %v1235_v35 = vrot.slane %v1234_v27, 1  ;;  %v3445_v21 = vadd.f32 %v3379_v7, %v3144_v19 }
 0x916   : > { %v1250_v36 = vrot.slane %v1249_v31, 2  ;;  %v1296_v37 = vadd.f32 %v1295_v32, %v1294_v29  ;;  %v1280_v38 = vrot.slane %v1279_v34, 4  ;;  %v1218_v39 = vrot.slane %v1217_v33, 1 }
 0x917   : > { %v1267_v40 = vadd.f32 %v1266_v30, %v1265_v23  ;;  %v1236_v45 = vadd.f32 %v1235_v35, %v1234_v27  ;;  %v1440_v22 = vsel %vm244_vm2, %v3445_v21, 0.0  ;;  %v1446_v29 = vsel %vm244_vm2, %v3154_v26, 0.0 }
 0x918   : > { %v1297_v41 = vrot.slane %v1296_v37, 2  ;;  %v1281_v42 = vadd.f32 %v1280_v38, %v1279_v34  ;;  %v1219_v43 = vadd.f32 %v1218_v39, %v1217_v33  ;;  %v1251_v44 = vadd.f32 %v1250_v36, %v1249_v31 }
 0x919   : > { %v1268_v46 = vrot.slane %v1267_v40, 1 }
 0x91a   : > { %v1282_v47 = vrot.slane %v1281_v42, 2  ;;  %2669 = vpush %v1219_v43  ;;  %v1252_v48 = vrot.slane %v1251_v44, 1  ;;  %v1298_v49 = vadd.f32 %v1297_v41, %v1296_v37 }
 0x91b   : > { %2671 = vpush %v1236_v45  ;;  %v1269_v53 = vadd.f32 %v1268_v46, %v1267_v40 }
 0x91c   : > { %v1253_v50 = vadd.f32 %v1252_v48, %v1251_v44  ;;  %v1283_v51 = vadd.f32 %v1282_v47, %v1281_v42  ;;  %v1299_v54 = vrot.slane %v1298_v49, 1 }
 0x91e   : > { %2673 = vpush %v1253_v50  ;;  %v1284_v55 = vrot.slane %v1283_v51, 1  ;;  %v1300_v59 = vadd.f32 %v1299_v54, %v1298_v49 }
 0x91f   : > { %2675 = vpush %v1269_v53 }
 0x920   : > { %v1285_v56 = vadd.f32 %v1284_v55, %v1283_v51 }
 0x922   : > { %2677 = vpush %v1285_v56 }
 0x923   : > { %2679 = vpush %v1300_v59 }
 0x94b   : > { %s2670_s14 = spop %2669 }
 0x94c   : > { %s2672_s20 = spop %2671 }
 0x94d   : > { %p1302_p5 = scmp.lt.f32.partialorder %s2672_s20, %s2670_s14 }
 0x94f   : > { %s3990_s20 = smov (!%p1302_p5, %s2672_s20), %s2670_s14  ;;  %s2674_s23 = spop %2673 }
 0x950   : > { %p1305_p11 = scmp.lt.f32.partialorder %s2674_s23, %s3990_s20  ;;  %s2676_s28 = spop %2675 }
 0x951   : > { %s1304_s21 = scalar_select %p1302_p5, 1, 0 }
 0x952   : > { %s3992_s23 = smov (!%p1305_p11, %s2674_s23), %s3990_s20 }
 0x953   : > { %p1308_p2 = scmp.lt.f32.partialorder %s2676_s28, %s3992_s23  ;;  %s2678_s29 = spop %2677 }
 0x954   : > { %s3996_s21 = smov (%p1305_p11, %s1304_s21), 2  ;;  %s2680_s10 = spop %2679 }
 0x955   : > { %s3994_s28 = smov (!%p1308_p2, %s2676_s28), %s3992_s23  ;;  %s3998_s21 = smov (%p1308_p2, %s3996_s21), 3 }
 0x956   : > { %p1311_p1 = scmp.lt.f32.partialorder %s2678_s29, %s3994_s28 }
 0x958   : > { %s4000_s29 = smov (!%p1311_p1, %s2678_s29), %s3994_s28  ;;  %s4002_s21 = smov (%p1311_p1, %s3998_s21), 4 }
 0x959   : > { %p1314_p4 = scmp.lt.f32.partialorder %s2680_s10, %s4000_s29 }
 0x95b   : > { %s4004_s21 = smov (%p1314_p4, %s4002_s21), 5 }
 0x95c   : > { %p1316_p6 = scmp.eq.s32.totalorder %s4004_s21, 2  ;;  %p1318_p9 = scmp.eq.s32.totalorder %s4004_s21, 3 }
 0x95d   : > { %p1320_p13 = scmp.eq.s32.totalorder %s4004_s21, 4  ;;  %p1359_p3 = scmp.eq.s32.totalorder %s4004_s21, 1 }
 0x95e   : > { %s1317_s6 = scalar_select %p1316_p6, 1, 0 }
 0x95f   : > { %s1360_s7 = scalar_select %p1359_p3, 2, 1 }
 0x960   : > { %s1400_s8 = scalar_select %p1359_p3, 1, 2 }
 0x961   : > { %s4006_s6 = smov (%p1318_p9, %s1317_s6), 1  ;;  %p1322_p7 = scmp.eq.s32.totalorder %s4004_s21, 5 }
 0x962   : > { %s4008_s6 = smov (%p1320_p13, %s4006_s6), 2  ;;  %s4010_s7 = smov (%p1316_p6, %s1360_s7), 0 }
 0x963   : > { %s4012_s6 = smov (%p1322_p7, %s4008_s6), 2  ;;  %s4014_s7 = smov (%p1318_p9, %s4010_s7), 2 }
 0x964   : > { %p1324_p10 = scmp.eq.s32.totalorder %s4012_s6, 1  ;;  %p1329_p8 = scmp.eq.s32.totalorder %s4012_s6, 2 }
 0x965   : > { %s4016_s7 = smov (%p1320_p13, %s4014_s7), 0  ;;  %s4020_s8 = smov (%p1316_p6, %s1400_s8), 2 }
 0x966   : > { %s1325_s26 = scalar_select %p1324_p10, 1, 0 }
 0x967   : > { %s1330_s25 = scalar_select %p1329_p8, 1, 0 }
 0x968   : > { %v1326_v60 = vstv %s1325_s26  ;;  %s4018_s7 = smov (%p1322_p7, %s4016_s7), 1  ;;  %s4022_s8 = smov (%p1318_p9, %s4020_s8), 0 }
 0x969   : > { %vm1327_vm12 = vcmp.eq.s32.totalorder %v1326_v60, 1  ;;  %v1331_v61 = vstv %s1330_s25  ;;  %p1365_p0 = scmp.eq.s32.totalorder %s4018_s7, 1  ;;  %p1370_p5 = scmp.eq.s32.totalorder %s4018_s7, 2 }
 0x96a   : > { %v1328_v62 = vsel %vm1327_vm12, %v3152_v25, %v3149_v8  ;;  %vm1332_vm13 = vcmp.eq.s32.totalorder %v1331_v61, 1  ;;  %s4024_s8 = smov (%p1320_p13, %s4022_s8), 1 }
 0x96b   : > { %v1333_v1 = vsel %vm1332_vm13, %v3156_v28, %v1328_v62  ;;  %s1366_s14 = scalar_select %p1365_p0, 1, 0 }
 0x96c   : > { %v3419_v3 = vmul.f32 %v3416_v2, %v1333_v1  ;;  %s1371_s20 = scalar_select %p1370_p5, 1, 0 }
 0x96d   : > { %v1367_v5 = vstv %s1366_s14  ;;  %s4026_s8 = smov (%p1322_p7, %s4024_s8), 0 }
 0x96e   : > { %1353 = vrot.lane.b32.xlu0 %v3419_v3, %s2941_s5  ;;  %vm1368_vm14 = vcmp.eq.s32.totalorder %v1367_v5, 1  ;;  %v1372_v10 = vstv %s1371_s20  ;;  %p1405_p11 = scmp.eq.s32.totalorder %s4026_s8, 1  ;;  %p1410_p2 = scmp.eq.s32.totalorder %s4026_s8, 2 }
 0x96f   : > { %v1369_v11 = vsel %vm1368_vm14, %v3152_v25, %v3149_v8  ;;  %vm1373_vm15 = vcmp.eq.s32.totalorder %v1372_v10, 1 }
 0x970   : > { %v1374_v12 = vsel %vm1373_vm15, %v3156_v28, %v1369_v11  ;;  %s1406_s23 = scalar_select %p1405_p11, 1, 0 }
 0x971   : > { %v3431_v52 = vmul.f32 %v3416_v2, %v1374_v12  ;;  %s1411_s28 = scalar_select %p1410_p2, 1, 0 }
 0x972   : > { %v1407_v13 = vstv %s1406_s23 }
 0x973   : > { %1394 = vrot.lane.b32.xlu1 %v3431_v52, %s2941_s5  ;;  %vm1408_vm0 = vcmp.eq.s32.totalorder %v1407_v13, 1  ;;  %v1412_v15 = vstv %s1411_s28 }
 0x974   : > { %v1409_v16 = vsel %vm1408_vm0, %v3152_v25, %v3149_v8  ;;  %vm1413_vm4 = vcmp.eq.s32.totalorder %v1412_v15, 1  ;;  %v3451_v8 = vadd.f32 %v3381_v9, %v3146_v20 }
 0x975   : > { %v1414_v17 = vsel %vm1413_vm4, %v3156_v28, %v1409_v16 }
 0x976   : > { %v3439_v18 = vmul.f32 %v3416_v2, %v1414_v17  ;;  %v1443_v28 = vsel %vm244_vm2, %v3451_v8, 0.0 }
 0x978   : > { %1434 = vrot.lane.b32.xlu1 %v3439_v18, %s2941_s5 }
 0x98d   : > { %1441 = vadd.xlane.f32.xlu0 %v1440_v22 }
 0x9e0   : > { %v1354_v23 = vpop.permute.xlu0 %1353 }
 0x9e1   : > { %v1356_v25 = vsel %vm1184_vm11, %v1354_v23, 0.0 }
 0x9e2   : > { %1357 = vadd.xlane.f32.xlu1 %v1356_v25 }
 0x9e5   : > { %v1395_v24 = vpop.permute.xlu1 %1394 }
 0x9e6   : > { %1444 = vadd.xlane.f32.xlu1 %v1443_v28  ;;  %v1397_v19 = vsel %vm1184_vm11, %v1395_v24, 0.0 }
 0x9e7   : > { %1398 = vadd.xlane.f32.xlu0 %v1397_v19 }
 0x9ea   : > { %v1435_v7 = vpop.permute.xlu1 %1434 }
 0x9eb   : > { %v1437_v27 = vsel %vm1184_vm11, %v1435_v7, 0.0 }
 0x9ec   : > { %1438 = vadd.xlane.f32.xlu0 %v1437_v27 }
 0x9f0   : > { %1447 = vadd.xlane.f32.xlu0 %v1446_v29 }
 0xa1a   : > { %v1442_v20 = vpop.xlane.xlu0 %1441 }
 0xa6f   : > { %v1358_v9 = vpop.xlane.xlu1 %1357 }
 0xa70   : > { %v1450_v33 = vrot.slane %v1358_v9, 6 }
 0xa72   : > { %v1452_v38 = vmul.f32 %v1450_v33, %v1442_v20 }
 0xa73   : > { %v1445_v32 = vpop.xlane.xlu1 %1444 }
 0xa74   : > { %v1399_v30 = vpop.xlane.xlu0 %1398  ;;  %v1487_v37 = vmul.f32 %v1450_v33, %v1445_v32 }
 0xa75   : > { %v1454_v31 = vrot.slane %v1399_v30, 6 }
 0xa77   : > { %v1456_v35 = vmul.f32 %v1454_v31, %v1445_v32  ;;  %v1488_v36 = vmul.f32 %v1454_v31, %v1442_v20 }
 0xa79   : > { %v1439_v34 = vpop.xlane.xlu0 %1438  ;;  %v1457_v44 = vadd.f32 %v1456_v35, %v1452_v38  ;;  %v1489_v45 = vadd.f32 %v1488_v36, %v1487_v37 }
 0xa7a   : > { %v1459_v39 = vrot.slane %v1439_v34, 6 }
 0xa7c   : > { %v1475_v48 = vmul.f32 %v1459_v39, %v1445_v32  ;;  %v1502_v50 = vmul.f32 %v1459_v39, %v1442_v20 }
 0xa7d   : > { %v1448_v40 = vpop.xlane.xlu0 %1447 }
 0xa7e   : > { %v1461_v41 = vmul.f32 %v1459_v39, %v1448_v40  ;;  %v1473_v42 = vmul.f32 %v1454_v31, %v1448_v40  ;;  %v1514_v43 = vmul.f32 %v1450_v33, %v1448_v40 }
 0xa80   : > { %v1462_v46 = vadd.f32 %v1461_v41, %v1457_v44  ;;  %v1474_v47 = vadd.f32 %v1473_v42, %v1452_v38  ;;  %v1501_v49 = vadd.f32 %v1487_v37, %v1473_v42  ;;  %v1490_v54 = vadd.f32 %v1489_v45, %v1461_v41 }
 0xa81   : > { %v1515_v55 = vadd.f32 %v1514_v43, %v1488_v36  ;;  %v1527_v60 = vadd.f32 %v1514_v43, %v1456_v35 }
 0xa82   : > { %v1463_v51 = vsel %vm499_vm3, %v1462_v46, 0.0  ;;  %v1476_v53 = vadd.f32 %v1475_v48, %v1474_v47  ;;  %v1503_v59 = vadd.f32 %v1502_v50, %v1501_v49  ;;  %v1491_v61 = vsel %vm499_vm3, %v1490_v54, 0.0 }
 0xa83   : > { %1464 = vadd.xlane.f32.xlu1 %v1463_v51  ;;  %v1516_v62 = vadd.f32 %v1515_v55, %v1475_v48  ;;  %v1528_v5 = vadd.f32 %v1527_v60, %v1502_v50 }
 0xa84   : > { %v1477_v56 = vsel %vm499_vm3, %v1476_v53, 0.0  ;;  %v1504_v1 = vsel %vm499_vm3, %v1503_v59, 0.0 }
 0xa85   : > { %1478 = vadd.xlane.f32.xlu0 %v1477_v56  ;;  %v1517_v10 = vsel %vm499_vm3, %v1516_v62, 0.0  ;;  %v1529_v11 = vsel %vm499_vm3, %v1528_v5, 0.0 }
 0xa87   : > { %1492 = vadd.xlane.f32.xlu1 %v1491_v61 }
 0xa89   : > { %1505 = vadd.xlane.f32.xlu0 %v1504_v1 }
 0xa8b   : > { %1518 = vadd.xlane.f32.xlu1 %v1517_v10 }
 0xa8d   : > { %1530 = vadd.xlane.f32.xlu0 %v1529_v11 }
 0xb10   : > { %v1465_v12 = vpop.xlane.xlu1 %1464 }
 0xb11   : > { %v1466_v13 = vrot.slane %v1465_v12, 4 }
 0xb12   : > { %v1479_v15 = vpop.xlane.xlu0 %1478 }
 0xb13   : > { %v1467_v16 = vadd.f32 %v1466_v13, %v1465_v12  ;;  %v1480_v17 = vrot.slane %v1479_v15, 4 }
 0xb14   : > { %v1493_v22 = vpop.xlane.xlu1 %1492 }
 0xb15   : > { %v1468_v23 = vrot.slane %v1467_v16, 2  ;;  %v1481_v25 = vadd.f32 %v1480_v17, %v1479_v15  ;;  %v1494_v28 = vrot.slane %v1493_v22, 4 }
 0xb16   : > { %v1506_v24 = vpop.xlane.xlu0 %1505 }
 0xb17   : > { %v1482_v19 = vrot.slane %v1481_v25, 2  ;;  %v1495_v7 = vadd.f32 %v1494_v28, %v1493_v22  ;;  %v1507_v27 = vrot.slane %v1506_v24, 4  ;;  %v1469_v29 = vadd.f32 %v1468_v23, %v1467_v16 }
 0xb18   : > { %v1519_v20 = vpop.xlane.xlu1 %1518 }
 0xb19   : > { %v1496_v9 = vrot.slane %v1495_v7, 2  ;;  %v1508_v30 = vadd.f32 %v1507_v27, %v1506_v24  ;;  %v1520_v31 = vrot.slane %v1519_v20, 4  ;;  %v1470_v32 = vrot.slane %v1469_v29, 1 }
 0xb1a   : > { %v1531_v33 = vpop.xlane.xlu0 %1530  ;;  %v1483_v34 = vadd.f32 %v1482_v19, %v1481_v25  ;;  %v1635_v25 = vsel %vm687_vm10, %v3445_v21, 0.0  ;;  %v1641_v19 = vsel %vm687_vm10, %v3154_v26, 0.0 }
 0xb1b   : > { %v1509_v35 = vrot.slane %v1508_v30, 2  ;;  %v1521_v36 = vadd.f32 %v1520_v31, %v1519_v20  ;;  %v1532_v37 = vrot.slane %v1531_v33, 4  ;;  %v1471_v38 = vadd.f32 %v1470_v32, %v1469_v29 }
 0xb1c   : > { %v1484_v39 = vrot.slane %v1483_v34, 1  ;;  %v1497_v40 = vadd.f32 %v1496_v9, %v1495_v7  ;;  %v1638_v9 = vsel %vm687_vm10, %v3451_v8, 0.0 }
 0xb1d   : > { %v1522_v41 = vrot.slane %v1521_v36, 2  ;;  %v1533_v42 = vadd.f32 %v1532_v37, %v1531_v33  ;;  %2681 = vpush %v1471_v38  ;;  %v1510_v43 = vadd.f32 %v1509_v35, %v1508_v30 }
 0xb1e   : > { %v1485_v44 = vadd.f32 %v1484_v39, %v1483_v34  ;;  %v1498_v45 = vrot.slane %v1497_v40, 1 }
 0xb1f   : > { %v1534_v46 = vrot.slane %v1533_v42, 2  ;;  %v1511_v47 = vrot.slane %v1510_v43, 1  ;;  %v1523_v48 = vadd.f32 %v1522_v41, %v1521_v36 }
 0xb20   : > { %2683 = vpush %v1485_v44  ;;  %v1499_v49 = vadd.f32 %v1498_v45, %v1497_v40 }
 0xb21   : > { %v1512_v50 = vadd.f32 %v1511_v47, %v1510_v43  ;;  %v1524_v51 = vrot.slane %v1523_v48, 1  ;;  %v1535_v53 = vadd.f32 %v1534_v46, %v1533_v42 }
 0xb22   : > { %2685 = vpush %v1499_v49 }
 0xb23   : > { %2687 = vpush %v1512_v50  ;;  %v1525_v54 = vadd.f32 %v1524_v51, %v1523_v48  ;;  %v1536_v55 = vrot.slane %v1535_v53, 1 }
 0xb25   : > { %2689 = vpush %v1525_v54  ;;  %v1537_v56 = vadd.f32 %v1536_v55, %v1535_v53 }
 0xb27   : > { %2691 = vpush %v1537_v56 }
 0xb4e   : > { %s2682_s21 = spop %2681 }
 0xb51   : > { %s2684_s29 = spop %2683 }
 0xb52   : > { %p1539_p1 = scmp.lt.f32.partialorder %s2684_s29, %s2682_s21 }
 0xb53   : > { %s2686_s10 = spop %2685 }
 0xb54   : > { %s4028_s29 = smov (!%p1539_p1, %s2684_s29), %s2682_s21  ;;  %s2688_s7 = spop %2687 }
 0xb55   : > { %p1542_p4 = scmp.lt.f32.partialorder %s2686_s10, %s4028_s29 }
 0xb56   : > { %s1541_s6 = scalar_select %p1539_p1, 1, 0 }
 0xb57   : > { %s4030_s10 = smov (!%p1542_p4, %s2686_s10), %s4028_s29  ;;  %s2690_s8 = spop %2689 }
 0xb58   : > { %p1545_p6 = scmp.lt.f32.partialorder %s2688_s7, %s4030_s10  ;;  %s4034_s6 = smov (%p1542_p4, %s1541_s6), 2 }
 0xb59   : > { %s2692_s26 = spop %2691 }
 0xb5a   : > { %s4032_s7 = smov (!%p1545_p6, %s2688_s7), %s4030_s10  ;;  %s4036_s6 = smov (%p1545_p6, %s4034_s6), 3 }
 0xb5b   : > { %p1548_p9 = scmp.lt.f32.partialorder %s2690_s8, %s4032_s7 }
 0xb5d   : > { %s4038_s8 = smov (!%p1548_p9, %s2690_s8), %s4032_s7  ;;  %s4040_s6 = smov (%p1548_p9, %s4036_s6), 4 }
 0xb5e   : > { %p1551_p13 = scmp.lt.f32.partialorder %s2692_s26, %s4038_s8 }
 0xb60   : > { %s4042_s6 = smov (%p1551_p13, %s4040_s6), 5 }
 0xb61   : > { %p1553_p3 = scmp.eq.s32.totalorder %s4042_s6, 2  ;;  %p1555_p7 = scmp.eq.s32.totalorder %s4042_s6, 3 }
 0xb62   : > { %p1557_p10 = scmp.eq.s32.totalorder %s4042_s6, 4  ;;  %p1582_p8 = scmp.eq.s32.totalorder %s4042_s6, 1 }
 0xb63   : > { %s1554_s25 = scalar_select %p1553_p3, 1, 0 }
 0xb64   : > { %s1583_s11 = scalar_select %p1582_p8, 2, 1 }
 0xb65   : > { %s1609_s13 = scalar_select %p1582_p8, 1, 2 }
 0xb66   : > { %s4044_s25 = smov (%p1555_p7, %s1554_s25), 1  ;;  %p1559_p0 = scmp.eq.s32.totalorder %s4042_s6, 5 }
 0xb67   : > { %s4046_s25 = smov (%p1557_p10, %s4044_s25), 2  ;;  %s4048_s11 = smov (%p1553_p3, %s1583_s11), 0 }
 0xb68   : > { %s4050_s25 = smov (%p1559_p0, %s4046_s25), 2  ;;  %s4052_s11 = smov (%p1555_p7, %s4048_s11), 2 }
 0xb69   : > { %p1561_p5 = scmp.eq.s32.totalorder %s4050_s25, 1  ;;  %p1566_p11 = scmp.eq.s32.totalorder %s4050_s25, 2 }
 0xb6a   : > { %s4054_s11 = smov (%p1557_p10, %s4052_s11), 0  ;;  %s4058_s13 = smov (%p1553_p3, %s1609_s13), 2 }
 0xb6b   : > { %s1562_s14 = scalar_select %p1561_p5, 1, 0 }
 0xb6c   : > { %s1567_s20 = scalar_select %p1566_p11, 1, 0 }
 0xb6d   : > { %v1563_v59 = vstv %s1562_s14  ;;  %s4056_s11 = smov (%p1559_p0, %s4054_s11), 1  ;;  %s4060_s13 = smov (%p1555_p7, %s4058_s13), 0 }
 0xb6e   : > { %vm1564_vm5 = vcmp.eq.s32.totalorder %v1563_v59, 1  ;;  %v1568_v60 = vstv %s1567_s20  ;;  %p1588_p2 = scmp.eq.s32.totalorder %s4056_s11, 1  ;;  %p1593_p1 = scmp.eq.s32.totalorder %s4056_s11, 2 }
 0xb6f   : > { %v1565_v61 = vsel %vm1564_vm5, %v3451_v8, %v3445_v21  ;;  %vm1569_vm6 = vcmp.eq.s32.totalorder %v1568_v60, 1  ;;  %s4062_s13 = smov (%p1557_p10, %s4060_s13), 1 }
 0xb70   : > { %v1570_v62 = vsel %vm1569_vm6, %v3154_v26, %v1565_v61  ;;  %s1589_s23 = scalar_select %p1588_p2, 1, 0  ;;  %vm851_vm6 = vcmask 523264  }
 0xb71   : > { %v3497_v1 = vmul.f32 %v3416_v2, %v1570_v62  ;;  %s1594_s28 = scalar_select %p1593_p1, 1, 0 }
 0xb72   : > { %v1590_v5 = vstv %s1589_s23  ;;  %s4064_s13 = smov (%p1559_p0, %s4062_s13), 0 }
 0xb73   : > { %1576 = vrot.lane.b32.xlu1 %v3497_v1, %s2941_s5  ;;  %vm1591_vm7 = vcmp.eq.s32.totalorder %v1590_v5, 1  ;;  %v1595_v10 = vstv %s1594_s28  ;;  %p1614_p4 = scmp.eq.s32.totalorder %s4064_s13, 1  ;;  %p1619_p6 = scmp.eq.s32.totalorder %s4064_s13, 2 }
 0xb74   : > { %v1592_v11 = vsel %vm1591_vm7, %v3451_v8, %v3445_v21  ;;  %vm1596_vm8 = vcmp.eq.s32.totalorder %v1595_v10, 1  ;;  %vm855_vm7 = vcmask 1041920  }
 0xb75   : > { %v1597_v12 = vsel %vm1596_vm8, %v3154_v26, %v1592_v11  ;;  %s1615_s21 = scalar_select %p1614_p4, 1, 0  ;;  %vm3640_vm8 = vmor %vm687_vm10, %vm855_vm7 }
 0xb76   : > { %v3509_v13 = vmul.f32 %v3416_v2, %v1597_v12  ;;  %s1620_s29 = scalar_select %p1619_p6, 1, 0 }
 0xb77   : > { %v1616_v15 = vstv %s1615_s21 }
 0xb78   : > { %1603 = vrot.lane.b32.xlu0 %v3509_v13, %s2941_s5  ;;  %vm1617_vm9 = vcmp.eq.s32.totalorder %v1616_v15, 1  ;;  %v1621_v16 = vstv %s1620_s29 }
 0xb79   : > { %v1618_v17 = vsel %vm1617_vm9, %v3451_v8, %v3445_v21  ;;  %vm1622_vm12 = vcmp.eq.s32.totalorder %v1621_v16, 1 }
 0xb7a   : > { %v1623_v22 = vsel %vm1622_vm12, %v3154_v26, %v1618_v17 }
 0xb7b   : > { %v3517_v23 = vmul.f32 %v3416_v2, %v1623_v22 }
 0xb7d   : > { %1629 = vrot.lane.b32.xlu1 %v3517_v23, %s2941_s5 }
 0xba1   : > { %1636 = vadd.xlane.f32.xlu1 %v1635_v25 }
 0xbe5   : > { %v1577_v28 = vpop.permute.xlu1 %1576 }
 0xbe6   : > { %v1579_v24 = vsel %vm244_vm2, %v1577_v28, 0.0 }
 0xbe7   : > { %1580 = vadd.xlane.f32.xlu1 %v1579_v24 }
 0xbea   : > { %v1604_v7 = vpop.permute.xlu0 %1603 }
 0xbeb   : > { %1642 = vadd.xlane.f32.xlu1 %v1641_v19  ;;  %v1606_v27 = vsel %vm244_vm2, %v1604_v7, 0.0 }
 0xbec   : > { %1607 = vadd.xlane.f32.xlu0 %v1606_v27 }
 0xbef   : > { %v1630_v29 = vpop.permute.xlu1 %1629 }
 0xbf0   : > { %v1632_v20 = vsel %vm244_vm2, %v1630_v29, 0.0 }
 0xbf1   : > { %1633 = vadd.xlane.f32.xlu0 %v1632_v20 }
 0xbf5   : > { %1639 = vadd.xlane.f32.xlu0 %v1638_v9 }
 0xc2e   : > { %v1637_v30 = vpop.xlane.xlu1 %1636 }
 0xc74   : > { %v1581_v31 = vpop.xlane.xlu1 %1580 }
 0xc75   : > { %v1645_v35 = vrot.slane %v1581_v31, 6 }
 0xc77   : > { %v1647_v39 = vmul.f32 %v1645_v35, %v1637_v30 }
 0xc78   : > { %v1643_v34 = vpop.xlane.xlu1 %1642 }
 0xc79   : > { %v1608_v32 = vpop.xlane.xlu0 %1607  ;;  %v1721_v46 = vmul.f32 %v1645_v35, %v1643_v34 }
 0xc7a   : > { %v1649_v33 = vrot.slane %v1608_v32, 6 }
 0xc7c   : > { %v1671_v37 = vmul.f32 %v1649_v33, %v1643_v34  ;;  %v1689_v40 = vmul.f32 %v1649_v33, %v1637_v30 }
 0xc7e   : > { %v1634_v36 = vpop.xlane.xlu0 %1633  ;;  %v1672_v45 = vadd.f32 %v1671_v37, %v1647_v39  ;;  %v1722_v61 = vadd.f32 %v1721_v46, %v1689_v40 }
 0xc7f   : > { %v1654_v38 = vrot.slane %v1634_v36, 6 }
 0xc81   : > { %v1656_v47 = vmul.f32 %v1654_v38, %v1643_v34  ;;  %v1706_v48 = vmul.f32 %v1654_v38, %v1637_v30 }
 0xc82   : > { %v1640_v41 = vpop.xlane.xlu0 %1639 }
 0xc83   : > { %v1651_v42 = vmul.f32 %v1649_v33, %v1640_v41  ;;  %v1673_v43 = vmul.f32 %v1654_v38, %v1640_v41  ;;  %v1688_v44 = vmul.f32 %v1645_v35, %v1640_v41 }
 0xc85   : > { %v1674_v49 = vadd.f32 %v1673_v43, %v1672_v45  ;;  %v1652_v50 = vadd.f32 %v1651_v42, %v1647_v39  ;;  %v1705_v51 = vadd.f32 %v1688_v44, %v1671_v37  ;;  %v1690_v53 = vadd.f32 %v1689_v40, %v1688_v44 }
 0xc86   : > { %v1737_v54 = vadd.f32 %v1721_v46, %v1651_v42  ;;  %v1723_v16 = vadd.f32 %v1722_v61, %v1673_v43 }
 0xc87   : > { %v1676_v55 = vrot.slane %v1674_v49, 2  ;;  %v1657_v56 = vadd.f32 %v1656_v47, %v1652_v50  ;;  %v1707_v59 = vadd.f32 %v1706_v48, %v1705_v51  ;;  %v1691_v60 = vadd.f32 %v1690_v53, %v1656_v47 }
 0xc88   : > { %v1738_v11 = vadd.f32 %v1737_v54, %v1706_v48  ;;  %v1725_v28 = vrot.slane %v1723_v16, 2 }
 0xc89   : > { %v1678_v62 = vsel %vm499_vm3, %v1676_v55, 0.0  ;;  %v1659_v5 = vrot.slane %v1657_v56, 2  ;;  %v1709_v10 = vrot.slane %v1707_v59, 2  ;;  %v1693_v15 = vrot.slane %v1691_v60, 2 }
 0xc8a   : > { %1679 = vadd.xlane.f32.xlu1 %v1678_v62  ;;  %v1740_v22 = vrot.slane %v1738_v11, 2  ;;  %v1727_v19 = vsel %vm499_vm3, %v1725_v28, 0.0 }
 0xc8b   : > { %v1661_v12 = vsel %vm499_vm3, %v1659_v5, 0.0  ;;  %v1711_v17 = vsel %vm499_vm3, %v1709_v10, 0.0  ;;  %v1695_v25 = vsel %vm499_vm3, %v1693_v15, 0.0 }
 0xc8c   : > { %1662 = vadd.xlane.f32.xlu0 %v1661_v12  ;;  %v1742_v24 = vsel %vm499_vm3, %v1740_v22, 0.0 }
 0xc8e   : > { %1712 = vadd.xlane.f32.xlu1 %v1711_v17 }
 0xc90   : > { %1696 = vadd.xlane.f32.xlu0 %v1695_v25 }
 0xc92   : > { %1743 = vadd.xlane.f32.xlu1 %v1742_v24 }
 0xc94   : > { %1728 = vadd.xlane.f32.xlu0 %v1727_v19 }
 0xd17   : > { %v1680_v7 = vpop.xlane.xlu1 %1679 }
 0xd18   : > { %v1681_v27 = vrot.slane %v1680_v7, 4 }
 0xd19   : > { %v1663_v29 = vpop.xlane.xlu0 %1662 }
 0xd1a   : > { %v1682_v20 = vadd.f32 %v1681_v27, %v1680_v7  ;;  %v1664_v9 = vrot.slane %v1663_v29, 4 }
 0xd1b   : > { %v1713_v30 = vpop.xlane.xlu1 %1712 }
 0xd1c   : > { %v1683_v31 = vrot.slane %v1682_v20, 2  ;;  %v1665_v32 = vadd.f32 %v1664_v9, %v1663_v29  ;;  %v1714_v33 = vrot.slane %v1713_v30, 4 }
 0xd1d   : > { %v1697_v34 = vpop.xlane.xlu0 %1696 }
 0xd1e   : > { %v1666_v35 = vrot.slane %v1665_v32, 2  ;;  %v1715_v36 = vadd.f32 %v1714_v33, %v1713_v30  ;;  %v1698_v37 = vrot.slane %v1697_v34, 4  ;;  %v1684_v38 = vadd.f32 %v1683_v31, %v1682_v20 }
 0xd1f   : > { %v1744_v39 = vpop.xlane.xlu1 %1743 }
 0xd20   : > { %v1716_v40 = vrot.slane %v1715_v36, 2  ;;  %v1699_v41 = vadd.f32 %v1698_v37, %v1697_v34  ;;  %v1745_v42 = vrot.slane %v1744_v39, 4  ;;  %v1667_v43 = vadd.f32 %v1666_v35, %v1665_v32 }
 0xd21   : > { %v1729_v44 = vpop.xlane.xlu0 %1728  ;;  %v1685_v45 = vrot.slane %v1684_v38, 1  ;;  %v1887_v35 = vsel %vm943_vm1, %v3445_v21, 0.0 }
 0xd22   : > { %v1700_v46 = vrot.slane %v1699_v41, 2  ;;  %v1746_v47 = vadd.f32 %v1745_v42, %v1744_v39  ;;  %v1730_v48 = vrot.slane %v1729_v44, 4  ;;  %v1668_v49 = vrot.slane %v1667_v43, 1 }
 0xd23   : > { %v1717_v50 = vadd.f32 %v1716_v40, %v1715_v36  ;;  %v1686_v56 = vadd.f32 %v1685_v45, %v1684_v38  ;;  %v1890_v38 = vsel %vm943_vm1, %v3451_v8, 0.0  ;;  %v1893_v42 = vsel %vm943_vm1, %v3154_v26, 0.0 }
 0xd24   : > { %v1747_v51 = vrot.slane %v1746_v47, 2  ;;  %v1731_v53 = vadd.f32 %v1730_v48, %v1729_v44  ;;  %v1669_v54 = vadd.f32 %v1668_v49, %v1667_v43  ;;  %v1701_v55 = vadd.f32 %v1700_v46, %v1699_v41 }
 0xd25   : > { %v1718_v59 = vrot.slane %v1717_v50, 1 }
 0xd26   : > { %v1732_v60 = vrot.slane %v1731_v53, 2  ;;  %2693 = vpush %v1669_v54  ;;  %v1702_v61 = vrot.slane %v1701_v55, 1  ;;  %v1748_v62 = vadd.f32 %v1747_v51, %v1746_v47 }
 0xd27   : > { %2695 = vpush %v1686_v56  ;;  %v1719_v11 = vadd.f32 %v1718_v59, %v1717_v50 }
 0xd28   : > { %v1703_v5 = vadd.f32 %v1702_v61, %v1701_v55  ;;  %v1733_v10 = vadd.f32 %v1732_v60, %v1731_v53  ;;  %v1749_v12 = vrot.slane %v1748_v62, 1 }
 0xd2a   : > { %2697 = vpush %v1703_v5  ;;  %v1734_v15 = vrot.slane %v1733_v10, 1  ;;  %v1750_v17 = vadd.f32 %v1749_v12, %v1748_v62 }
 0xd2b   : > { %2699 = vpush %v1719_v11 }
 0xd2c   : > { %v1735_v16 = vadd.f32 %v1734_v15, %v1733_v10 }
 0xd2e   : > { %2701 = vpush %v1735_v16 }
 0xd2f   : > { %2703 = vpush %v1750_v17 }
 0xd57   : > { %s2694_s10 = spop %2693 }
 0xd58   : > { %s2696_s6 = spop %2695 }
 0xd59   : > { %p1752_p9 = scmp.lt.f32.partialorder %s2696_s6, %s2694_s10 }
 0xd5b   : > { %s4066_s6 = smov (!%p1752_p9, %s2696_s6), %s2694_s10  ;;  %s2698_s7 = spop %2697 }
 0xd5c   : > { %p1755_p13 = scmp.lt.f32.partialorder %s2698_s7, %s4066_s6  ;;  %s2700_s26 = spop %2699 }
 0xd5d   : > { %s1754_s8 = scalar_select %p1752_p9, 1, 0 }
 0xd5e   : > { %s4068_s7 = smov (!%p1755_p13, %s2698_s7), %s4066_s6 }
 0xd5f   : > { %p1758_p3 = scmp.lt.f32.partialorder %s2700_s26, %s4068_s7  ;;  %s2702_s25 = spop %2701 }
 0xd60   : > { %s4072_s8 = smov (%p1755_p13, %s1754_s8), 2  ;;  %s2704_s11 = spop %2703 }
 0xd61   : > { %s4070_s26 = smov (!%p1758_p3, %s2700_s26), %s4068_s7  ;;  %s4074_s8 = smov (%p1758_p3, %s4072_s8), 3 }
 0xd62   : > { %p1761_p7 = scmp.lt.f32.partialorder %s2702_s25, %s4070_s26 }
 0xd64   : > { %s4076_s25 = smov (!%p1761_p7, %s2702_s25), %s4070_s26  ;;  %s4078_s8 = smov (%p1761_p7, %s4074_s8), 4 }
 0xd65   : > { %p1764_p10 = scmp.lt.f32.partialorder %s2704_s11, %s4076_s25 }
 0xd67   : > { %s4080_s8 = smov (%p1764_p10, %s4078_s8), 5 }
 0xd68   : > { %p1766_p8 = scmp.eq.s32.totalorder %s4080_s8, 2  ;;  %p1768_p0 = scmp.eq.s32.totalorder %s4080_s8, 3 }
 0xd69   : > { %p1770_p5 = scmp.eq.s32.totalorder %s4080_s8, 4  ;;  %p1808_p11 = scmp.eq.s32.totalorder %s4080_s8, 1 }
 0xd6a   : > { %s1767_s13 = scalar_select %p1766_p8, 1, 0 }
 0xd6b   : > { %s1809_s14 = scalar_select %p1808_p11, 2, 1 }
 0xd6c   : > { %s1848_s20 = scalar_select %p1808_p11, 1, 2 }
 0xd6d   : > { %s4082_s13 = smov (%p1768_p0, %s1767_s13), 1  ;;  %p1772_p2 = scmp.eq.s32.totalorder %s4080_s8, 5 }
 0xd6e   : > { %s4084_s13 = smov (%p1770_p5, %s4082_s13), 2  ;;  %s4086_s14 = smov (%p1766_p8, %s1809_s14), 0 }
 0xd6f   : > { %s4088_s13 = smov (%p1772_p2, %s4084_s13), 2  ;;  %s4090_s14 = smov (%p1768_p0, %s4086_s14), 2 }
 0xd70   : > { %p1774_p1 = scmp.eq.s32.totalorder %s4088_s13, 1  ;;  %p1779_p4 = scmp.eq.s32.totalorder %s4088_s13, 2 }
 0xd71   : > { %s4092_s14 = smov (%p1770_p5, %s4090_s14), 0  ;;  %s4096_s20 = smov (%p1766_p8, %s1848_s20), 2 }
 0xd72   : > { %s1775_s23 = scalar_select %p1774_p1, 1, 0 }
 0xd73   : > { %s1780_s28 = scalar_select %p1779_p4, 1, 0 }
 0xd74   : > { %v1776_v22 = vstv %s1775_s23  ;;  %s4094_s14 = smov (%p1772_p2, %s4092_s14), 1  ;;  %s4098_s20 = smov (%p1768_p0, %s4096_s20), 0 }
 0xd75   : > { %vm1777_vm13 = vcmp.eq.s32.totalorder %v1776_v22, 1  ;;  %v1781_v25 = vstv %s1780_s28  ;;  %p1814_p6 = scmp.eq.s32.totalorder %s4094_s14, 1  ;;  %p1819_p9 = scmp.eq.s32.totalorder %s4094_s14, 2 }
 0xd76   : > { %v1778_v28 = vsel %vm1777_vm13, %v3451_v8, %v3445_v21  ;;  %vm1782_vm14 = vcmp.eq.s32.totalorder %v1781_v25, 1  ;;  %s4100_s20 = smov (%p1770_p5, %s4098_s20), 1 }
 0xd77   : > { %v1783_v24 = vsel %vm1782_vm14, %v3154_v26, %v1778_v28  ;;  %s1815_s21 = scalar_select %p1814_p6, 1, 0 }
 0xd78   : > { %v3567_v19 = vmul.f32 %v3416_v2, %v1783_v24  ;;  %s1820_s29 = scalar_select %p1819_p9, 1, 0 }
 0xd79   : > { %v1816_v7 = vstv %s1815_s21  ;;  %s4102_s20 = smov (%p1772_p2, %s4100_s20), 0 }
 0xd7a   : > { %1802 = vrot.lane.b32.xlu0 %v3567_v19, %s2941_s5  ;;  %vm1817_vm15 = vcmp.eq.s32.totalorder %v1816_v7, 1  ;;  %v1821_v27 = vstv %s1820_s29  ;;  %p1853_p13 = scmp.eq.s32.totalorder %s4102_s20, 1  ;;  %p1858_p3 = scmp.eq.s32.totalorder %s4102_s20, 2 }
 0xd7b   : > { %v1818_v29 = vsel %vm1817_vm15, %v3451_v8, %v3445_v21  ;;  %vm1822_vm0 = vcmp.eq.s32.totalorder %v1821_v27, 1 }
 0xd7c   : > { %v1823_v20 = vsel %vm1822_vm0, %v3154_v26, %v1818_v29  ;;  %s1854_s10 = scalar_select %p1853_p13, 1, 0 }
 0xd7d   : > { %v3579_v9 = vmul.f32 %v3416_v2, %v1823_v20  ;;  %s1859_s6 = scalar_select %p1858_p3, 1, 0 }
 0xd7e   : > { %v1855_v30 = vstv %s1854_s10 }
 0xd7f   : > { %1842 = vrot.lane.b32.xlu1 %v3579_v9, %s2941_s5  ;;  %vm1856_vm4 = vcmp.eq.s32.totalorder %v1855_v30, 1  ;;  %v1860_v31 = vstv %s1859_s6 }
 0xd80   : > { %v1857_v32 = vsel %vm1856_vm4, %v3451_v8, %v3445_v21  ;;  %vm1861_vm5 = vcmp.eq.s32.totalorder %v1860_v31, 1 }
 0xd81   : > { %v1862_v33 = vsel %vm1861_vm5, %v3154_v26, %v1857_v32 }
 0xd82   : > { %v3587_v34 = vmul.f32 %v3416_v2, %v1862_v33 }
 0xd84   : > { %1881 = vrot.lane.b32.xlu1 %v3587_v34, %s2941_s5 }
 0xd99   : > { %1888 = vadd.xlane.f32.xlu0 %v1887_v35 }
 0xdec   : > { %v1803_v36 = vpop.permute.xlu0 %1802 }
 0xded   : > { %v1805_v37 = vsel %vm687_vm10, %v1803_v36, 0.0 }
 0xdee   : > { %1806 = vadd.xlane.f32.xlu1 %v1805_v37 }
 0xdf1   : > { %v1843_v39 = vpop.permute.xlu1 %1842 }
 0xdf2   : > { %1891 = vadd.xlane.f32.xlu1 %v1890_v38  ;;  %v1845_v40 = vsel %vm687_vm10, %v1843_v39, 0.0  ;;  %v2942_v39 = vmov 1983009808  }
 0xdf3   : > { %1846 = vadd.xlane.f32.xlu0 %v1845_v40  ;;  %v841_v40 = vunpack.c.l.s4 %v2942_v39 }
 0xdf6   : > { %v1882_v2 = vpop.permute.xlu1 %1881 }
 0xdf7   : > { %v1884_v41 = vsel %vm687_vm10, %v1882_v2, 0.0 }
 0xdf8   : > { %1885 = vadd.xlane.f32.xlu0 %v1884_v41 }
 0xdfc   : > { %1894 = vadd.xlane.f32.xlu0 %v1893_v42  ;;  %v842_v42 = vunpack.c.0.s8 %v841_v40 }
 0xe26   : > { %v1889_v43 = vpop.xlane.xlu0 %1888 }
 0xe7b   : > { %v1807_v44 = vpop.xlane.xlu1 %1806 }
 0xe7c   : > { %v1897_v48 = vrot.slane %v1807_v44, 6 }
 0xe7e   : > { %v1899_v55 = vmul.f32 %v1897_v48, %v1889_v43 }
 0xe7f   : > { %v1892_v47 = vpop.xlane.xlu1 %1891 }
 0xe80   : > { %v1847_v45 = vpop.xlane.xlu0 %1846  ;;  %v1940_v53 = vmul.f32 %v1897_v48, %v1892_v47 }
 0xe81   : > { %v1901_v46 = vrot.slane %v1847_v45, 6 }
 0xe83   : > { %v1941_v50 = vmul.f32 %v1901_v46, %v1889_v43  ;;  %v1903_v51 = vmul.f32 %v1901_v46, %v1892_v47 }
 0xe85   : > { %v1886_v49 = vpop.xlane.xlu0 %1885  ;;  %v1904_v62 = vadd.f32 %v1903_v51, %v1899_v55  ;;  %v1942_v5 = vadd.f32 %v1941_v50, %v1940_v53 }
 0xe86   : > { %v1906_v54 = vrot.slane %v1886_v49, 6  ;;  %v1418_v49 = vcombine.high %v3439_v18, %v3439_v18 }
 0xe88   : > { %v1925_v10 = vmul.f32 %v1906_v54, %v1892_v47  ;;  %v1958_v11 = vmul.f32 %v1906_v54, %v1889_v43  ;;  %v3607_v43 = vsub.s32 %v842_v42, %v3136_v14  ;;  %v1337_v47 = vcombine.high %v3419_v3, %v3419_v3 }
 0xe89   : > { %v1895_v56 = vpop.xlane.xlu0 %1894 }
 0xe8a   : > { %v1908_v59 = vmul.f32 %v1906_v54, %v1895_v56  ;;  %v1923_v60 = vmul.f32 %v1901_v46, %v1895_v56  ;;  %v1973_v61 = vmul.f32 %v1897_v48, %v1895_v56  ;;  %v846_v44 = vrot.slane %v3270_v58, %v3607_v43 }
 0xe8b   : > { %v928_v46 = vrot.slane %v3290_v4, %v3607_v43  ;;  %v889_v48 = vrot.slane %v3282_v63, %v3607_v43  ;;  %v1344_v58 = vrot.slane %v1337_v47, %v3607_v43  ;;  %v1425_v4 = vrot.slane %v1418_v49, %v3607_v43 }
 0xe8c   : > { %v1924_v12 = vadd.f32 %v1923_v60, %v1899_v55  ;;  %v1957_v15 = vadd.f32 %v1940_v53, %v1923_v60  ;;  %v1974_v16 = vadd.f32 %v1973_v61, %v1941_v50  ;;  %v1909_v17 = vadd.f32 %v1908_v59, %v1904_v62 }
 0xe8d   : > { %v1943_v22 = vadd.f32 %v1942_v5, %v1908_v59  ;;  %v1989_v25 = vadd.f32 %v1973_v61, %v1903_v51  ;;  %v847_v45 = vcombine.high %v846_v44, %v846_v44  ;;  %v929_v14 = vcombine.high %v928_v46, %v928_v46 }
 0xe8e   : > { %v1926_v28 = vadd.f32 %v1925_v10, %v1924_v12  ;;  %v1959_v24 = vadd.f32 %v1958_v11, %v1957_v15  ;;  %v1911_v7 = vrot.slane %v1909_v17, 4  ;;  %v1975_v30 = vadd.f32 %v1974_v16, %v1925_v10 }
 0xe8f   : > { %v1945_v20 = vrot.slane %v1943_v22, 4  ;;  %v1990_v33 = vadd.f32 %v1989_v25, %v1958_v11  ;;  %v1378_v50 = vcombine.high %v3431_v52, %v3431_v52  ;;  %v890_v51 = vcombine.high %v889_v48, %v889_v48 }
 0xe90   : > { %v1928_v27 = vrot.slane %v1926_v28, 4  ;;  %v1913_v29 = vsel %vm499_vm3, %v1911_v7, 0.0  ;;  %v1961_v32 = vrot.slane %v1959_v24, 4  ;;  %v1977_v36 = vrot.slane %v1975_v30, 4 }
 0xe91   : > { %1914 = vadd.xlane.f32.xlu1 %v1913_v29  ;;  %v1947_v35 = vsel %vm499_vm3, %v1945_v20, 0.0  ;;  %v1992_v38 = vrot.slane %v1990_v33, 4  ;;  %v1345_v3 = vcombine.high %v1344_v58, %v1344_v58  ;;  %v1385_v63 = vrot.slane %v1378_v50, %v3607_v43 }
 0xe92   : > { %v1930_v31 = vsel %vm499_vm3, %v1928_v27, 0.0  ;;  %v1963_v37 = vsel %vm499_vm3, %v1961_v32, 0.0  ;;  %v1979_v2 = vsel %vm499_vm3, %v1977_v36, 0.0  ;;  %v1833_v18 = vrot.slane %v3579_v9, %v3607_v43 }
 0xe93   : > { %1931 = vadd.xlane.f32.xlu0 %v1930_v31  ;;  %v1994_v41 = vsel %vm499_vm3, %v1992_v38, 0.0  ;;  %v1426_v53 = vcombine.high %v1425_v4, %v1425_v4  ;;  %v1793_v52 = vrot.slane %v3567_v19, %v3607_v43  ;;  %v1386_v54 = vcombine.high %v1385_v63, %v1385_v63 }
 0xe94   : > { %v1834_v55 = vcombine.high %v1833_v18, %v1833_v18  ;;  %v1872_v59 = vrot.slane %v3587_v34, %v3607_v43 }
 0xe95   : > { %1948 = vadd.xlane.f32.xlu1 %v1947_v35  ;;  %v1794_v56 = vcombine.high %v1793_v52, %v1793_v52 }
 0xe96   : > { %v1873_v9 = vcombine.high %v1872_v59, %v1872_v59 }
 0xe97   : > { %1964 = vadd.xlane.f32.xlu0 %v1963_v37 }
 0xe99   : > { %1980 = vadd.xlane.f32.xlu1 %v1979_v2 }
 0xe9b   : > { %1995 = vadd.xlane.f32.xlu0 %v1994_v41 }
 0xeaa   : > { %848 = vrot.lane.b32.xlu1 %v847_v45, %s2941_s5 }
 0xeae   : > { %930 = vrot.lane.b32.xlu1 %v929_v14, %s2941_s5  ;;  %v838_v14 = vld [vmem:[#allocation2] sm:$0xf] }
 0xeb1   : > { %891 = vrot.lane.b32.xlu0 %v890_v51, %s2941_s5 }
 0xeb2   : > { %1346 = vrot.lane.b32.xlu1 %v1345_v3, %s2941_s5  ;;  %v881_v3 = vld [vmem:[#allocation2 + $0xa] sm:$0xf] }
 0xeb5   : > { %1427 = vrot.lane.b32.xlu0 %v1426_v53, %s2941_s5 }
 0xeb6   : > { %1387 = vrot.lane.b32.xlu1 %v1386_v54, %s2941_s5 }
 0xeb9   : > { %1835 = vrot.lane.b32.xlu0 %v1834_v55, %s2941_s5 }
 0xeba   : > { %1795 = vrot.lane.b32.xlu1 %v1794_v56, %s2941_s5 }
 0xebe   : > { %1874 = vrot.lane.b32.xlu1 %v1873_v9, %s2941_s5  ;;  %v920_v9 = vld [vmem:[#allocation2 + $0x14] sm:$0xf] }
 0xf1e   : > { %v1915_v60 = vpop.xlane.xlu1 %1914 }
 0xf1f   : > { %v1916_v61 = vrot.slane %v1915_v60, 4 }
 0xf20   : > { %v1932_v19 = vpop.xlane.xlu0 %1931 }
 0xf21   : > { %v1933_v62 = vrot.slane %v1932_v19, 4  ;;  %v1917_v5 = vadd.f32 %v1916_v61, %v1915_v60 }
 0xf22   : > { %v1949_v11 = vpop.xlane.xlu1 %1948 }
 0xf23   : > { %v1934_v10 = vadd.f32 %v1933_v62, %v1932_v19  ;;  %v1918_v12 = vrot.slane %v1917_v5, 2  ;;  %v1950_v15 = vrot.slane %v1949_v11, 4  ;;  %v1096_v19 = vcombine.high %v3340_v57, %v3340_v57 }
 0xf24   : > { %v1965_v16 = vpop.xlane.xlu0 %1964 }
 0xf25   : > { %v1935_v17 = vrot.slane %v1934_v10, 2  ;;  %v1966_v22 = vrot.slane %v1965_v16, 4  ;;  %v1951_v34 = vadd.f32 %v1950_v15, %v1949_v11  ;;  %v1919_v25 = vadd.f32 %v1918_v12, %v1917_v5 }
 0xf26   : > { %v1981_v24 = vpop.xlane.xlu1 %1980  ;;  %v1103_v12 = vrot.slane %v1096_v19, %v3607_v43  ;;  %v1167_v15 = vcombine.high %v3360_v6, %v3360_v6 }
 0xf27   : > { %v1967_v28 = vadd.f32 %v1966_v22, %v1965_v16  ;;  %v1936_v7 = vadd.f32 %v1935_v17, %v1934_v10  ;;  %v1952_v27 = vrot.slane %v1951_v34, 2  ;;  %v1982_v29 = vrot.slane %v1981_v24, 4 }
 0xf28   : > { %v1996_v20 = vpop.xlane.xlu0 %1995  ;;  %v1920_v30 = vrot.slane %v1919_v25, 1  ;;  %v1132_v10 = vcombine.high %v3352_v0, %v3352_v0 }
 0xf29   : > { %v1968_v31 = vrot.slane %v1967_v28, 2  ;;  %v1997_v32 = vrot.slane %v1996_v20, 4  ;;  %v1937_v33 = vrot.slane %v1936_v7, 1  ;;  %v1983_v35 = vadd.f32 %v1982_v29, %v1981_v24 }
 0xf2a   : > { %v1921_v36 = vadd.f32 %v1920_v30, %v1919_v25  ;;  %v1953_v37 = vadd.f32 %v1952_v27, %v1951_v34  ;;  %v849_v39 = vpop.permute.xlu1 %848  ;;  %v1139_v16 = vrot.slane %v1132_v10, %v3607_v43  ;;  %v1174_v25 = vrot.slane %v1167_v15, %v3607_v43 }
 0xf2b   : > { %v1998_v38 = vadd.f32 %v1997_v32, %v1996_v20  ;;  %v1938_v40 = vadd.f32 %v1937_v33, %v1936_v7  ;;  %v1969_v2 = vadd.f32 %v1968_v31, %v1967_v28  ;;  %v1984_v41 = vrot.slane %v1983_v35, 2 }
 0xf2c   : > { %v850_v42 = vrot.slane %v849_v39, 6  ;;  %2705 = vpush %v1921_v36  ;;  %v892_v44 = vpop.permute.xlu0 %891  ;;  %v1954_v45 = vrot.slane %v1953_v37, 1 }
 0xf2d   : > { %v1999_v46 = vrot.slane %v1998_v38, 2  ;;  %v893_v47 = vrot.slane %v892_v44, 6  ;;  %2707 = vpush %v1938_v40  ;;  %v1970_v48 = vrot.slane %v1969_v2, 1  ;;  %v1985_v51 = vadd.f32 %v1984_v41, %v1983_v35 }
 0xf2e   : > { %v852_v50 = vsel %vm851_vm6, %v850_v42, %v849_v39  ;;  %v1955_v58 = vadd.f32 %v1954_v45, %v1953_v37  ;;  %v931_v18 = vpop.permute.xlu1 %930 }
 0xf2f   : > { %v854_v4 = vadd.f32 %v852_v50, %v838_v14  ;;  %v894_v63 = vsel %vm851_vm6, %v893_v47, %v892_v44  ;;  %v1971_v53 = vadd.f32 %v1970_v48, %v1969_v2  ;;  %v2000_v52 = vadd.f32 %v1999_v46, %v1998_v38 }
 0xf30   : > { %v896_v54 = vadd.f32 %v894_v63, %v881_v3  ;;  %v932_v55 = vrot.slane %v931_v18, 6  ;;  %2709 = vpush %v1955_v58  ;;  %v1986_v56 = vrot.slane %v1985_v51, 1  ;;  %v1428_v27 = vpop.permute.xlu0 %1427 }
 0xf31   : > { %857 = vst.msk [vmem:[#allocation2] sm:$0xf] %vm3640_vm8, %v854_v4  ;;  %v2001_v59 = vrot.slane %v2000_v52, 1  ;;  %v1429_v20 = vrot.slane %v1428_v27, 6 }
 0xf32   : > { %2711 = vpush %v1971_v53  ;;  %v933_v60 = vsel %vm851_vm6, %v932_v55, %v931_v18  ;;  %v1987_v61 = vadd.f32 %v1986_v56, %v1985_v51  ;;  %v1347_v11 = vpop.permute.xlu1 %1346  ;;  %v3710_v56 = vld [vmem:[%s3851_s3] ss:$0 sm:$0xff] }
 0xf33   : > { %897 = vst.msk [vmem:[#allocation2 + $0xa] sm:$0xf] %vm3640_vm8, %v896_v54  ;;  %v935_v62 = vadd.f32 %v933_v60, %v920_v9  ;;  %v2002_v5 = vadd.f32 %v2001_v59, %v2000_v52  ;;  %v1348_v7 = vrot.slane %v1347_v11, 6  ;;  %v1430_v37 = vsel %vm851_vm6, %v1429_v20, %v1428_v27 }
 0xf34   : > { %2713 = vpush %v1987_v61  ;;  %v1836_v45 = vpop.permute.xlu0 %1835 }
 0xf35   : > { %936 = vst.msk [vmem:[#allocation2 + $0x14] sm:$0xf] %vm3640_vm8, %v935_v62  ;;  %v1349_v6 = vsel %vm851_vm6, %v1348_v7, %v1347_v11  ;;  %v1837_v48 = vrot.slane %v1836_v45, 6 }
 0xf36   : > { %2715 = vpush %v2002_v5  ;;  %v1388_v28 = vpop.permute.xlu1 %1387 }
 0xf37   : > { %v1389_v29 = vrot.slane %v1388_v28, 6 }
 0xf38   : > { %v1094_v17 = vld [vmem:[#allocation2 + $0x2] sm:$0x3] }
 0xf39   : > { %v1105_v57 = vadd.f32 %v1103_v12, %v1094_v17  ;;  %v1390_v33 = vsel %vm851_vm6, %v1389_v29, %v1388_v28 }
 0xf3a   : > { %v1130_v22 = vld [vmem:[#allocation2 + $0xc] sm:$0x3]  ;;  %v1796_v41 = vpop.permute.xlu1 %1795 }
 0xf3b   : > { %v1141_v34 = vadd.f32 %v1139_v16, %v1130_v22  ;;  %1106 = vst [vmem:[#allocation2 + $0x2] sm:$0x3] %v1105_v57  ;;  %v1797_v47 = vrot.slane %v1796_v41, 6 }
 0xf3c   : > { %v1165_v0 = vld [vmem:[#allocation2 + $0x16] sm:$0x3] }
 0xf3d   : > { %1142 = vst [vmem:[#allocation2 + $0xc] sm:$0x3] %v1141_v34  ;;  %v1176_v24 = vadd.f32 %v1174_v25, %v1165_v0  ;;  %v1798_v58 = vsel %vm851_vm6, %v1797_v47, %v1796_v41 }
 0xf3e   : > { %v1875_v14 = vpop.permute.xlu1 %1874 }
 0xf3f   : > { %1177 = vst [vmem:[#allocation2 + $0x16] sm:$0x3] %v1176_v24  ;;  %v1876_v51 = vrot.slane %v1875_v14, 6 }
 0xf42   : > { %v1335_v30 = vld [vmem:[#allocation2 + $0x2] sm:$0xf] }
 0xf43   : > { %v1351_v31 = vadd.f32 %v1349_v6, %v1335_v30 }
 0xf44   : > { %v1376_v32 = vld [vmem:[#allocation2 + $0xc] sm:$0xf] }
 0xf45   : > { %v1392_v35 = vadd.f32 %v1390_v33, %v1376_v32  ;;  %1352 = vst.msk [vmem:[#allocation2 + $0x2] sm:$0xf] %vm3640_vm8, %v1351_v31  ;;  %v2127_v32 = vsel %vm1184_vm11, %v3445_v21, 0.0  ;;  %v2130_v33 = vsel %vm1184_vm11, %v3451_v8, 0.0 }
 0xf46   : > { %v1416_v36 = vld [vmem:[#allocation2 + $0x16] sm:$0xf] }
 0xf47   : > { %1393 = vst.msk [vmem:[#allocation2 + $0xc] sm:$0xf] %vm3640_vm8, %v1392_v35  ;;  %v1432_v38 = vadd.f32 %v1430_v37, %v1416_v36 }
 0xf49   : > { %1433 = vst.msk [vmem:[#allocation2 + $0x16] sm:$0xf] %vm3640_vm8, %v1432_v38  ;;  %v2133_v38 = vsel %vm1184_vm11, %v3154_v26, 0.0 }
 0xf4c   : > { %v1572_v39 = vld [vmem:[#allocation2 + $0x4] sm:$0x3] }
 0xf4d   : > { %v1573_v40 = vadd.f32 %v1572_v39, %v3497_v1  ;;  %v1838_v1 = vsel %vm851_vm6, %v1837_v48, %v1836_v45 }
 0xf4e   : > { %v1599_v2 = vld [vmem:[#allocation2 + $0xe] sm:$0x3] }
 0xf4f   : > { %v1600_v42 = vadd.f32 %v1599_v2, %v3509_v13  ;;  %1574 = vst [vmem:[#allocation2 + $0x4] sm:$0x3] %v1573_v40 }
 0xf50   : > { %v1625_v44 = vld [vmem:[#allocation2 + $0x18] sm:$0x3] }
 0xf51   : > { %1601 = vst [vmem:[#allocation2 + $0xe] sm:$0x3] %v1600_v42  ;;  %v1626_v46 = vadd.f32 %v1625_v44, %v3517_v23  ;;  %v1877_v23 = vsel %vm851_vm6, %v1876_v51, %v1875_v14 }
 0xf53   : > { %1627 = vst [vmem:[#allocation2 + $0x18] sm:$0x3] %v1626_v46 }
 0xf56   : > { %v1785_v50 = vld [vmem:[#allocation2 + $0x4] sm:$0xf] }
 0xf57   : > { %v1800_v3 = vadd.f32 %v1798_v58, %v1785_v50 }
 0xf58   : > { %v1825_v4 = vld [vmem:[#allocation2 + $0xe] sm:$0xf] }
 0xf59   : > { %v1840_v63 = vadd.f32 %v1838_v1, %v1825_v4  ;;  %1801 = vst.msk [vmem:[#allocation2 + $0x4] sm:$0xf] %vm3640_vm8, %v1800_v3 }
 0xf5a   : > { %v1864_v13 = vld [vmem:[#allocation2 + $0x18] sm:$0xf] }
 0xf5b   : > { %1841 = vst.msk [vmem:[#allocation2 + $0xe] sm:$0xf] %vm3640_vm8, %v1840_v63  ;;  %v1879_v18 = vadd.f32 %v1877_v23, %v1864_v13 }
 0xf5d   : > { %1880 = vst.msk [vmem:[#allocation2 + $0x18] sm:$0xf] %vm3640_vm8, %v1879_v18  ;;  %s2706_s7 = spop %2705 }
 0xf5e   : > { %s2708_s8 = spop %2707 }
 0xf5f   : > { %p2004_p7 = scmp.lt.f32.partialorder %s2708_s8, %s2706_s7 }
 0xf60   : > { %v2037_v11 = vld [vmem:[#allocation2 + $0x6] sm:$0x3] }
 0xf61   : > { %s4104_s8 = smov (!%p2004_p7, %s2708_s8), %s2706_s7  ;;  %s2710_s26 = spop %2709 }
 0xf62   : > { %p2007_p10 = scmp.lt.f32.partialorder %s2710_s26, %s4104_s8  ;;  %v2073_v57 = vld [vmem:[#allocation2 + $0x10] sm:$0x3] }
 0xf63   : > { %s2006_s25 = scalar_select %p2004_p7, 1, 0 }
 0xf64   : > { %s4106_s26 = smov (!%p2007_p10, %s2710_s26), %s4104_s8  ;;  %s2712_s11 = spop %2711  ;;  %v2108_v27 = vld [vmem:[#allocation2 + $0x1a] sm:$0x3] }
 0xf65   : > { %p2010_p8 = scmp.lt.f32.partialorder %s2712_s11, %s4106_s26  ;;  %s2714_s13 = spop %2713 }
 0xf66   : > { %s4110_s25 = smov (%p2007_p10, %s2006_s25), 2 }
 0xf67   : > { %s4108_s11 = smov (!%p2010_p8, %s2712_s11), %s4106_s26  ;;  %s2716_s14 = spop %2715 }
 0xf68   : > { %p2013_p0 = scmp.lt.f32.partialorder %s2714_s13, %s4108_s11  ;;  %s4112_s25 = smov (%p2010_p8, %s4110_s25), 3 }
 0xf6a   : > { %s4114_s13 = smov (!%p2013_p0, %s2714_s13), %s4108_s11  ;;  %s4116_s25 = smov (%p2013_p0, %s4112_s25), 4 }
 0xf6b   : > { %p2016_p5 = scmp.lt.f32.partialorder %s2716_s14, %s4114_s13 }
 0xf6d   : > { %s4118_s25 = smov (%p2016_p5, %s4116_s25), 5 }
 0xf6e   : > { %p2018_p11 = scmp.eq.s32.totalorder %s4118_s25, 2  ;;  %p2020_p2 = scmp.eq.s32.totalorder %s4118_s25, 3 }
 0xf6f   : > { %p2022_p1 = scmp.eq.s32.totalorder %s4118_s25, 4  ;;  %p2024_p4 = scmp.eq.s32.totalorder %s4118_s25, 5 }
 0xf70   : > { %s2019_s20 = scalar_select %p2018_p11, 1, 0 }
 0xf71   : > { %p2056_p6 = scmp.eq.s32.totalorder %s4118_s25, 1 }
 0xf72   : > { %s4120_s20 = smov (%p2020_p2, %s2019_s20), 1 }
 0xf73   : > { %s2057_s23 = scalar_select %p2056_p6, 2, 1 }
 0xf74   : > { %s2092_s28 = scalar_select %p2056_p6, 1, 2 }
 0xf75   : > { %s4122_s23 = smov (%p2018_p11, %s2057_s23), 0  ;;  %s4126_s20 = smov (%p2022_p1, %s4120_s20), 2 }
 0xf76   : > { %s4124_s28 = smov (%p2018_p11, %s2092_s28), 2  ;;  %s4128_s23 = smov (%p2020_p2, %s4122_s23), 2 }
 0xf77   : > { %s4130_s20 = smov (%p2024_p4, %s4126_s20), 2  ;;  %s4132_s23 = smov (%p2022_p1, %s4128_s23), 0 }
 0xf78   : > { %p2026_p9 = scmp.eq.s32.totalorder %s4130_s20, 1  ;;  %p2031_p13 = scmp.eq.s32.totalorder %s4130_s20, 2 }
 0xf79   : > { %s4134_s23 = smov (%p2024_p4, %s4132_s23), 1  ;;  %s4136_s28 = smov (%p2020_p2, %s4124_s28), 0 }
 0xf7a   : > { %s2027_s21 = scalar_select %p2026_p9, 1, 0 }
 0xf7b   : > { %s2032_s29 = scalar_select %p2031_p13, 1, 0 }
 0xf7c   : > { %v2028_v53 = vstv %s2027_s21  ;;  %p2062_p3 = scmp.eq.s32.totalorder %s4134_s23, 1  ;;  %p2067_p7 = scmp.eq.s32.totalorder %s4134_s23, 2 }
 0xf7d   : > { %vm2029_vm10 = vcmp.eq.s32.totalorder %v2028_v53, 1  ;;  %v2033_v52 = vstv %s2032_s29  ;;  %s4138_s28 = smov (%p2022_p1, %s4136_s28), 1 }
 0xf7e   : > { %v2030_v54 = vsel %vm2029_vm10, %v3451_v8, %v3445_v21  ;;  %vm2034_vm9 = vcmp.eq.s32.totalorder %v2033_v52, 1  ;;  %s2063_s10 = scalar_select %p2062_p3, 1, 0  ;;  %vm2382_vm10 = vcmask 7174  }
 0xf7f   : > { %v2035_v55 = vsel %vm2034_vm9, %v3154_v26, %v2030_v54  ;;  %s2068_s6 = scalar_select %p2067_p7, 1, 0  ;;  %vm2384_vm9 = vcmask 15374  }
 0xf80   : > { %v2036_v59 = vmul.f32 %v3710_v56, %v2035_v55  ;;  %v2064_v9 = vstv %s2063_s10  ;;  %s4140_s28 = smov (%p2024_p4, %s4138_s28), 0 }
 0xf81   : > { %vm2065_vm12 = vcmp.eq.s32.totalorder %v2064_v9, 1  ;;  %v2069_v60 = vstv %s2068_s6  ;;  %p2097_p10 = scmp.eq.s32.totalorder %s4140_s28, 1  ;;  %p2102_p8 = scmp.eq.s32.totalorder %s4140_s28, 2 }
 0xf82   : > { %2050 = vrot.lane.b32.xlu0 %v2036_v59, %s2941_s5  ;;  %v2039_v61 = vcombine.high %v2036_v59, %v2036_v59  ;;  %v2066_v19 = vsel %vm2065_vm12, %v3451_v8, %v3445_v21  ;;  %vm2070_vm13 = vcmp.eq.s32.totalorder %v2069_v60, 1 }
 0xf83   : > { %v2071_v62 = vsel %vm2070_vm13, %v3154_v26, %v2066_v19  ;;  %s2098_s26 = scalar_select %p2097_p10, 1, 0 }
 0xf84   : > { %v2046_v5 = vrot.slane %v2039_v61, %v3607_v43  ;;  %v2072_v10 = vmul.f32 %v3710_v56, %v2071_v62  ;;  %s2103_s11 = scalar_select %p2102_p8, 1, 0 }
 0xf85   : > { %v2099_v17 = vstv %s2098_s26 }
 0xf86   : > { %v2048_v12 = vadd.f32 %v2046_v5, %v2037_v11  ;;  %v2075_v15 = vcombine.high %v2072_v10, %v2072_v10  ;;  %2086 = vrot.lane.b32.xlu0 %v2072_v10, %s2941_s5  ;;  %vm2100_vm14 = vcmp.eq.s32.totalorder %v2099_v17, 1  ;;  %v2104_v22 = vstv %s2103_s11 }
 0xf87   : > { %v2101_v25 = vsel %vm2100_vm14, %v3451_v8, %v3445_v21  ;;  %vm2105_vm15 = vcmp.eq.s32.totalorder %v2104_v22, 1 }
 0xf88   : > { %2049 = vst [vmem:[#allocation2 + $0x6] sm:$0x3] %v2048_v12  ;;  %v2082_v16 = vrot.slane %v2075_v15, %v3607_v43  ;;  %v2106_v0 = vsel %vm2105_vm15, %v3154_v26, %v2101_v25 }
 0xf89   : > { %v2107_v28 = vmul.f32 %v3710_v56, %v2106_v0 }
 0xf8a   : > { %v2084_v34 = vadd.f32 %v2082_v16, %v2073_v57 }
 0xf8b   : > { %v2110_v24 = vcombine.high %v2107_v28, %v2107_v28 }
 0xf8c   : > { %2085 = vst [vmem:[#allocation2 + $0x10] sm:$0x3] %v2084_v34 }
 0xf8d   : > { %v2117_v7 = vrot.slane %v2110_v24, %v3607_v43 }
 0xf8f   : > { %v2119_v29 = vadd.f32 %v2117_v7, %v2108_v27 }
 0xf91   : > { %2120 = vst [vmem:[#allocation2 + $0x1a] sm:$0x3] %v2119_v29 }
 0xff4   : > { %v2051_v20 = vpop.permute.xlu0 %2050 }
 0xff5   : > { %v2053_v30 = vsel %vm943_vm1, %v2051_v20, 0.0 }
 0xff6   : > { %2054 = vadd.xlane.f32.xlu1 %v2053_v30 }
 0xff8   : > { %v2087_v6 = vpop.permute.xlu0 %2086 }
 0xff9   : > { %v2089_v31 = vsel %vm943_vm1, %v2087_v6, 0.0 }
 0xffa   : > { %2090 = vadd.xlane.f32.xlu0 %v2089_v31  ;;  %2128 = vadd.xlane.f32.xlu1 %v2127_v32 }
 0xffe   : > { %2131 = vadd.xlane.f32.xlu1 %v2130_v33 }
0x1010   : > { %2121 = vrot.lane.b32.xlu0 %v2107_v28, %s2941_s5 }
0x1083   : > { %v2055_v39 = vpop.xlane.xlu1 %2054 }
0x1084   : > { %v2137_v41 = vrot.slane %v2055_v39, 6 }
0x1087   : > { %v2091_v35 = vpop.xlane.xlu0 %2090  ;;  %v2129_v40 = vpop.xlane.xlu1 %2128 }
0x1088   : > { %v2141_v42 = vrot.slane %v2091_v35, 6  ;;  %v2139_v48 = vmul.f32 %v2137_v41, %v2129_v40 }
0x108a   : > { %v2181_v14 = vmul.f32 %v2141_v42, %v2129_v40 }
0x108b   : > { %v2122_v36 = vpop.permute.xlu0 %2121  ;;  %v2132_v2 = vpop.xlane.xlu1 %2131 }
0x108c   : > { %v2124_v37 = vsel %vm943_vm1, %v2122_v36, 0.0  ;;  %v2143_v45 = vmul.f32 %v2141_v42, %v2132_v2  ;;  %v2180_v46 = vmul.f32 %v2137_v41, %v2132_v2 }
0x108d   : > { %2125 = vadd.xlane.f32.xlu1 %v2124_v37 }
0x108e   : > { %v2144_v1 = vadd.f32 %v2143_v45, %v2139_v48  ;;  %v2182_v4 = vadd.f32 %v2181_v14, %v2180_v46 }
0x1091   : > { %2134 = vadd.xlane.f32.xlu1 %v2133_v38 }
0x111a   : > { %v2126_v44 = vpop.xlane.xlu1 %2125 }
0x111b   : > { %v2146_v47 = vrot.slane %v2126_v44, 6 }
0x111d   : > { %v2165_v3 = vmul.f32 %v2146_v47, %v2132_v2  ;;  %v2198_v54 = vmul.f32 %v2146_v47, %v2129_v40 }
0x111e   : > { %v2135_v50 = vpop.xlane.xlu1 %2134 }
0x111f   : > { %v2148_v58 = vmul.f32 %v2146_v47, %v2135_v50  ;;  %v2163_v51 = vmul.f32 %v2141_v42, %v2135_v50  ;;  %v2213_v13 = vmul.f32 %v2137_v41, %v2135_v50 }
0x1121   : > { %v2164_v63 = vadd.f32 %v2163_v51, %v2139_v48  ;;  %v2197_v23 = vadd.f32 %v2180_v46, %v2163_v51  ;;  %v2183_v18 = vadd.f32 %v2182_v4, %v2148_v58  ;;  %v2149_v53 = vadd.f32 %v2148_v58, %v2144_v1 }
0x1122   : > { %v2214_v9 = vadd.f32 %v2213_v13, %v2181_v14  ;;  %v2229_v5 = vadd.f32 %v2213_v13, %v2143_v45 }
0x1123   : > { %v2166_v52 = vadd.f32 %v2165_v3, %v2164_v63  ;;  %v2185_v55 = vrot.slane %v2183_v18, 6  ;;  %v2151_v59 = vrot.slane %v2149_v53, 6  ;;  %v2199_v62 = vadd.f32 %v2198_v54, %v2197_v23 }
0x1124   : > { %v2215_v12 = vadd.f32 %v2214_v9, %v2165_v3  ;;  %v2230_v17 = vadd.f32 %v2229_v5, %v2198_v54 }
0x1125   : > { %v2187_v60 = vsel %vm499_vm3, %v2185_v55, 0.0  ;;  %v2153_v61 = vsel %vm499_vm3, %v2151_v59, 0.0  ;;  %v2168_v19 = vrot.slane %v2166_v52, 6  ;;  %v2201_v11 = vrot.slane %v2199_v62, 6 }
0x1126   : > { %2188 = vadd.xlane.f32.xlu0 %v2187_v60  ;;  %2154 = vadd.xlane.f32.xlu1 %v2153_v61  ;;  %v2217_v16 = vrot.slane %v2215_v12, 6  ;;  %v2232_v22 = vrot.slane %v2230_v17, 6 }
0x1127   : > { %v2170_v10 = vsel %vm499_vm3, %v2168_v19, 0.0  ;;  %v2203_v15 = vsel %vm499_vm3, %v2201_v11, 0.0 }
0x1128   : > { %v2219_v57 = vsel %vm499_vm3, %v2217_v16, 0.0  ;;  %v2234_v34 = vsel %vm499_vm3, %v2232_v22, 0.0 }
0x112a   : > { %2171 = vadd.xlane.f32.xlu1 %v2170_v10 }
0x112e   : > { %2204 = vadd.xlane.f32.xlu1 %v2203_v15 }
0x1132   : > { %2220 = vadd.xlane.f32.xlu1 %v2219_v57 }
0x1136   : > { %2235 = vadd.xlane.f32.xlu1 %v2234_v34 }
0x11b3   : > { %v2189_v25 = vpop.xlane.xlu0 %2188  ;;  %v2155_v0 = vpop.xlane.xlu1 %2154 }
0x11b4   : > { %v2190_v28 = vrot.slane %v2189_v25, 4  ;;  %v2156_v24 = vrot.slane %v2155_v0, 4 }
0x11b6   : > { %v2191_v7 = vadd.f32 %v2190_v28, %v2189_v25  ;;  %v2157_v27 = vadd.f32 %v2156_v24, %v2155_v0 }
0x11b7   : > { %v2172_v29 = vpop.xlane.xlu1 %2171 }
0x11b8   : > { %v2192_v20 = vrot.slane %v2191_v7, 2  ;;  %v2158_v30 = vrot.slane %v2157_v27, 2  ;;  %v2173_v6 = vrot.slane %v2172_v29, 4 }
0x11ba   : > { %v2174_v31 = vadd.f32 %v2173_v6, %v2172_v29  ;;  %v2159_v32 = vadd.f32 %v2158_v30, %v2157_v27  ;;  %v2193_v35 = vadd.f32 %v2192_v20, %v2191_v7 }
0x11bb   : > { %v2205_v33 = vpop.xlane.xlu1 %2204 }
0x11bc   : > { %v2175_v36 = vrot.slane %v2174_v31, 2  ;;  %v2206_v37 = vrot.slane %v2205_v33, 4  ;;  %v2160_v38 = vrot.slane %v2159_v32, 1  ;;  %v2194_v42 = vrot.slane %v2193_v35, 1 }
0x11be   : > { %v2207_v39 = vadd.f32 %v2206_v37, %v2205_v33  ;;  %v2161_v40 = vadd.f32 %v2160_v38, %v2159_v32  ;;  %v2176_v2 = vadd.f32 %v2175_v36, %v2174_v31  ;;  %v2195_v58 = vadd.f32 %v2194_v42, %v2193_v35  ;;  %v2277_v32 = vld [vmem:[#allocation2 + $0x6] sm:$0xf]  ;;  %v2318_v36 = vld [vmem:[#allocation2 + $0x10] sm:$0xf] }
0x11bf   : > { %v2221_v41 = vpop.xlane.xlu1 %2220 }
0x11c0   : > { %v2208_v44 = vrot.slane %v2207_v39, 2  ;;  %v2222_v45 = vrot.slane %v2221_v41, 4  ;;  %2717 = vpush %v2161_v40  ;;  %v2177_v46 = vrot.slane %v2176_v2, 1 }
0x11c2   : > { %v2223_v47 = vadd.f32 %v2222_v45, %v2221_v41  ;;  %v2178_v48 = vadd.f32 %v2177_v46, %v2176_v2  ;;  %v2209_v14 = vadd.f32 %v2208_v44, %v2207_v39  ;;  %v2358_v46 = vld [vmem:[#allocation2 + $0x1a] sm:$0xf] }
0x11c3   : > { %v2236_v50 = vpop.xlane.xlu1 %2235 }
0x11c4   : > { %v2224_v51 = vrot.slane %v2223_v47, 2  ;;  %v2237_v1 = vrot.slane %v2236_v50, 4  ;;  %2719 = vpush %v2178_v48  ;;  %v2210_v4 = vrot.slane %v2209_v14, 1 }
0x11c5   : > { %2721 = vpush %v2195_v58 }
0x11c6   : > { %v2238_v3 = vadd.f32 %v2237_v1, %v2236_v50  ;;  %v2211_v63 = vadd.f32 %v2210_v4, %v2209_v14  ;;  %v2225_v13 = vadd.f32 %v2224_v51, %v2223_v47 }
0x11c8   : > { %v2239_v23 = vrot.slane %v2238_v3, 2  ;;  %2723 = vpush %v2211_v63  ;;  %v2226_v18 = vrot.slane %v2225_v13, 1 }
0x11ca   : > { %v2227_v53 = vadd.f32 %v2226_v18, %v2225_v13  ;;  %v2240_v52 = vadd.f32 %v2239_v23, %v2238_v3 }
0x11cc   : > { %2725 = vpush %v2227_v53  ;;  %v2241_v54 = vrot.slane %v2240_v52, 1 }
0x11ce   : > { %v2242_v55 = vadd.f32 %v2241_v54, %v2240_v52 }
0x11d0   : > { %2727 = vpush %v2242_v55 }
0x11f1   : > { %s2718_s25 = spop %2717 }
0x11f5   : > { %s2720_s13 = spop %2719 }
0x11f6   : > { %p2244_p0 = scmp.lt.f32.partialorder %s2720_s13, %s2718_s25  ;;  %s2722_s14 = spop %2721 }
0x11f8   : > { %s4142_s13 = smov (!%p2244_p0, %s2720_s13), %s2718_s25 }
0x11f9   : > { %s2246_s20 = scalar_select %p2244_p0, 1, 0 }
0x11fa   : > { %p2247_p5 = scmp.lt.f32.partialorder %s2722_s14, %s4142_s13  ;;  %s2724_s23 = spop %2723 }
0x11fc   : > { %s4144_s14 = smov (!%p2247_p5, %s2722_s14), %s4142_s13  ;;  %s4146_s20 = smov (%p2247_p5, %s2246_s20), 2 }
0x11fd   : > { %p2250_p11 = scmp.lt.f32.partialorder %s2724_s23, %s4144_s14  ;;  %s2726_s28 = spop %2725 }
0x11ff   : > { %s4148_s23 = smov (!%p2250_p11, %s2724_s23), %s4144_s14  ;;  %s4150_s20 = smov (%p2250_p11, %s4146_s20), 3 }
0x1200   : > { %p2253_p2 = scmp.lt.f32.partialorder %s2726_s28, %s4148_s23 }
0x1201   : > { %s2728_s21 = spop %2727 }
0x1202   : > { %s4152_s28 = smov (!%p2253_p2, %s2726_s28), %s4148_s23  ;;  %s4154_s20 = smov (%p2253_p2, %s4150_s20), 4 }
0x1203   : > { %p2256_p1 = scmp.lt.f32.partialorder %s2728_s21, %s4152_s28  ;;  %s2414_s28 = sshll.u32 %s3119_s9, 4  ;;  %s3805_s28 = int_to_ptr.vmem [resolvable:$true] %s2414_s28 }
0x1204   : > { %s2401_s21 = scalar_lea.sflag [#allocation7], %s3104_s12 }
0x1205   : > { %s4156_s20 = smov (%p2256_p1, %s4154_s20), 5 }
0x1206   : > { %p2258_p4 = scmp.eq.s32.totalorder %s4156_s20, 2  ;;  %p2260_p6 = scmp.eq.s32.totalorder %s4156_s20, 3 }
0x1207   : > { %p2262_p9 = scmp.eq.s32.totalorder %s4156_s20, 4  ;;  %p2264_p13 = scmp.eq.s32.totalorder %s4156_s20, 5 }
0x1208   : > { %s2259_s29 = scalar_select %p2258_p4, 1, 0 }
0x1209   : > { %p2301_p3 = scmp.eq.s32.totalorder %s4156_s20, 1 }
0x120a   : > { %s4158_s29 = smov (%p2260_p6, %s2259_s29), 1 }
0x120b   : > { %s2302_s10 = scalar_select %p2301_p3, 2, 1 }
0x120c   : > { %s2342_s6 = scalar_select %p2301_p3, 1, 2 }
0x120d   : > { %s4160_s10 = smov (%p2258_p4, %s2302_s10), 0  ;;  %s4164_s29 = smov (%p2262_p9, %s4158_s29), 2 }
0x120e   : > { %s4162_s6 = smov (%p2258_p4, %s2342_s6), 2  ;;  %s4168_s29 = smov (%p2264_p13, %s4164_s29), 2 }
0x120f   : > { %s4166_s6 = smov (%p2260_p6, %s4162_s6), 0  ;;  %p2266_p7 = scmp.eq.s32.totalorder %s4168_s29, 1 }
0x1210   : > { %s4170_s6 = smov (%p2262_p9, %s4166_s6), 1  ;;  %p2271_p10 = scmp.eq.s32.totalorder %s4168_s29, 2 }
0x1211   : > { %s4172_s10 = smov (%p2260_p6, %s4160_s10), 2  ;;  %s4176_s6 = smov (%p2264_p13, %s4170_s6), 0 }
0x1212   : > { %s2267_s7 = scalar_select %p2266_p7, 1, 0 }
0x1213   : > { %s2272_s8 = scalar_select %p2271_p10, 1, 0 }
0x1214   : > { %v2268_v59 = vstv %s2267_s7  ;;  %s4174_s10 = smov (%p2262_p9, %s4172_s10), 0  ;;  %p2347_p5 = scmp.eq.s32.totalorder %s4176_s6, 1 }
0x1215   : > { %vm2269_vm3 = vcmp.eq.s32.totalorder %v2268_v59, 1  ;;  %v2273_v9 = vstv %s2272_s8  ;;  %s4178_s10 = smov (%p2264_p13, %s4174_s10), 1  ;;  %p2352_p11 = scmp.eq.s32.totalorder %s4176_s6, 2 }
0x1216   : > { %v2270_v60 = vsel %vm2269_vm3, %v3451_v8, %v3445_v21  ;;  %vm2274_vm1 = vcmp.eq.s32.totalorder %v2273_v9, 1  ;;  %p2307_p8 = scmp.eq.s32.totalorder %s4178_s10, 1  ;;  %p2312_p0 = scmp.eq.s32.totalorder %s4178_s10, 2 }
0x1217   : > { %v2275_v61 = vsel %vm2274_vm1, %v3154_v26, %v2270_v60  ;;  %s2348_s25 = scalar_select %p2347_p5, 1, 0 }
0x1218   : > { %v2276_v19 = vmul.f32 %v3710_v56, %v2275_v61  ;;  %s2308_s26 = scalar_select %p2307_p8, 1, 0 }
0x1219   : > { %s2313_s11 = scalar_select %p2312_p0, 1, 0  ;;  %v2349_v25 = vstv %s2348_s25 }
0x121a   : > { %2295 = vrot.lane.b32.xlu0 %v2276_v19, %s2941_s5  ;;  %v2279_v62 = vcombine.high %v2276_v19, %v2276_v19  ;;  %v2309_v5 = vstv %s2308_s26  ;;  %s2353_s13 = scalar_select %p2352_p11, 1, 0  ;;  %vm2350_vm5 = vcmp.eq.s32.totalorder %v2349_v25, 1 }
0x121b   : > { %vm2310_vm0 = vcmp.eq.s32.totalorder %v2309_v5, 1  ;;  %v2314_v11 = vstv %s2313_s11  ;;  %v2351_v28 = vsel %vm2350_vm5, %v3451_v8, %v3445_v21  ;;  %s2859_s29 = scalar_lea.vmem %s3805_s28, 384  ;;  %s2943_s10 = smov [#allocation10]  }
0x121c   : > { %v2286_v10 = vrot.slane %v2279_v62, %v3607_v43  ;;  %v2311_v12 = vsel %vm2310_vm0, %v3451_v8, %v3445_v21  ;;  %vm2315_vm4 = vcmp.eq.s32.totalorder %v2314_v11, 1  ;;  %v2354_v0 = vstv %s2353_s13  ;;  %p2860_p2 = scmp.ne.s32.totalorder %s3805_s28, %s2859_s29  ;;  %s2863_s6 = sshll.u32 %s2943_s10, 4  ;;  %s2864_s6 = int_to_ptr.vmem [resolvable:$false] %s2863_s6 }
0x121d   : > { %v2316_v16 = vsel %vm2315_vm4, %v3154_v26, %v2311_v12  ;;  %vm2355_vm7 = vcmp.eq.s32.totalorder %v2354_v0, 1  ;;  %p2866_p6 = scmp.lt.s32.totalorder %s3805_s28, %s2864_s6 }
0x121e   : > { %v2287_v15 = vcombine.high %v2286_v10, %v2286_v10  ;;  %v2317_v17 = vmul.f32 %v3710_v56, %v2316_v16  ;;  %v2356_v27 = vsel %vm2355_vm7, %v3154_v26, %v2351_v28  ;;  %p2861_p1 = pnand %p2860_p2, %p3056_p12 }
0x121f   : > { %v2357_v29 = vmul.f32 %v3710_v56, %v2356_v27 }
0x1220   : > { %2288 = vrot.lane.b32.xlu1 %v2287_v15, %s2941_s5  ;;  %v2320_v57 = vcombine.high %v2317_v17, %v2317_v17  ;;  %2336 = vrot.lane.b32.xlu0 %v2317_v17, %s2941_s5  ;;  %p2862_p4 = pneg %p2861_p1 }
0x1221   : > { %v2360_v35 = vcombine.high %v2357_v29, %v2357_v29 }
0x1222   : > { %v2327_v22 = vrot.slane %v2320_v57, %v3607_v43 }
0x1223   : > { %v2367_v8 = vrot.slane %v2360_v35, %v3607_v43 }
0x1224   : > { %v2328_v34 = vcombine.high %v2327_v22, %v2327_v22 }
0x1225   : > { %v2368_v38 = vcombine.high %v2367_v8, %v2367_v8 }
0x1226   : > { %2329 = vrot.lane.b32.xlu0 %v2328_v34, %s2941_s5 }
0x128c   : > { %v2296_v24 = vpop.permute.xlu0 %2295 }
0x128d   : > { %v2298_v7 = vsel %vm1184_vm11, %v2296_v24, 0.0 }
0x128e   : > { %2299 = vadd.xlane.f32.xlu1 %v2298_v7 }
0x1292   : > { %v2289_v20 = vpop.permute.xlu1 %2288  ;;  %v2337_v6 = vpop.permute.xlu0 %2336 }
0x1293   : > { %v2290_v30 = vrot.slane %v2289_v20, 6  ;;  %v2339_v31 = vsel %vm1184_vm11, %v2337_v6, 0.0 }
0x1294   : > { %2340 = vadd.xlane.f32.xlu0 %v2339_v31 }
0x1295   : > { %v2291_v33 = vsel %vm851_vm6, %v2290_v30, %v2289_v20 }
0x1296   : > { %v2293_v21 = vadd.f32 %v2291_v33, %v2277_v32 }
0x1298   : > { %2294 = vst.msk [vmem:[#allocation2 + $0x6] sm:$0xf] %vm3640_vm8, %v2293_v21  ;;  %v2330_v26 = vpop.permute.xlu0 %2329 }
0x1299   : > { %v2331_v56 = vrot.slane %v2330_v26, 6 }
0x129b   : > { %v2332_v37 = vsel %vm851_vm6, %v2331_v56, %v2330_v26 }
0x129c   : > { %v2334_v39 = vadd.f32 %v2332_v37, %v2318_v36 }
0x129e   : > { %2335 = vst.msk [vmem:[#allocation2 + $0x10] sm:$0xf] %vm3640_vm8, %v2334_v39 }
0x129f   : > { %v2394_v40 = vld [vmem:[#allocation2 + $0x8] sm:$0x3]  ;;  %2369 = vrot.lane.b32.xlu1 %v2368_v38, %s2941_s5  ;;  %v2388_v2 = vld [vmem:[#allocation2] sm:$0xff] }
0x12a0   : > { %2397 = vst.msk [vmem:[#allocation3] sm:$0x3] %vm244_vm2, %v2394_v40  ;;  %2391 = vst [vmem:[%s3119_s9] sm:$0xff] %v2388_v2 }
0x12a3   : > { %2376 = vrot.lane.b32.xlu1 %v2357_v29, %s2941_s5  ;;  %s2514_s5 = sshll.u32 %s2993_s19, 7  ;;  %s2865_s19 = scalar_lea.vmem %s2864_s6, 768 }
0x12a4   : > { %s3802_s23 = scalar_lea.hbm %s3852_s4, %s2514_s5  ;;  %p2867_p9 = scmp.lt.s32.totalorder %s2865_s19, %s2859_s29 }
0x12a5   : > { %v2395_v43 = vld [vmem:[#allocation2 + $0x12] sm:$0x3]  ;;  %v2389_v41 = vld [vmem:[#allocation2 + $0xa] sm:$0xff] }
0x12a6   : > { %2398 = vst.msk [vmem:[#allocation3 + $0x2] sm:$0x3] %vm244_vm2, %v2395_v43  ;;  %2392 = vst [vmem:[%s3119_s9 + $0x8] sm:$0xff] %v2389_v41  ;;  %p2868_p13 = por %p2867_p9, %p2866_p6 }
0x12a8   : > { %p2869_p3 = pnand %p2868_p13, %p2862_p4 }
0x131b   : > { %v2300_v42 = vpop.xlane.xlu1 %2299 }
0x131c   : > { %2383 = vst.msk [vmem:[#allocation4 - $0x6] sm:$0xc0] %vm2382_vm10, %v2300_v42 }
0x131f   : > { %v2370_v44 = vpop.permute.xlu1 %2369 }
0x1320   : > { %v2371_v45 = vrot.slane %v2370_v44, 6 }
0x1321   : > { %v2341_v48 = vpop.xlane.xlu0 %2340 }
0x1322   : > { %v2372_v47 = vsel %vm851_vm6, %v2371_v45, %v2370_v44  ;;  %2385 = vst.msk [vmem:[#allocation4 - $0x6] sm:$0xc0] %vm2384_vm9, %v2341_v48 }
0x1323   : > { %v2374_v14 = vadd.f32 %v2372_v47, %v2358_v46  ;;  %v2377_v50 = vpop.permute.xlu1 %2376 }
0x1324   : > { %v2379_v58 = vsel %vm1184_vm11, %v2377_v50, 0.0 }
0x1325   : > { %2375 = vst.msk [vmem:[#allocation2 + $0x1a] sm:$0xf] %vm3640_vm8, %v2374_v14  ;;  %2380 = vadd.xlane.f32.xlu1 %v2379_v58 }
0x132c   : > { %v2396_v51 = vld [vmem:[#allocation2 + $0x1c] sm:$0x3]  ;;  %v2390_v1 = vld [vmem:[#allocation2 + $0x14] sm:$0xff] }
0x132d   : > { %2399 = vst.msk [vmem:[#allocation3 + $0x4] sm:$0x3] %vm244_vm2, %v2396_v51  ;;  %2393 = vst [vmem:[%s3119_s9 + $0x10] sm:$0xff] %v2390_v1 }
0x132e   : > { %2872 = shalt.err (!%p2869_p3)
}
0x132f   : > { %s2873_s9 = scalar_lea.hbm %s3802_s23, 384  ;;  %s2877_s26 = scalar_lea.hbm %s3852_s4, 1920 }
0x1330   : > { %p2874_p7 = scmp.ne.s32.totalorder %s3802_s23, %s2873_s9  ;;  %p2878_p0 = scmp.lt.u32.totalorder %s3802_s23, %s3852_s4 }
0x1331   : > { %p2879_p5 = scmp.lt.u32.totalorder %s2877_s26, %s2873_s9  ;;  %p2881_p2 = scmp.lt.u32.totalorder %s2873_s9, %s3802_s23 }
0x1332   : > { %p2875_p10 = pnand %p2874_p7, %p3056_p12 }
0x1333   : > { %p2880_p11 = por %p2879_p5, %p2878_p0 }
0x1334   : > { %p2876_p8 = pneg %p2875_p10 }
0x1335   : > { %p2882_p1 = por %p2881_p2, %p2880_p11 }
0x1337   : > { %p2883_p4 = pnand %p2882_p1, %p2876_p8 }
0x1339   : > { %2886 = shalt.err (!%p2883_p4)
}
0x133a   : > { %s2944_s13 = smov 128   ;;  %s2945_s5 = smov 640   ;;  %vm2386_vm2 = vcmask 23574  }
0x133b   : > { %s2946_s14 = smov 8  }
0x133c   : > { %2735 = dma.vmem_to_hbm [thread:$0]  (%p3056_p12), %s3805_s28, 384, %s3802_s23, %s2401_s21, %s2944_s13, %s2945_s5, %s2946_s14  }
0x13b2   : > { %v2381_v49 = vpop.xlane.xlu1 %2380 }
0x13b3   : > { %2387 = vst.msk [vmem:[#allocation4 - $0x6] sm:$0xc0] %vm2386_vm2, %v2381_v49 }
0x13b4 PF: > { %p2752_p6 = scmp.ge.s32.totalorder %s2929_s18, 2  ;;  %s2429_s20 = sand.u32 1, %s2917_s15  }
0x13b5   : > { %p3870_p9 = scmp.ne.s32.totalorder %s3857_s22, 0  ;;  %s2430_s29 = scalar_lea.sflag [#allocation7], %s2429_s20 }
0x13b7   : > { %p2746_p13 = pnand %p2752_p6, %p3870_p9 }
0x13b9   : > { %2912 = dma.done.wait (!%p2746_p13), %s2430_s29, 384  }
0x13ba   : > { %2914 = vsyncadd (!%p2746_p13), %s2430_s29, 4294966912  ;;  %p18_p12 = scmp.ge.s32.totalorder %s3026_s27, 7   ;;  %s3871_s15 = smov %s2921_s16 }
0x13bb   : > { %s3872_s16 = smov %s2925_s17  ;;  %s3873_s17 = smov %s3052_s24 }
0x13bc   : > { %s3874_s18 = smov %s3026_s27  ;;  %20 = sbr.rel (!%p18_p12) target bundleno = 6 (0x6), region = 91 }
0x13c3   :  { %2435 = vsyncpa [#allocation6], 1 }
0x13c4   :  { %2437 = vsyncpa [#allocation6 + $0x1], 1 }
0x13c5   :  { %2438 = vsyncpa [#allocation9], 1 }
0x13c6   :  { %2439 = vsyncpa [#allocation7], 1 }
0x13c7   :  { %2441 = vsyncpa [#allocation7 + $0x1], 1 }

</bundles_post_ra>
